<compile_context>
chip_gen: v7x
topology: tpu7x:2x2x1
jax: 0.10.0
libtpu: 0.0.40
codegen_flags: <defaults>
</compile_context>

<pallas_src>
import jax
import jax.numpy as jnp
from jax.experimental import pallas as pl
from jax.experimental.pallas import tpu as pltpu

INPUT_SIZE = 3072
HIDDEN_SIZE = 128


def mlp_kernel(x_ref, w1_ref, b1_ref, w2_ref, b2_ref, w3_ref, b3_ref,
               wp_ref, bp_ref, o_ref):
    # fc -> (dropout: identity at eval) -> relu
    h = jnp.dot(x_ref[...], w1_ref[...], preferred_element_type=jnp.float32)
    h = jnp.maximum(h + b1_ref[...], 0.0)
    # fc2 -> (dropout) -> relu
    h = jnp.dot(h.astype(jnp.bfloat16), w2_ref[...],
                preferred_element_type=jnp.float32)
    h = jnp.maximum(h + b2_ref[...], 0.0)
    # fc3 -> (dropout) -> relu
    h = jnp.dot(h.astype(jnp.bfloat16), w3_ref[...],
                preferred_element_type=jnp.float32)
    h = jnp.maximum(h + b3_ref[...], 0.0)
    # predict: [H] -> 1 projection as a VPU multiply + lane reduction.  An N=1
    # MXU matmul would use 1/128..1/256 of the lanes and still pay push/pop.
    out = jnp.sum(h * wp_ref[...], axis=-1, keepdims=True) + bp_ref[0, 0]
    # Lane-dense store: broadcast the per-row scalar across 128 lanes; the
    # wrapper slices column 0.  Avoids masked partial stores every grid step.
    o_ref[...] = jnp.broadcast_to(out, o_ref.shape).astype(o_ref.dtype)


def _pick_tile_b(batch):
    """Largest MXU-friendly batch tile, preferring >= 2 grid steps (keeps both
    v7x TensorCores busy).  Worst case x tile 256x3072 bf16 = 1.5 MiB (x2 for
    double buffering) fits every generation's scoped VMEM default."""
    candidates = (256, 128, 64, 32, 16, 8)
    for t in candidates:
        if batch % t == 0 and batch // t >= 2:
            return t
    for t in candidates:
        if batch % t == 0:
            return t
    return batch  # single full-batch block (block dim == array dim is legal)


def nn_forward(x, params, *, tile_b=None):
    """x: [B, INPUT_SIZE] float32 -> [B, 1] float32."""
    w1, b1, w2, b2, w3, b3, wp, bp = params
    B, D = x.shape
    H = w1.shape[1]
    assert D == w1.shape[0]
    if tile_b is None:
        tile_b = _pick_tile_b(B)
    assert B % tile_b == 0, "batch must be a multiple of tile_b"

    # bf16 for the big operands (f32 accumulation); tiny predict weight and all
    # biases stay f32.
    xb = x.astype(jnp.bfloat16)
    w1b = w1.astype(jnp.bfloat16)
    w2b = w2.astype(jnp.bfloat16)
    w3b = w3.astype(jnp.bfloat16)
    wp_row = wp.reshape(1, H).astype(jnp.float32)
    bp_s = bp.reshape(1, 1).astype(jnp.float32)

    def vmem_resident():
        # Whole array resident in VMEM for the entire kernel: one DMA, no
        # per-iteration re-fetch, no double buffering.
        return pl.BlockSpec(memory_space=pltpu.MemorySpace.VMEM)

    out_padded = pl.pallas_call(
        mlp_kernel,
        out_shape=jax.ShapeDtypeStruct((B, H), jnp.float32),
        grid_spec=pltpu.PrefetchScalarGridSpec(
            num_scalar_prefetch=0,
            grid=(B // tile_b,),
            in_specs=[
                pl.BlockSpec((tile_b, D), lambda i: (i, 0)),        # x tile (bf16)
                vmem_resident(), vmem_resident(),                   # fc:  w1, b1
                vmem_resident(), vmem_resident(),                   # fc2: w2, b2
                vmem_resident(), vmem_resident(),                   # fc3: w3, b3
                vmem_resident(),                                    # predict weight row
                pl.BlockSpec(memory_space=pltpu.MemorySpace.SMEM),  # predict bias scalar
            ],
            out_specs=pl.BlockSpec((tile_b, H), lambda i: (i, 0)),  # lane-dense out
        ),
        compiler_params=pltpu.CompilerParams(
            dimension_semantics=("parallel",)),
    )(xb, w1b, b1, w2b, b2, w3b, b3, wp_row, bp_s)

    # Only lane 0 of each row carries the prediction.
    return out_padded[:, :1]


def init_linear(key, fan_in, fan_out):
    """PyTorch nn.Linear default init: U(-1/sqrt(fan_in), 1/sqrt(fan_in)).
    Weight returned transposed as [in, out] for y = x @ W + b."""
    kw, kb = jax.random.split(key)
    bound = 1.0 / jnp.sqrt(jnp.float32(fan_in))
    w = jax.random.uniform(kw, (fan_in, fan_out), jnp.float32, -bound, bound)
    b = jax.random.uniform(kb, (1, fan_out), jnp.float32, -bound, bound)
    return w, b


if __name__ == "__main__":
    key = jax.random.PRNGKey(0)
    kx, k1, k2, k3, k4 = jax.random.split(key, 5)

    batch = 256  # features fixed by the module: 3072 -> 128 -> 128 -> 128 -> 1
    x = jax.random.normal(kx, (batch, INPUT_SIZE), jnp.float32)

    w1, b1 = init_linear(k1, INPUT_SIZE, HIDDEN_SIZE)
    w2, b2 = init_linear(k2, HIDDEN_SIZE, HIDDEN_SIZE)
    w3, b3 = init_linear(k3, HIDDEN_SIZE, HIDDEN_SIZE)
    wp, bp = init_linear(k4, HIDDEN_SIZE, 1)
    params = (w1, b1, w2, b2, w3, b3, wp, bp)

    out = nn_forward(x, params)
    out = jax.block_until_ready(out)

    # Pure-JAX reference with the same bf16-in / f32-accumulate recipe.
    def ref(x):
        h = jnp.dot(x.astype(jnp.bfloat16), w1.astype(jnp.bfloat16),
                    preferred_element_type=jnp.float32)
        h = jnp.maximum(h + b1, 0.0)
        h = jnp.dot(h.astype(jnp.bfloat16), w2.astype(jnp.bfloat16),
                    preferred_element_type=jnp.float32)
        h = jnp.maximum(h + b2, 0.0)
        h = jnp.dot(h.astype(jnp.bfloat16), w3.astype(jnp.bfloat16),
                    preferred_element_type=jnp.float32)
        h = jnp.maximum(h + b3, 0.0)
        return jnp.sum(h * wp.reshape(1, -1), axis=-1, keepdims=True) + bp.reshape(1, 1)

    expected = ref(x)
    assert out.shape == (batch, 1)
    assert jnp.allclose(out, expected, atol=1e-2, rtol=1e-2)

    print("KERNEL_OK")
</pallas_src>

<mosaic_0001>
module attributes {stable_mosaic.version = 11 : i64} {
  func.func @mlp_kernel(%arg0: i32, %arg1: memref<128x3072xbf16, #tpu.memory_space<vmem>>, %arg2: memref<3072x128xbf16, #tpu.memory_space<vmem>>, %arg3: memref<1x128xf32, #tpu.memory_space<vmem>>, %arg4: memref<128x128xbf16, #tpu.memory_space<vmem>>, %arg5: memref<1x128xf32, #tpu.memory_space<vmem>>, %arg6: memref<128x128xbf16, #tpu.memory_space<vmem>>, %arg7: memref<1x128xf32, #tpu.memory_space<vmem>>, %arg8: memref<1x128xf32, #tpu.memory_space<vmem>>, %arg9: memref<1x1xf32, #tpu.memory_space<smem>>, %arg10: memref<128x128xf32, #tpu.memory_space<vmem>>) attributes {dimension_semantics = [#tpu.dimension_semantics<parallel>], iteration_bounds = array<i64: 2>, scalar_prefetch = 0 : i64, scratch_operands = 0 : i64, tpu.core_type = #tpu.core_type<tc>, window_params = [{transform_indices = @transform_0, window_bounds = array<i64: 128, 3072>}, {pipeline_mode = #tpu.pipeline_mode<synchronous>, transform_indices = @transform_1, window_bounds = array<i64: 3072, 128>}, {pipeline_mode = #tpu.pipeline_mode<synchronous>, transform_indices = @transform_2, window_bounds = array<i64: 1, 128>}, {pipeline_mode = #tpu.pipeline_mode<synchronous>, transform_indices = @transform_3, window_bounds = array<i64: 128, 128>}, {pipeline_mode = #tpu.pipeline_mode<synchronous>, transform_indices = @transform_4, window_bounds = array<i64: 1, 128>}, {pipeline_mode = #tpu.pipeline_mode<synchronous>, transform_indices = @transform_5, window_bounds = array<i64: 128, 128>}, {pipeline_mode = #tpu.pipeline_mode<synchronous>, transform_indices = @transform_6, window_bounds = array<i64: 1, 128>}, {pipeline_mode = #tpu.pipeline_mode<synchronous>, transform_indices = @transform_7, window_bounds = array<i64: 1, 128>}, {transform_indices = @transform_8, window_bounds = array<i64: 1, 1>}, {transform_indices = @transform_9, window_bounds = array<i64: 128, 128>}]} {
    %c0 = arith.constant 0 : index
    %c0_0 = arith.constant 0 : index
    %0 = vector.load %arg1[%c0, %c0_0] : memref<128x3072xbf16, #tpu.memory_space<vmem>>, vector<128x3072xbf16>
    %c0_1 = arith.constant 0 : index
    %c0_2 = arith.constant 0 : index
    %1 = vector.load %arg2[%c0_1, %c0_2] : memref<3072x128xbf16, #tpu.memory_space<vmem>>, vector<3072x128xbf16>
    %cst = arith.constant dense<0.000000e+00> : vector<128x128xf32>
    %2 = tpu.matmul %0, %1, %cst {dimension_numbers = #tpu.dot_dimension_numbers<[1], [0], [0], [1], [0, 0, 1, 1], [], []>} : vector<128x3072xbf16>, vector<3072x128xbf16>, vector<128x128xf32> -> vector<128x128xf32>
    %c0_3 = arith.constant 0 : index
    %c0_4 = arith.constant 0 : index
    %3 = vector.load %arg3[%c0_3, %c0_4] : memref<1x128xf32, #tpu.memory_space<vmem>>, vector<1x128xf32>
    %4 = vector.broadcast %3 : vector<1x128xf32> to vector<128x128xf32>
    %5 = arith.addf %2, %4 : vector<128x128xf32>
    %cst_5 = arith.constant 0.000000e+00 : f32
    %6 = vector.broadcast %cst_5 : f32 to vector<128x128xf32>
    %7 = arith.maximumf %5, %6 : vector<128x128xf32>
    %8 = arith.truncf %7 : vector<128x128xf32> to vector<128x128xbf16>
    %c0_6 = arith.constant 0 : index
    %c0_7 = arith.constant 0 : index
    %9 = vector.load %arg4[%c0_6, %c0_7] : memref<128x128xbf16, #tpu.memory_space<vmem>>, vector<128x128xbf16>
    %cst_8 = arith.constant dense<0.000000e+00> : vector<128x128xf32>
    %10 = tpu.matmul %8, %9, %cst_8 {dimension_numbers = #tpu.dot_dimension_numbers<[1], [0], [0], [1], [0, 0, 1, 1], [], []>} : vector<128x128xbf16>, vector<128x128xbf16>, vector<128x128xf32> -> vector<128x128xf32>
    %c0_9 = arith.constant 0 : index
    %c0_10 = arith.constant 0 : index
    %11 = vector.load %arg5[%c0_9, %c0_10] : memref<1x128xf32, #tpu.memory_space<vmem>>, vector<1x128xf32>
    %12 = vector.broadcast %11 : vector<1x128xf32> to vector<128x128xf32>
    %13 = arith.addf %10, %12 : vector<128x128xf32>
    %cst_11 = arith.constant 0.000000e+00 : f32
    %14 = vector.broadcast %cst_11 : f32 to vector<128x128xf32>
    %15 = arith.maximumf %13, %14 : vector<128x128xf32>
    %16 = arith.truncf %15 : vector<128x128xf32> to vector<128x128xbf16>
    %c0_12 = arith.constant 0 : index
    %c0_13 = arith.constant 0 : index
    %17 = vector.load %arg6[%c0_12, %c0_13] : memref<128x128xbf16, #tpu.memory_space<vmem>>, vector<128x128xbf16>
    %cst_14 = arith.constant dense<0.000000e+00> : vector<128x128xf32>
    %18 = tpu.matmul %16, %17, %cst_14 {dimension_numbers = #tpu.dot_dimension_numbers<[1], [0], [0], [1], [0, 0, 1, 1], [], []>} : vector<128x128xbf16>, vector<128x128xbf16>, vector<128x128xf32> -> vector<128x128xf32>
    %c0_15 = arith.constant 0 : index
    %c0_16 = arith.constant 0 : index
    %19 = vector.load %arg7[%c0_15, %c0_16] : memref<1x128xf32, #tpu.memory_space<vmem>>, vector<1x128xf32>
    %20 = vector.broadcast %19 : vector<1x128xf32> to vector<128x128xf32>
    %21 = arith.addf %18, %20 : vector<128x128xf32>
    %cst_17 = arith.constant 0.000000e+00 : f32
    %22 = vector.broadcast %cst_17 : f32 to vector<128x128xf32>
    %23 = arith.maximumf %21, %22 : vector<128x128xf32>
    %c0_18 = arith.constant 0 : index
    %c0_19 = arith.constant 0 : index
    %24 = vector.load %arg8[%c0_18, %c0_19] : memref<1x128xf32, #tpu.memory_space<vmem>>, vector<1x128xf32>
    %25 = vector.broadcast %24 : vector<1x128xf32> to vector<128x128xf32>
    %26 = arith.mulf %23, %25 : vector<128x128xf32>
    %cst_20 = arith.constant dense<0.000000e+00> : vector<128xf32>
    %27 = vector.multi_reduction <add>, %26, %cst_20 [1] : vector<128x128xf32> to vector<128xf32>
    %28 = vector.shape_cast %27 : vector<128xf32> to vector<128x1xf32>
    %c0_21 = arith.constant 0 : index
    %c0_22 = arith.constant 0 : index
    %29 = memref.load %arg9[%c0_21, %c0_22] : memref<1x1xf32, #tpu.memory_space<smem>>
    %30 = vector.broadcast %29 : f32 to vector<128x1xf32>
    %31 = arith.addf %28, %30 : vector<128x1xf32>
    %32 = vector.shape_cast %31 : vector<128x1xf32> to vector<128x1xf32>
    %33 = vector.broadcast %32 : vector<128x1xf32> to vector<128x128xf32>
    %c0_23 = arith.constant 0 : index
    %c0_24 = arith.constant 0 : index
    %34 = vector.load %arg10[%c0_23, %c0_24] : memref<128x128xf32, #tpu.memory_space<vmem>>, vector<128x128xf32>
    tpu.vector_store %arg10[%c0_23, %c0_24], %33 {strides = array<i32>} : memref<128x128xf32, #tpu.memory_space<vmem>>, vector<128x128xf32>,
    return
  }
  func.func @transform_0(%arg0: i32) -> (i32, i32) {
    %c0_i32 = arith.constant 0 : i32
    %c0_i32_0 = arith.constant 0 : i32
    return %arg0, %c0_i32 : i32, i32
  }
  func.func @transform_1(%arg0: i32) -> (i32, i32) {
    %c0_i32 = arith.constant 0 : i32
    %c0_i32_0 = arith.constant 0 : i32
    %c0_i32_1 = arith.constant 0 : i32
    return %c0_i32, %c0_i32_0 : i32, i32
  }
  func.func @transform_2(%arg0: i32) -> (i32, i32) {
    %c0_i32 = arith.constant 0 : i32
    %c0_i32_0 = arith.constant 0 : i32
    %c0_i32_1 = arith.constant 0 : i32
    return %c0_i32, %c0_i32_0 : i32, i32
  }
  func.func @transform_3(%arg0: i32) -> (i32, i32) {
    %c0_i32 = arith.constant 0 : i32
    %c0_i32_0 = arith.constant 0 : i32
    %c0_i32_1 = arith.constant 0 : i32
    return %c0_i32, %c0_i32_0 : i32, i32
  }
  func.func @transform_4(%arg0: i32) -> (i32, i32) {
    %c0_i32 = arith.constant 0 : i32
    %c0_i32_0 = arith.constant 0 : i32
    %c0_i32_1 = arith.constant 0 : i32
    return %c0_i32, %c0_i32_0 : i32, i32
  }
  func.func @transform_5(%arg0: i32) -> (i32, i32) {
    %c0_i32 = arith.constant 0 : i32
    %c0_i32_0 = arith.constant 0 : i32
    %c0_i32_1 = arith.constant 0 : i32
    return %c0_i32, %c0_i32_0 : i32, i32
  }
  func.func @transform_6(%arg0: i32) -> (i32, i32) {
    %c0_i32 = arith.constant 0 : i32
    %c0_i32_0 = arith.constant 0 : i32
    %c0_i32_1 = arith.constant 0 : i32
    return %c0_i32, %c0_i32_0 : i32, i32
  }
  func.func @transform_7(%arg0: i32) -> (i32, i32) {
    %c0_i32 = arith.constant 0 : i32
    %c0_i32_0 = arith.constant 0 : i32
    %c0_i32_1 = arith.constant 0 : i32
    return %c0_i32, %c0_i32_0 : i32, i32
  }
  func.func @transform_8(%arg0: i32) -> (i32, i32) {
    %c0_i32 = arith.constant 0 : i32
    %c0_i32_0 = arith.constant 0 : i32
    %c0_i32_1 = arith.constant 0 : i32
    return %c0_i32, %c0_i32_0 : i32, i32
  }
  func.func @transform_9(%arg0: i32) -> (i32, i32) {
    %c0_i32 = arith.constant 0 : i32
    %c0_i32_0 = arith.constant 0 : i32
    return %arg0, %c0_i32 : i32, i32
  }
}

</mosaic_0001>

<bundles_post_ra>
// kernel: tpu_custom_call.1
= control target key start
LH: loop header
LB: loop body
LE: loop exit
PB: predicated region body
PF: predicated region fallthrough
CT: control target
= control target key end

     0   :  { %s7926_s0 = inlined_call_operand.hbm [shape: bf16[256,3072], index: 0, kind: input, shape index: {}]   ;;  %s7927_s1 = inlined_call_operand.hbm [shape: bf16[3072,128], index: 1, kind: input, shape index: {}]   ;;  %s7928_s2 = inlined_call_operand.hbm [shape: f32[1,128], index: 2, kind: input, shape index: {}]   ;;  %s7929_s3 = inlined_call_operand.hbm [shape: bf16[128,128], index: 3, kind: input, shape index: {}]   ;;  %s7930_s4 = inlined_call_operand.hbm [shape: f32[1,128], index: 4, kind: input, shape index: {}]   ;;  %s7931_s5 = inlined_call_operand.hbm [shape: bf16[128,128], index: 5, kind: input, shape index: {}]   ;;  %s7932_s6 = inlined_call_operand.hbm [shape: f32[1,128], index: 6, kind: input, shape index: {}]   ;;  %s7933_s7 = inlined_call_operand.hbm [shape: f32[1,128], index: 7, kind: input, shape index: {}]   ;;  %s7934_s8 = inlined_call_operand.<no memory space> [shape: f32[1,1], index: 8, kind: input, shape index: {}]   ;;  %s7935_s9 = inlined_call_operand.hbm [shape: f32[256,128], index: 9, kind: output, shape index: {}]  }
   0x1   :  { %7939 = sst [smem:[#allocation24_spill]] %s7927_s1 }
   0x2   :  { %7940 = sst [smem:[#allocation25_spill]] %s7928_s2 }
   0x3   :  { %14 = sst [smem:[#allocation2]] %s7934_s8 }
   0x4   :  { %15 = vsyncpa [#allocation4], 0 }
   0x5   :  { %17 = vsyncpa [#allocation4 + $0x1], 0 }
   0x6   :  { %18 = vsyncpa [#allocation7], 0 }
   0x7   :  { %19 = vsyncpa [#allocation10], 0 }
   0x8   :  { %20 = vsyncpa [#allocation13], 0 }
   0x9   :  { %21 = vsyncpa [#allocation16], 0 }
   0xa   :  { %22 = vsyncpa [#allocation5], 0 }
   0xb   :  { %24 = vsyncpa [#allocation5 + $0x1], 0  ;;  %s6960_s11 = smov 0   ;;  %s6962_s12 = smov 0  }
   0xc   :  { %s6964_s13 = smov 0   ;;  %s6966_s14 = smov 0  }
   0xd LB: > { %s6892_s8 = smov [#allocation6]   ;;  %s6981_s16 = sadd.s32 4294967295, %s6890_s14   ;;  %s6890_s14 = sphi %s6966_s14, %s7966_s14   ;;  %s6886_s13 = sphi %s6964_s13, %s7965_s13   ;;  %s6882_s12 = sphi %s6962_s12, %s7964_s12   ;;  %s6878_s11 = sphi %s6960_s11, %s7963_s11  }
   0xe   : > { %s267_s15 = sshll.u32 %s6892_s8, 4  ;;  %p4953_p0 = scmp.ge.s32.totalorder %s6890_s14, 1  ;;  %s6986_s15 = int_to_ptr.vmem [resolvable:$true] %s267_s15 }
   0xf   : > { %p7936_p1 = scmp.eq.s32.totalorder %s6981_s16, 0  ;;  %p255_p2 = scmp.lt.s32.totalorder %s6890_s14, 3 }
  0x10   : > { %s6893_s18 = smov [#allocation9]   ;;  %s6894_s21 = smov [#allocation12]  }
  0x11   : > { %p6988_p3 = pnand %p4953_p0, %p255_p2  ;;  %s291_s19 = sshll.u32 %s6893_s18, 4  ;;  %s7001_s19 = int_to_ptr.vmem [resolvable:$true] %s291_s19 }
  0x12   : > { %s315_s22 = sshll.u32 %s6894_s21, 4  ;;  %s7943_s1 = sld [smem:[#allocation24_spill]]  ;;  %s7003_s22 = int_to_ptr.vmem [resolvable:$true] %s315_s22 }
  0x13   : > { %s7941_s17 = scalar_select %p6988_p3, 1, 0 }
  0x14   : > { %p6283_p5 = pneg %p6988_p3 }
  0x16   : > { %p6997_p6 = pnand %p6283_p5, %p7936_p1 }
  0x18   : > { %s6582_s25 = scalar_lea.hbm %s7943_s1, 24576  ;;  %p7013_p8 = pneg %p6997_p6 }
  0x19   : > { %p6583_p7 = scmp.ne.s32.totalorder %s7943_s1, %s6582_s25  ;;  %p6589_p11 = scmp.lt.u32.totalorder %s6582_s25, %s7943_s1 }
  0x1b   : > { %p6585_p9 = pnand %p7013_p8, %p6583_p7 }
  0x1d   : > { %p6586_p10 = pneg %p6585_p9 }
  0x1f   : > { %p6591_p12 = pnand %p6589_p11, %p6586_p10 }
  0x21   : > { %6594 = shalt.err (!%p6591_p12)
}
  0x22   : > { %s6595_s10 = scalar_lea.vmem %s6986_s15, 24576  ;;  %p6603_p5 = scmp.lt.s32.totalorder %s6986_s15, %s6986_s15 }
  0x23   : > { %p6596_p13 = scmp.ne.s32.totalorder %s6986_s15, %s6595_s10  ;;  %p6604_p4 = scmp.lt.s32.totalorder %s6595_s10, %s6595_s10 }
  0x25   : > { %p6598_p0 = pnand %p6596_p13, %p7013_p8  ;;  %p6605_p7 = por %p6604_p4, %p6603_p5 }
  0x27   : > { %p6599_p2 = pneg %p6598_p0 }
  0x29   : > { %p6606_p9 = pnand %p6605_p7, %p6599_p2 }
  0x2b   : > { %6609 = shalt.err (!%p6606_p9)
}
  0x2c   : > { %s6895_s8 = smov 64   ;;  %s6896_s18 = smov 4  }
  0x2d   : > { %6286 = dma.hbm_to_vmem [thread:$0]  (!%p6997_p6), %s7943_s1, 24576, %s6986_s15, [#allocation7], %s6895_s8, %s6895_s8, %s6896_s18  }
  0x2e   : > { %s6610_s26 = scalar_lea.hbm %s7929_s3, 1024 }
  0x2f   : > { %p6611_p4 = scmp.ne.s32.totalorder %s7929_s3, %s6610_s26  ;;  %p6617_p12 = scmp.lt.u32.totalorder %s6610_s26, %s7929_s3 }
  0x31   : > { %p6613_p10 = pnand %p6611_p4, %p7013_p8 }
  0x33   : > { %p6614_p11 = pneg %p6613_p10 }
  0x35   : > { %p6619_p13 = pnand %p6617_p12, %p6614_p11 }
  0x37   : > { %6622 = shalt.err (!%p6619_p13)
}
  0x38   : > { %s6623_s15 = scalar_lea.vmem %s7001_s19, 1024  ;;  %p6631_p7 = scmp.lt.s32.totalorder %s7001_s19, %s7001_s19 }
  0x39   : > { %p6624_p0 = scmp.ne.s32.totalorder %s7001_s19, %s6623_s15  ;;  %p6632_p9 = scmp.lt.s32.totalorder %s6623_s15, %s6623_s15 }
  0x3b   : > { %p6626_p2 = pnand %p6624_p0, %p7013_p8  ;;  %p6633_p4 = por %p6632_p9, %p6631_p7 }
  0x3d   : > { %p6627_p5 = pneg %p6626_p2 }
  0x3f   : > { %p6634_p10 = pnand %p6633_p4, %p6627_p5 }
  0x41   : > { %6637 = shalt.err (!%p6634_p10)
}
  0x42   : > { %6292 = dma.hbm_to_vmem [thread:$0]  (!%p6997_p6), %s7929_s3, 1024, %s7001_s19, [#allocation10], %s6895_s8, %s6895_s8, %s6896_s18  }
  0x43   : > { %s6638_s26 = scalar_lea.hbm %s7931_s5, 1024 }
  0x44   : > { %p6639_p11 = scmp.ne.s32.totalorder %s7931_s5, %s6638_s26  ;;  %p6645_p0 = scmp.lt.u32.totalorder %s6638_s26, %s7931_s5 }
  0x46   : > { %p6641_p12 = pnand %p6639_p11, %p7013_p8 }
  0x48   : > { %p6642_p13 = pneg %p6641_p12 }
  0x4a   : > { %p6647_p2 = pnand %p6645_p0, %p6642_p13 }
  0x4c   : > { %6650 = shalt.err (!%p6647_p2)
}
  0x4d   : > { %s6651_s19 = scalar_lea.vmem %s7003_s22, 1024  ;;  %p6659_p4 = scmp.lt.s32.totalorder %s7003_s22, %s7003_s22 }
  0x4e   : > { %p6652_p5 = scmp.ne.s32.totalorder %s7003_s22, %s6651_s19  ;;  %p6660_p10 = scmp.lt.s32.totalorder %s6651_s19, %s6651_s19 }
  0x50   : > { %p6654_p7 = pnand %p6652_p5, %p7013_p8  ;;  %p6661_p11 = por %p6660_p10, %p6659_p4 }
  0x52   : > { %p6655_p9 = pneg %p6654_p7 }
  0x54   : > { %p6662_p12 = pnand %p6661_p11, %p6655_p9 }
  0x56   : > { %6665 = shalt.err (!%p6662_p12)
}
  0x57   : > { %6298 = dma.hbm_to_vmem [thread:$0]  (!%p6997_p6), %s7931_s5, 1024, %s7003_s22, [#allocation13], %s6895_s8, %s6895_s8, %s6896_s18  }
  0x58   : > { %s6897_s23 = smov [#allocation8]   ;;  %s6898_s25 = smov [#allocation11]  }
  0x59   : > { %s281_s24 = sshll.u32 %s6897_s23, 4  ;;  %s305_s26 = sshll.u32 %s6898_s25, 4  ;;  %s282_s24 = int_to_ptr.vmem [resolvable:$true] %s281_s24  ;;  %s306_s26 = int_to_ptr.vmem [resolvable:$true] %s305_s26 }
  0x5a   : > { %s7945_s2 = sld [smem:[#allocation25_spill]] }
  0x60   : > { %s6666_s30 = scalar_lea.hbm %s7945_s2, 16 }
  0x61   : > { %p6667_p13 = scmp.ne.s32.totalorder %s7945_s2, %s6666_s30  ;;  %p6673_p5 = scmp.lt.u32.totalorder %s6666_s30, %s7945_s2 }
  0x63   : > { %p6669_p0 = pnand %p6667_p13, %p7013_p8 }
  0x65   : > { %p6670_p2 = pneg %p6669_p0 }
  0x67   : > { %p6675_p7 = pnand %p6673_p5, %p6670_p2 }
  0x69   : > { %6678 = shalt.err (!%p6675_p7)
}
  0x6a   : > { %s6679_s22 = scalar_lea.vmem %s282_s24, 16  ;;  %s6686_s8 = scalar_lea.vmem %s282_s24, 32 }
  0x6b   : > { %p6680_p9 = scmp.ne.s32.totalorder %s282_s24, %s6679_s22  ;;  %p6687_p11 = scmp.lt.s32.totalorder %s282_s24, %s282_s24 }
  0x6c   : > { %p6688_p12 = scmp.lt.s32.totalorder %s6686_s8, %s6679_s22 }
  0x6d   : > { %p6682_p4 = pnand %p6680_p9, %p7013_p8 }
  0x6e   : > { %p6689_p1 = por %p6688_p12, %p6687_p11 }
  0x6f   : > { %p6683_p10 = pneg %p6682_p4 }
  0x71   : > { %p6690_p3 = pnand %p6689_p1, %p6683_p10 }
  0x73   : > { %6693 = shalt.err (!%p6690_p3)
}
  0x74   : > { %6289 = dma.hbm_to_vmem [thread:$0]  (!%p6997_p6), %s7945_s2, 16, %s282_s24, [#allocation7]  }
  0x75   : > { %s6694_s25 = scalar_lea.hbm %s7930_s4, 16 }
  0x76   : > { %p6695_p13 = scmp.ne.s32.totalorder %s7930_s4, %s6694_s25  ;;  %p6701_p3 = scmp.lt.u32.totalorder %s6694_s25, %s7930_s4 }
  0x78   : > { %p6697_p0 = pnand %p6695_p13, %p7013_p8 }
  0x7a   : > { %p6698_p1 = pneg %p6697_p0 }
  0x7c   : > { %p6703_p2 = pnand %p6701_p3, %p6698_p1 }
  0x7e   : > { %6706 = shalt.err (!%p6703_p2)
}
  0x7f   : > { %s6707_s19 = scalar_lea.vmem %s306_s26, 16  ;;  %s6714_s24 = scalar_lea.vmem %s306_s26, 32 }
  0x80   : > { %p6708_p5 = scmp.ne.s32.totalorder %s306_s26, %s6707_s19  ;;  %p6715_p4 = scmp.lt.s32.totalorder %s306_s26, %s306_s26 }
  0x81   : > { %p6716_p10 = scmp.lt.s32.totalorder %s6714_s24, %s6707_s19 }
  0x82   : > { %p6710_p7 = pnand %p6708_p5, %p7013_p8 }
  0x83   : > { %p6717_p11 = por %p6716_p10, %p6715_p4 }
  0x84   : > { %p6711_p9 = pneg %p6710_p7 }
  0x86   : > { %p6718_p12 = pnand %p6717_p11, %p6711_p9 }
  0x88   : > { %6721 = shalt.err (!%p6718_p12)
}
  0x89   : > { %6295 = dma.hbm_to_vmem [thread:$0]  (!%p6997_p6), %s7930_s4, 16, %s306_s26, [#allocation10]  }
  0x8a   : > { %s6899_s8 = smov [#allocation14]   ;;  %s6900_s21 = smov [#allocation15]  }
  0x8b   : > { %s329_s18 = sshll.u32 %s6899_s8, 4  ;;  %s340_s1 = sshll.u32 %s6900_s21, 4  ;;  %s330_s18 = int_to_ptr.vmem [resolvable:$true] %s329_s18  ;;  %s341_s1 = int_to_ptr.vmem [resolvable:$true] %s340_s1 }
  0x8c   : > { %s6722_s27 = scalar_lea.hbm %s7932_s6, 16 }
  0x8d   : > { %p6723_p13 = scmp.ne.s32.totalorder %s7932_s6, %s6722_s27  ;;  %p6729_p3 = scmp.lt.u32.totalorder %s6722_s27, %s7932_s6 }
  0x8f   : > { %p6725_p0 = pnand %p6723_p13, %p7013_p8 }
  0x91   : > { %p6726_p1 = pneg %p6725_p0 }
  0x93   : > { %p6731_p2 = pnand %p6729_p3, %p6726_p1 }
  0x95   : > { %6734 = shalt.err (!%p6731_p2)
}
  0x96   : > { %s6735_s26 = scalar_lea.vmem %s330_s18, 16  ;;  %s6742_s24 = scalar_lea.vmem %s330_s18, 32 }
  0x97   : > { %p6736_p5 = scmp.ne.s32.totalorder %s330_s18, %s6735_s26  ;;  %p6743_p4 = scmp.lt.s32.totalorder %s330_s18, %s330_s18 }
  0x98   : > { %p6744_p10 = scmp.lt.s32.totalorder %s6742_s24, %s6735_s26 }
  0x99   : > { %p6738_p7 = pnand %p6736_p5, %p7013_p8 }
  0x9a   : > { %p6745_p11 = por %p6744_p10, %p6743_p4 }
  0x9b   : > { %p6739_p9 = pneg %p6738_p7 }
  0x9d   : > { %p6746_p12 = pnand %p6745_p11, %p6739_p9 }
  0x9f   : > { %6749 = shalt.err (!%p6746_p12)
}
  0xa0   : > { %6301 = dma.hbm_to_vmem [thread:$0]  (!%p6997_p6), %s7932_s6, 16, %s330_s18, [#allocation13]  }
  0xa1   : > { %s6750_s23 = scalar_lea.hbm %s7933_s7, 16 }
  0xa2   : > { %p6751_p13 = scmp.ne.s32.totalorder %s7933_s7, %s6750_s23  ;;  %p6757_p3 = scmp.lt.u32.totalorder %s6750_s23, %s7933_s7 }
  0xa4   : > { %p6753_p0 = pnand %p6751_p13, %p7013_p8 }
  0xa6   : > { %p6754_p1 = pneg %p6753_p0 }
  0xa8   : > { %p6759_p2 = pnand %p6757_p3, %p6754_p1 }
  0xaa   : > { %6762 = shalt.err (!%p6759_p2)
}
  0xab   : > { %s6763_s10 = scalar_lea.vmem %s341_s1, 16  ;;  %s6770_s18 = scalar_lea.vmem %s341_s1, 32 }
  0xac   : > { %p6764_p5 = scmp.ne.s32.totalorder %s341_s1, %s6763_s10  ;;  %p6771_p4 = scmp.lt.s32.totalorder %s341_s1, %s341_s1 }
  0xad   : > { %p6772_p10 = scmp.lt.s32.totalorder %s6770_s18, %s6763_s10 }
  0xae   : > { %p6766_p7 = pnand %p6764_p5, %p7013_p8 }
  0xaf   : > { %p6773_p11 = por %p6772_p10, %p6771_p4 }
  0xb0   : > { %p6767_p9 = pneg %p6766_p7 }
  0xb2   : > { %p6774_p12 = pnand %p6773_p11, %p6767_p9 }
  0xb4   : > { %6777 = shalt.err (!%p6774_p12)
}
  0xb5   : > { %6304 = dma.hbm_to_vmem [thread:$0]  (!%p6997_p6), %s7933_s7, 16, %s341_s1, [#allocation16]  }
  0xb6   : > { %s4952_s28 = sadd.s32 4294967294, %s6890_s14   ;;  %s7163_s20 = sadd.s32 1, %s6890_s14  }
  0xb7   : > { %s37_s24 = sadd.s32 1, %s6886_s13  ;;  %s34_s15 = ssub.s32 %s6890_s14, %s7163_s20 }
  0xb8   : > { %p44_p8 = scmp.ne.s32.totalorder %s6886_s13, %s6882_s12  ;;  %p35_p13 = scmp.eq.s32.totalorder %s34_s15, 0 }
  0xb9   : > { %p45_p0 = scmp.eq.s32.totalorder %s6890_s14, 0  ;;  %p50_p1 = scmp.ne.s32.totalorder %s6882_s12, %s6878_s11 }
  0xba   : > { %p242_p3 = scmp.eq.s32.totalorder %s6981_s16, 1  ;;  %p7946_p5 = scmp.eq.s32.totalorder %s6981_s16, 0 }
  0xbb   : > { %s7175_s22 = scalar_select %p35_p13, %s6886_s13, %s37_s24  }
  0xbc   : > { %p46_p2 = por %p45_p0, %p44_p8  ;;  %p7179_p7 = por %p7946_p5, %p50_p1 }
  0xbd   : > { %p7183_p6 = por %p242_p3, %p44_p8  ;;  %p248_p9 = scmp.eq.s32.totalorder %s4952_s28, 1 }
  0xbe   : > { %p6320_p4 = scmp.lt.s32.totalorder %s6890_s14, 2  ;;  %s354_s21 = sand.u32 1, %s6886_s13  }
  0xbf   : > { %s7948_s1 = scalar_select %p7183_p6, 1, 0 }
  0xc0   : > { %p7189_p10 = por %p248_p9, %p50_p1  ;;  %s6248_s25 = smul.u32 1536, %s354_s21 }
  0xc1   : > { %p7193_p11 = pnand %p6320_p4, %p46_p2  ;;  %s6249_s29 = smul.u32 24576, %s6890_s14 }
  0xc2   : > { %s7949_s23 = scalar_select %p7189_p10, 1, 0 }
  0xc3   : > { %s7201_s18 = scalar_lea.hbm %s7926_s0, %s6249_s29  ;;  %s358_s19 = scalar_lea.vmem [#allocation3], %s6248_s25 }
  0xc4   : > { %s366_s26 = sshll.u32 %s358_s19, 4  ;;  %s7205_s28 = scalar_lea.sflag [#allocation4], %s354_s21  ;;  %s7203_s26 = int_to_ptr.vmem [resolvable:$true] %s366_s26 }
  0xc5   : > { %s6778_s24 = scalar_lea.hbm %s7201_s18, 24576  ;;  %p6780_p8 = pneg %p7193_p11 }
  0xc6   : > { %p6779_p12 = scmp.ne.s32.totalorder %s7201_s18, %s6778_s24  ;;  %s6783_s30 = scalar_lea.hbm %s7926_s0, 49152 }
  0xc7   : > { %p6784_p1 = scmp.lt.u32.totalorder %s7201_s18, %s7926_s0  ;;  %p6785_p3 = scmp.lt.u32.totalorder %s6783_s30, %s6778_s24 }
  0xc8   : > { %p6781_p13 = pnand %p6780_p8, %p6779_p12  ;;  %p6787_p5 = scmp.lt.u32.totalorder %s6778_s24, %s7201_s18 }
  0xc9   : > { %p6786_p2 = por %p6785_p3, %p6784_p1 }
  0xca   : > { %p6782_p0 = pneg %p6781_p13 }
  0xcb   : > { %p6788_p9 = por %p6787_p5, %p6786_p2 }
  0xcd   : > { %p6789_p4 = pnand %p6788_p9, %p6782_p0 }
  0xcf   : > { %6792 = shalt.err (!%p6789_p4)
}
  0xd0   : > { %s6793_s21 = scalar_lea.vmem %s7203_s26, 24576  ;;  %s6901_s25 = smov [#allocation3]  }
  0xd1   : > { %p6794_p12 = scmp.ne.s32.totalorder %s7203_s26, %s6793_s21  ;;  %s6798_s19 = sshll.u32 %s6901_s25, 4  ;;  %s6799_s19 = int_to_ptr.vmem [resolvable:$false] %s6798_s19 }
  0xd2   : > { %s6800_s2 = scalar_lea.vmem %s6799_s19, 49152  ;;  %p6801_p6 = scmp.lt.s32.totalorder %s7203_s26, %s6799_s19 }
  0xd3   : > { %p6796_p13 = pnand %p6794_p12, %p6780_p8  ;;  %p6802_p1 = scmp.lt.s32.totalorder %s6800_s2, %s6793_s21 }
  0xd5   : > { %p6797_p10 = pneg %p6796_p13  ;;  %p6803_p3 = por %p6802_p1, %p6801_p6 }
  0xd7   : > { %p6804_p2 = pnand %p6803_p3, %p6797_p10 }
  0xd9   : > { %6807 = shalt.err (!%p6804_p2)
}
  0xda   : > { %s6902_s24 = smov 1536   ;;  %s6903_s15 = smov 96  }
  0xdb   : > { %6308 = dma.hbm_to_vmem [thread:$0]  (!%p7193_p11), %s7201_s18, 24576, %s7203_s26, %s7205_s28, %s6902_s24, %s6902_s24, %s6903_s15  }
  0xdc   : > { %p7951_p8 = scmp.ne.s32.totalorder %s7941_s17, 0 }
  0xdd   : > { %s7236_s29 = sand.u32 (!%p7951_p8), 1, %s6882_s12  }
  0xde   : > { %378 = sbr.rel (%p7951_p8) target bundleno = 1484 (0x5cc), region = 56  ;;  %s381_s10 = scalar_lea.sflag (!%p7951_p8), [#allocation4], %s7236_s29 }
  0xdf   : > { %s6250_s30 = smul.u32 (!%p7951_p8), 1536, %s7236_s29 }
  0xe1   : > { %s7240_s21 = scalar_lea.vmem (!%p7951_p8), [#allocation3], %s6250_s30 }
  0xe5   : > { %6853 = dma.done.wait (%p7179_p7), %s381_s10, 24576  }
  0xe6   : > { %6855 = vsyncadd (%p7179_p7), %s381_s10, 4294942720  ;;  %p7952_p6 = scmp.eq.s32.totalorder %s6981_s16, 0 }
  0xe8   : > { %6857 = dma.done.wait (%p7952_p6), [#allocation7], 24592   ;;  %p7953_p10 = pmov %p7952_p6 }
  0xe9   : > { %p7954_p11 = pmov %p7952_p6 }
  0xea   : > { %6859 = vsyncadd (%p7953_p10), [#allocation7], 4294942704 }
  0xeb   : > { %6861 = dma.done.wait (%p7954_p11), [#allocation10], 1040   ;;  %p7955_p0 = pmov %p7952_p6 }
  0xed   : > { %6863 = vsyncadd (%p7955_p0), [#allocation10], 4294966256  ;;  %p7956_p5 = pmov %p7955_p0 }
  0xee   : > { %p7957_p9 = pmov %p7955_p0 }
  0xef   : > { %6865 = dma.done.wait (%p7956_p5), [#allocation13], 1040  }
  0xf0   : > { %6867 = vsyncadd (%p7957_p9), [#allocation13], 4294966256  ;;  %p7958_p7 = pmov %p7955_p0 }
  0xf1   : > { %p7959_p4 = pmov %p7955_p0 }
  0xf2   : > { %6869 = dma.done.wait (%p7958_p7), [#allocation16], 16  }
  0xf3   : > { %6871 = vsyncadd (%p7959_p4), [#allocation16], 4294967280  ;;  %v6374_v0 = vld [vmem:[#allocation6 + $0x40] sm:$0xff]   ;;  %v6378_v4 = vld [vmem:[#allocation6 + $0x48] sm:$0xff]   ;;  %s4764_s17 = sld [smem:[#allocation2]]  ;;  %s4973_s8 = sshll.u32 %s7236_s29, 7 }
  0xf4   : > { %v6375_v1 = vld [vmem:[#allocation6 + $0xc0] sm:$0xff]   ;;  %5384 = vmatprep.subr.bf16.mxu0 %v6374_v0  ;;  %v6379_v5 = vld [vmem:[#allocation6 + $0xc8] sm:$0xff]   ;;  %v6382_v8 = vld [vmem:[#allocation6 + $0x50] sm:$0xff]   ;;  %s7857_s27 = scalar_lea.vmem [#allocation17], %s4973_s8  ;;  %s5383_s18 = sshll.u32 %s6981_s16, 11 }
  0xf5   : > { %v6376_v2 = vld [vmem:[#allocation6] sm:$0xff]   ;;  %5448 = vmatprep.subr.bf16.mxu1 %v6375_v1  ;;  %v6380_v6 = vld [vmem:[#allocation6 + $0x8] sm:$0xff]   ;;  %v6383_v9 = vld [vmem:[#allocation6 + $0xd0] sm:$0xff]   ;;  %s4812_s26 = sshll.u32 %s7857_s27, 4  ;;  %s7878_s19 = scalar_lea.hbm %s7935_s9, %s5383_s18  ;;  %s7880_s26 = int_to_ptr.vmem [resolvable:$true] %s4812_s26 }
  0xf6   : > { %v6377_v3 = vld [vmem:[#allocation6 + $0x80] sm:$0xff]   ;;  %5385 = vmatpush3.bf16.msra.mxu0 %v6376_v2  ;;  %v6381_v7 = vld [vmem:[#allocation6 + $0x88] sm:$0xff]   ;;  %v6384_v10 = vld [vmem:[#allocation6 + $0x10] sm:$0xff]   ;;  %s4799_s2 = scalar_lea.sflag [#allocation5], %s7236_s29  ;;  %s6808_s16 = scalar_lea.vmem %s7880_s26, 2048 }
  0xf7   : > { %5449 = vmatpush3.bf16.msra.mxu1 %v6377_v3  ;;  %5386 = vmatprep.subr.bf16.mxu0 %v6378_v4  ;;  %v6385_v11 = vld [vmem:[#allocation6 + $0x90] sm:$0xff]   ;;  %v6386_v12 = vld [vmem:[#allocation6 + $0x58] sm:$0xff]   ;;  %v6390_v16 = vld [vmem:[#allocation6 + $0x60] sm:$0xff]   ;;  %p6809_p12 = scmp.ne.s32.totalorder %s7880_s26, %s6808_s16  ;;  %p7960_p13 = scmp.ne.s32.totalorder %s7948_s1, 0 }
  0xf8   : > { %5450 = vmatprep.subr.bf16.mxu1 %v6379_v5  ;;  %v6387_v13 = vld [vmem:[#allocation6 + $0xd8] sm:$0xff]   ;;  %v6391_v17 = vld [vmem:[#allocation6 + $0xe0] sm:$0xff]   ;;  %v6394_v20 = vld [vmem:[#allocation6 + $0x68] sm:$0xff]   ;;  %s6904_s24 = smov [#allocation17]  }
  0xf9   : > { %v6388_v14 = vld [vmem:[#allocation6 + $0x18] sm:$0xff]   ;;  %v6392_v18 = vld [vmem:[#allocation6 + $0x20] sm:$0xff]   ;;  %v6395_v21 = vld [vmem:[#allocation6 + $0xe8] sm:$0xff]   ;;  %p6810_p1 = pnand %p6809_p12, %p7960_p13  ;;  %s6812_s15 = sshll.u32 %s6904_s24, 4  ;;  %s6813_s15 = int_to_ptr.vmem [resolvable:$false] %s6812_s15 }
  0xfa   : > { %5387 = vmatpush3.bf16.msra.mxu0 %v6380_v6  ;;  %v6389_v15 = vld [vmem:[#allocation6 + $0x98] sm:$0xff]   ;;  %v6393_v19 = vld [vmem:[#allocation6 + $0xa0] sm:$0xff]   ;;  %v6396_v22 = vld [vmem:[#allocation6 + $0x28] sm:$0xff]   ;;  %s6814_s30 = scalar_lea.vmem %s6813_s15, 4096  ;;  %p6815_p2 = scmp.lt.s32.totalorder %s7880_s26, %s6813_s15 }
  0xfb   : > { %5451 = vmatpush3.bf16.msra.mxu1 %v6381_v7  ;;  %5388 = vmatprep.subr.bf16.mxu0 %v6382_v8  ;;  %v6397_v23 = vld [vmem:[#allocation6 + $0xa8] sm:$0xff]   ;;  %v6398_v24 = vld [vmem:[#allocation6 + $0x70] sm:$0xff]   ;;  %v6402_v28 = vld [vmem:[#allocation6 + $0x78] sm:$0xff]   ;;  %p6811_p3 = pneg %p6810_p1  ;;  %p6816_p8 = scmp.lt.s32.totalorder %s6814_s30, %s6808_s16 }
  0xfc   : > { %5452 = vmatprep.subr.bf16.mxu1 %v6383_v9  ;;  %v6399_v25 = vld [vmem:[#allocation6 + $0xf0] sm:$0xff]   ;;  %v6403_v29 = vld [vmem:[#allocation6 + $0xf8] sm:$0xff]   ;;  %v450_v32 = vld [vmem:[%s7240_s21] sm:$0xff] }
  0xfd   : > { %v6400_v26 = vld [vmem:[#allocation6 + $0x30] sm:$0xff]   ;;  %v6404_v30 = vld [vmem:[#allocation6 + $0x38] sm:$0xff]   ;;  %v462_v33 = vld [vmem:[%s7240_s21 + $0x60] sm:$0xff]  ;;  %p6817_p6 = por %p6816_p8, %p6815_p2 }
  0xfe   : > { %5389 = vmatpush3.bf16.msra.mxu0 %v6384_v10  ;;  %v6401_v27 = vld [vmem:[#allocation6 + $0xb0] sm:$0xff]   ;;  %v6405_v31 = vld [vmem:[#allocation6 + $0xb8] sm:$0xff]   ;;  %v451_v34 = vld [vmem:[%s7240_s21 + $0x8] sm:$0xff]  ;;  %v4975_v35 = vcombine.low %v450_v32, %v462_v33  ;;  %v4976_v36 = vcombine.high %v450_v32, %v462_v33 }
  0xff   : > { %5453 = vmatpush3.bf16.msra.mxu1 %v6385_v11  ;;  %5390 = vmatprep.subr.bf16.mxu0 %v6386_v12  ;;  %v463_v37 = vld [vmem:[%s7240_s21 + $0x68] sm:$0xff]  ;;  %v6406_v40 = vld [vmem:[#allocation6 + $0x140] sm:$0xff]   ;;  %v6414_v62 = vld [vmem:[#allocation6 + $0x150] sm:$0xff]   ;;  %p6818_p10 = pnand %p6817_p6, %p6811_p3 }
 0x100   : > { %5454 = vmatprep.subr.bf16.mxu1 %v6387_v13  ;;  %v4977_v38 = vcombine.low %v451_v34, %v463_v37  ;;  %v4978_v39 = vcombine.high %v451_v34, %v463_v37  ;;  %3177 = vmatprep.mubr.bf16.mxu0 %v4976_v36  ;;  %v6407_v41 = vld [vmem:[#allocation6 + $0x100] sm:$0xff]   ;;  %v475_v47 = vld [vmem:[%s7240_s21 + $0xc8] sm:$0xff]  ;;  %v6415_v63 = vld [vmem:[#allocation6 + $0x110] sm:$0xff]  }
 0x101   : > { %v6408_v42 = vld [vmem:[#allocation6 + $0x1c0] sm:$0xff]   ;;  %v487_v48 = vld [vmem:[%s7240_s21 + $0x128] sm:$0xff]  ;;  %v6416_v0 = vld [vmem:[#allocation6 + $0x1d0] sm:$0xff]  }
 0x102   : > { %5391 = vmatpush3.bf16.msra.mxu0 %v6388_v14  ;;  %3274 = vmatprep.mubr.bf16.mxu1 %v4978_v39  ;;  %v6409_v43 = vld [vmem:[#allocation6 + $0x180] sm:$0xff]   ;;  %v5002_v49 = vcombine.high %v475_v47, %v487_v48  ;;  %v6410_v50 = vld [vmem:[#allocation6 + $0x148] sm:$0xff]   ;;  %v5001_v53 = vcombine.low %v475_v47, %v487_v48  ;;  %v6417_v1 = vld [vmem:[#allocation6 + $0x190] sm:$0xff]  }
 0x103   : > { %5455 = vmatpush3.bf16.msra.mxu1 %v6389_v15  ;;  %5392 = vmatprep.subr.bf16.mxu0 %v6390_v16  ;;  %v474_v44 = vld [vmem:[%s7240_s21 + $0xc0] sm:$0xff]  ;;  %v6411_v52 = vld [vmem:[#allocation6 + $0x108] sm:$0xff]   ;;  %v6418_v10 = vld [vmem:[#allocation6 + $0x158] sm:$0xff]  }
 0x104   : > { %5456 = vmatprep.subr.bf16.mxu1 %v6391_v17  ;;  %v486_v45 = vld [vmem:[%s7240_s21 + $0x120] sm:$0xff]  ;;  %v6412_v54 = vld [vmem:[#allocation6 + $0x1c8] sm:$0xff]   ;;  %v6419_v11 = vld [vmem:[#allocation6 + $0x118] sm:$0xff]  }
 0x105   : > { %v5000_v46 = vcombine.high %v474_v44, %v486_v45  ;;  %v4999_v51 = vcombine.low %v474_v44, %v486_v45  ;;  %v6413_v55 = vld [vmem:[#allocation6 + $0x188] sm:$0xff]   ;;  %v498_v56 = vld [vmem:[%s7240_s21 + $0x180] sm:$0xff]  ;;  %v6420_v12 = vld [vmem:[#allocation6 + $0x1d8] sm:$0xff]  }
 0x106   : > { %5393 = vmatpush3.bf16.msra.mxu0 %v6392_v18  ;;  %v510_v57 = vld [vmem:[%s7240_s21 + $0x1e0] sm:$0xff]  ;;  %v499_v58 = vld [vmem:[%s7240_s21 + $0x188] sm:$0xff]  ;;  %v6421_v13 = vld [vmem:[#allocation6 + $0x198] sm:$0xff]  }
 0x107   : > { %5457 = vmatpush3.bf16.msra.mxu1 %v6393_v19  ;;  %5394 = vmatprep.subr.bf16.mxu0 %v6394_v20  ;;  %v511_v59 = vld [vmem:[%s7240_s21 + $0x1e8] sm:$0xff]  ;;  %v5024_v60 = vcombine.high %v498_v56, %v510_v57  ;;  %v5023_v2 = vcombine.low %v498_v56, %v510_v57  ;;  %v522_v3 = vld [vmem:[%s7240_s21 + $0x240] sm:$0xff]  ;;  %v6431_v39 = vld [vmem:[#allocation6 + $0x130] sm:$0xff]  }
 0x108   : > { %5458 = vmatprep.subr.bf16.mxu1 %v6395_v21  ;;  %v5026_v61 = vcombine.high %v499_v58, %v511_v59  ;;  %v534_v4 = vld [vmem:[%s7240_s21 + $0x2a0] sm:$0xff]  ;;  %v523_v5 = vld [vmem:[%s7240_s21 + $0x248] sm:$0xff]  ;;  %v5025_v6 = vcombine.low %v499_v58, %v511_v59  ;;  %v6435_v48 = vld [vmem:[#allocation6 + $0x138] sm:$0xff]  }
 0x109   : > { %v5048_v7 = vcombine.high %v522_v3, %v534_v4  ;;  %v535_v8 = vld [vmem:[%s7240_s21 + $0x2a8] sm:$0xff]  ;;  %v546_v14 = vld [vmem:[%s7240_s21 + $0x300] sm:$0xff]  ;;  %v5047_v19 = vcombine.low %v522_v3, %v534_v4  ;;  %v465_v3 = vld [vmem:[%s7240_s21 + $0x78] sm:$0xff] }
 0x10a   : > { %5395 = vmatpush3.bf16.msra.mxu0 %v6396_v22  ;;  %v5050_v9 = vcombine.high %v523_v5, %v535_v8  ;;  %v558_v15 = vld [vmem:[%s7240_s21 + $0x360] sm:$0xff]  ;;  %v547_v16 = vld [vmem:[%s7240_s21 + $0x308] sm:$0xff]  ;;  %v5049_v21 = vcombine.low %v523_v5, %v535_v8  ;;  %v476_v8 = vld [vmem:[%s7240_s21 + $0xd0] sm:$0xff] }
 0x10b   : > { %5459 = vmatpush3.bf16.msra.mxu1 %v6397_v23  ;;  %5396 = vmatprep.subr.bf16.mxu0 %v6398_v24  ;;  %v559_v17 = vld [vmem:[%s7240_s21 + $0x368] sm:$0xff]  ;;  %v6422_v18 = vld [vmem:[#allocation6 + $0x160] sm:$0xff]   ;;  %v5072_v22 = vcombine.high %v546_v14, %v558_v15  ;;  %v5071_v34 = vcombine.low %v546_v14, %v558_v15 }
 0x10c   : > { %5460 = vmatprep.subr.bf16.mxu1 %v6399_v25  ;;  %v6423_v20 = vld [vmem:[#allocation6 + $0x120] sm:$0xff]   ;;  %v5074_v24 = vcombine.high %v547_v16, %v559_v17  ;;  %v6428_v32 = vld [vmem:[#allocation6 + $0x1e8] sm:$0xff]  }
 0x10d   : > { %v6424_v23 = vld [vmem:[#allocation6 + $0x1e0] sm:$0xff]   ;;  %v6429_v33 = vld [vmem:[#allocation6 + $0x1a8] sm:$0xff]  }
 0x10e   : > { %5397 = vmatpush3.bf16.msra.mxu0 %v6400_v26  ;;  %v6425_v25 = vld [vmem:[#allocation6 + $0x1a0] sm:$0xff]   ;;  %v595_v44 = vld [vmem:[%s7240_s21 + $0x488] sm:$0xff] }
 0x10f   : > { %5461 = vmatpush3.bf16.msra.mxu1 %v6401_v27  ;;  %5398 = vmatprep.subr.bf16.mxu0 %v6402_v28  ;;  %v570_v26 = vld [vmem:[%s7240_s21 + $0x3c0] sm:$0xff]  ;;  %v6426_v28 = vld [vmem:[#allocation6 + $0x168] sm:$0xff]  }
 0x110   : > { %5462 = vmatprep.subr.bf16.mxu1 %v6403_v29  ;;  %v582_v27 = vld [vmem:[%s7240_s21 + $0x420] sm:$0xff]  ;;  %v571_v29 = vld [vmem:[%s7240_s21 + $0x3c8] sm:$0xff] }
 0x111   : > { %v5096_v36 = vcombine.high %v570_v26, %v582_v27  ;;  %v607_v45 = vld [vmem:[%s7240_s21 + $0x4e8] sm:$0xff]  ;;  %v5095_v47 = vcombine.low %v570_v26, %v582_v27  ;;  %v6438_v56 = vld [vmem:[#allocation6 + $0x240] sm:$0xff]   ;;  %v6446_v26 = vld [vmem:[#allocation6 + $0x250] sm:$0xff]  }
 0x112   : > { %5399 = vmatpush3.bf16.msra.mxu0 %v6404_v30  ;;  %v583_v30 = vld [vmem:[%s7240_s21 + $0x428] sm:$0xff]  ;;  %v6440_v58 = vld [vmem:[#allocation6 + $0x2c0] sm:$0xff]   ;;  %v6448_v27 = vld [vmem:[#allocation6 + $0x2d0] sm:$0xff]  }
 0x113   : > { %5463 = vmatpush3.bf16.msra.mxu1 %v6405_v31  ;;  %5512 = vmatprep.subr.bf16.mxu0 %v6406_v40  ;;  %v6427_v31 = vld [vmem:[#allocation6 + $0x128] sm:$0xff]   ;;  %v5098_v37 = vcombine.high %v571_v29, %v583_v30  ;;  %v6432_v40 = vld [vmem:[#allocation6 + $0x1f0] sm:$0xff]   ;;  %v6441_v15 = vld [vmem:[#allocation6 + $0x280] sm:$0xff]  }
 0x114   : > { %5576 = vmatprep.subr.bf16.mxu1 %v6408_v42  ;;  %v606_v42 = vld [vmem:[%s7240_s21 + $0x4e0] sm:$0xff]  ;;  %v619_v57 = vld [vmem:[%s7240_s21 + $0x548] sm:$0xff] }
 0x115   : > { %3178 = vmatmul.mubr.bf16.vlgmr.msra.gmra.mrb[0].mxu0 %v4975_v35  ;;  %v5073_v35 = vcombine.low %v547_v16, %v559_v17  ;;  %v631_v59 = vld [vmem:[%s7240_s21 + $0x5a8] sm:$0xff] }
 0x116   : > { %3275 = vmatmul.mubr.bf16.vlgmr.msra.gmra.mrb[0].mxu1 %v4977_v38  ;;  %5513 = vmatpush3.bf16.msra.mxu0 %v6407_v41  ;;  %v6430_v38 = vld [vmem:[#allocation6 + $0x170] sm:$0xff]   ;;  %v594_v41 = vld [vmem:[%s7240_s21 + $0x480] sm:$0xff]  ;;  %v5145_v5 = vcombine.low %v619_v57, %v631_v59  ;;  %v6442_v17 = vld [vmem:[#allocation6 + $0x248] sm:$0xff]  }
 0x117   : > { %5577 = vmatpush3.bf16.msra.mxu1 %v6409_v43  ;;  %3185 = vmatprep.mubr.bf16.mxu0 %v5000_v46  ;;  %v6433_v43 = vld [vmem:[#allocation6 + $0x1b0] sm:$0xff]   ;;  %v6434_v46 = vld [vmem:[#allocation6 + $0x178] sm:$0xff]  }
 0x118   : > { %3282 = vmatprep.mubr.bf16.mxu1 %v5002_v49  ;;  %5514 = vmatprep.subr.bf16.mxu0 %v6410_v50  ;;  %v5097_v49 = vcombine.low %v571_v29, %v583_v30  ;;  %v5120_v50 = vcombine.high %v594_v41, %v606_v42 }
 0x119   : > { %5578 = vmatprep.subr.bf16.mxu1 %v6412_v54  ;;  %v618_v54 = vld [vmem:[%s7240_s21 + $0x540] sm:$0xff] }
 0x11a   : > { %5515 = vmatpush3.bf16.msra.mxu0 %v6411_v52  ;;  %v5122_v52 = vcombine.high %v595_v44, %v607_v45 }
 0x11b   : > { %5579 = vmatpush3.bf16.msra.mxu1 %v6413_v55  ;;  %5516 = vmatprep.subr.bf16.mxu0 %v6414_v62  ;;  %v630_v55 = vld [vmem:[%s7240_s21 + $0x5a0] sm:$0xff] }
 0x11c   : > { %5580 = vmatprep.subr.bf16.mxu1 %v6416_v0  ;;  %v5144_v62 = vcombine.high %v618_v54, %v630_v55  ;;  %v452_v0 = vld [vmem:[%s7240_s21 + $0x10] sm:$0xff]  ;;  %v5143_v4 = vcombine.low %v618_v54, %v630_v55  ;;  %v549_v54 = vld [vmem:[%s7240_s21 + $0x318] sm:$0xff] }
 0x11d   : > { %3186 = vmatmul.mubr.bf16.gmra.mrb[4].mxu0 %v4999_v51  ;;  %v6436_v51 = vld [vmem:[#allocation6 + $0x1f8] sm:$0xff]  }
 0x11e   : > { %3283 = vmatmul.mubr.bf16.gmra.mrb[4].mxu1 %v5001_v53  ;;  %3193 = vmatprep.mubr.bf16.mxu0 %v5024_v60  ;;  %v6437_v53 = vld [vmem:[#allocation6 + $0x1b8] sm:$0xff]   ;;  %v5119_v60 = vcombine.low %v594_v41, %v606_v42  ;;  %v6454_v42 = vld [vmem:[#allocation6 + $0x260] sm:$0xff]  }
 0x11f   : > { %3290 = vmatprep.mubr.bf16.mxu1 %v5026_v61  ;;  %5517 = vmatpush3.bf16.msra.mxu0 %v6415_v63  ;;  %v5121_v61 = vcombine.low %v595_v44, %v607_v45  ;;  %v5146_v63 = vcombine.high %v619_v57, %v631_v59  ;;  %v6453_v41 = vld [vmem:[#allocation6 + $0x298] sm:$0xff]   ;;  %v6456_v44 = vld [vmem:[#allocation6 + $0x2e0] sm:$0xff]   ;;  %v6461_v57 = vld [vmem:[#allocation6 + $0x2a8] sm:$0xff]  }
 0x120   : > { %5581 = vmatpush3.bf16.msra.mxu1 %v6417_v1  ;;  %5518 = vmatprep.subr.bf16.mxu0 %v6418_v10  ;;  %v464_v1 = vld [vmem:[%s7240_s21 + $0x70] sm:$0xff]  ;;  %v561_v55 = vld [vmem:[%s7240_s21 + $0x378] sm:$0xff] }
 0x121   : > { %5582 = vmatprep.subr.bf16.mxu1 %v6420_v12  ;;  %v4979_v10 = vcombine.low %v452_v0, %v464_v1  ;;  %v477_v12 = vld [vmem:[%s7240_s21 + $0xd8] sm:$0xff] }
 0x123   : > { %5519 = vmatpush3.bf16.msra.mxu0 %v6419_v11  ;;  %v6439_v11 = vld [vmem:[#allocation6 + $0x200] sm:$0xff]  }
 0x124   : > { %5583 = vmatpush3.bf16.msra.mxu1 %v6421_v13  ;;  %5520 = vmatprep.subr.bf16.mxu0 %v6422_v18  ;;  %v489_v13 = vld [vmem:[%s7240_s21 + $0x138] sm:$0xff] }
 0x125   : > { %3194 = vmatmul.mubr.bf16.gmra.mrb[8].mxu0 %v5023_v2  ;;  %5584 = vmatprep.subr.bf16.mxu1 %v6424_v23  ;;  %v453_v2 = vld [vmem:[%s7240_s21 + $0x18] sm:$0xff]  ;;  %v5006_v18 = vcombine.high %v477_v12, %v489_v13  ;;  %v512_v23 = vld [vmem:[%s7240_s21 + $0x1f0] sm:$0xff]  ;;  %v5005_v29 = vcombine.low %v477_v12, %v489_v13  ;;  %v6472_v12 = vld [vmem:[#allocation6 + $0x3c0] sm:$0xff]   ;;  %v5077_v13 = vcombine.low %v549_v54, %v561_v55 }
 0x126   : > { %3291 = vmatmul.mubr.bf16.gmra.mrb[8].mxu1 %v5025_v6  ;;  %3201 = vmatprep.mubr.bf16.mxu0 %v5048_v7  ;;  %v4980_v6 = vcombine.high %v452_v0, %v464_v1  ;;  %v4982_v7 = vcombine.high %v453_v2, %v465_v3  ;;  %v4981_v14 = vcombine.low %v453_v2, %v465_v3  ;;  %v6463_v0 = vld [vmem:[#allocation6 + $0x230] sm:$0xff]   ;;  %v6466_v2 = vld [vmem:[#allocation6 + $0x278] sm:$0xff]  }
 0x127   : > { %3298 = vmatprep.mubr.bf16.mxu1 %v5050_v9  ;;  %5521 = vmatpush3.bf16.msra.mxu0 %v6423_v20  ;;  %v488_v9 = vld [vmem:[%s7240_s21 + $0x130] sm:$0xff]  ;;  %v6444_v20 = vld [vmem:[#allocation6 + $0x2c8] sm:$0xff]  }
 0x128   : > { %5585 = vmatpush3.bf16.msra.mxu1 %v6425_v25  ;;  %5522 = vmatprep.subr.bf16.mxu0 %v6426_v28  ;;  %v5004_v16 = vcombine.high %v476_v8, %v488_v9  ;;  %v513_v25 = vld [vmem:[%s7240_s21 + $0x1f8] sm:$0xff]  ;;  %v5003_v28 = vcombine.low %v476_v8, %v488_v9  ;;  %v6465_v1 = vld [vmem:[#allocation6 + $0x2b0] sm:$0xff]  }
 0x129   : > { %5586 = vmatprep.subr.bf16.mxu1 %v6428_v32  ;;  %v6447_v32 = vld [vmem:[#allocation6 + $0x210] sm:$0xff]   ;;  %v6467_v8 = vld [vmem:[#allocation6 + $0x238] sm:$0xff]  }
 0x12a   : > { %v572_v3 = vld [vmem:[%s7240_s21 + $0x3d0] sm:$0xff]  ;;  %v6469_v9 = vld [vmem:[#allocation6 + $0x2b8] sm:$0xff]  }
 0x12b   : > { %5523 = vmatpush3.bf16.msra.mxu0 %v6427_v31 }
 0x12c   : > { %5587 = vmatpush3.bf16.msra.mxu1 %v6429_v33  ;;  %5524 = vmatprep.subr.bf16.mxu0 %v6430_v38  ;;  %v6449_v33 = vld [vmem:[#allocation6 + $0x290] sm:$0xff]   ;;  %v525_v38 = vld [vmem:[%s7240_s21 + $0x258] sm:$0xff] }
 0x12d   : > { %3202 = vmatmul.mubr.bf16.gmra.mrb[12].mxu0 %v5047_v19  ;;  %5588 = vmatprep.subr.bf16.mxu1 %v6432_v40  ;;  %v6443_v19 = vld [vmem:[#allocation6 + $0x208] sm:$0xff]   ;;  %v6451_v40 = vld [vmem:[#allocation6 + $0x218] sm:$0xff]  }
 0x12e   : > { %3299 = vmatmul.mubr.bf16.gmra.mrb[12].mxu1 %v5049_v21  ;;  %3209 = vmatprep.mubr.bf16.mxu0 %v5072_v22  ;;  %v6445_v21 = vld [vmem:[#allocation6 + $0x288] sm:$0xff]   ;;  %v500_v22 = vld [vmem:[%s7240_s21 + $0x190] sm:$0xff] }
 0x12f   : > { %3306 = vmatprep.mubr.bf16.mxu1 %v5074_v24  ;;  %5525 = vmatpush3.bf16.msra.mxu0 %v6431_v39  ;;  %v501_v24 = vld [vmem:[%s7240_s21 + $0x198] sm:$0xff]  ;;  %v5028_v30 = vcombine.high %v500_v22, %v512_v23 }
 0x130   : > { %5589 = vmatpush3.bf16.msra.mxu1 %v6433_v43  ;;  %5526 = vmatprep.subr.bf16.mxu0 %v6434_v46  ;;  %v5030_v31 = vcombine.high %v501_v24, %v513_v25  ;;  %v537_v39 = vld [vmem:[%s7240_s21 + $0x2b8] sm:$0xff]  ;;  %v5027_v43 = vcombine.low %v500_v22, %v512_v23  ;;  %v5029_v45 = vcombine.low %v501_v24, %v513_v25  ;;  %v620_v24 = vld [vmem:[%s7240_s21 + $0x550] sm:$0xff] }
 0x131   : > { %5590 = vmatprep.subr.bf16.mxu1 %v6436_v51  ;;  %v548_v51 = vld [vmem:[%s7240_s21 + $0x310] sm:$0xff] }
 0x132   : > { %v632_v25 = vld [vmem:[%s7240_s21 + $0x5b0] sm:$0xff] }
 0x133   : > { %5527 = vmatpush3.bf16.msra.mxu0 %v6435_v48  ;;  %v5054_v48 = vcombine.high %v525_v38, %v537_v39 }
 0x134   : > { %5591 = vmatpush3.bf16.msra.mxu1 %v6437_v53  ;;  %5640 = vmatprep.subr.bf16.mxu0 %v6438_v56  ;;  %v560_v53 = vld [vmem:[%s7240_s21 + $0x370] sm:$0xff]  ;;  %v6459_v56 = vld [vmem:[#allocation6 + $0x228] sm:$0xff]  }
 0x135   : > { %3210 = vmatmul.mubr.bf16.gmra.mrb[16].mxu0 %v5071_v34  ;;  %5704 = vmatprep.subr.bf16.mxu1 %v6440_v58  ;;  %v6450_v34 = vld [vmem:[#allocation6 + $0x258] sm:$0xff]   ;;  %v6462_v58 = vld [vmem:[#allocation6 + $0x270] sm:$0xff]  }
 0x136   : > { %3307 = vmatmul.mubr.bf16.gmra.mrb[16].mxu1 %v5073_v35  ;;  %3217 = vmatprep.mubr.bf16.mxu0 %v5096_v36  ;;  %v524_v35 = vld [vmem:[%s7240_s21 + $0x250] sm:$0xff] }
 0x137   : > { %3314 = vmatprep.mubr.bf16.mxu1 %v5098_v37  ;;  %v536_v36 = vld [vmem:[%s7240_s21 + $0x2b0] sm:$0xff]  ;;  %v6452_v37 = vld [vmem:[#allocation6 + $0x2d8] sm:$0xff]  }
 0x138   : > { %v5052_v46 = vcombine.high %v524_v35, %v536_v36  ;;  %v5051_v59 = vcombine.low %v524_v35, %v536_v36  ;;  %v467_v35 = vld [vmem:[%s7240_s21 + $0x88] sm:$0xff]  ;;  %v5147_v36 = vcombine.low %v620_v24, %v632_v25 }
 0x13d   : > { %3218 = vmatmul.mubr.bf16.gmra.mrb[20].mxu0 %v5095_v47  ;;  %v6455_v47 = vld [vmem:[#allocation6 + $0x220] sm:$0xff]  }
 0x13e   : > { %3315 = vmatmul.mubr.bf16.gmra.mrb[20].mxu1 %v5097_v49  ;;  %3225 = vmatprep.mubr.bf16.mxu0 %v5120_v50  ;;  %v6457_v49 = vld [vmem:[#allocation6 + $0x2a0] sm:$0xff]   ;;  %v6458_v50 = vld [vmem:[#allocation6 + $0x268] sm:$0xff]  }
 0x13f   : > { %3322 = vmatprep.mubr.bf16.mxu1 %v5122_v52  ;;  %v6460_v52 = vld [vmem:[#allocation6 + $0x2e8] sm:$0xff]  }
 0x145   : > { %3226 = vmatmul.mubr.bf16.gmra.mrb[24].mxu0 %v5119_v60  ;;  %v6464_v60 = vld [vmem:[#allocation6 + $0x2f0] sm:$0xff]  }
 0x146   : > { %3323 = vmatmul.mubr.bf16.gmra.mrb[24].mxu1 %v5121_v61  ;;  %3233 = vmatprep.mubr.bf16.mxu0 %v5144_v62  ;;  %v5053_v61 = vcombine.low %v525_v38, %v537_v39  ;;  %v5076_v62 = vcombine.high %v548_v51, %v560_v53 }
 0x147   : > { %3330 = vmatprep.mubr.bf16.mxu1 %v5146_v63  ;;  %v5078_v63 = vcombine.high %v549_v54, %v561_v55  ;;  %v502_v54 = vld [vmem:[%s7240_s21 + $0x1a0] sm:$0xff] }
 0x148   : > { %v514_v55 = vld [vmem:[%s7240_s21 + $0x200] sm:$0xff] }
 0x14d   : > { %3234 = vmatmul.mubr.bf16.gmra.mrb[28].mxu0 %v5143_v4  ;;  %v584_v4 = vld [vmem:[%s7240_s21 + $0x430] sm:$0xff] }
 0x14e   : > { %3331 = vmatmul.mubr.bf16.gmra.mrb[28].mxu1 %v5145_v5  ;;  %3371 = vmatprep.mubr.bf16.mxu0 %v4980_v6  ;;  %v6468_v5 = vld [vmem:[#allocation6 + $0x2f8] sm:$0xff]  }
 0x14f   : > { %3468 = vmatprep.mubr.bf16.mxu1 %v4982_v7  ;;  %v573_v6 = vld [vmem:[%s7240_s21 + $0x3d8] sm:$0xff] }
 0x150   : > { %v585_v7 = vld [vmem:[%s7240_s21 + $0x438] sm:$0xff] }
 0x155   : > { %3372 = vmatmul.mubr.bf16.vlgmr.msra.gmra.mrb[32].mxu0 %v4979_v10  ;;  %v6470_v10 = vld [vmem:[#allocation6 + $0x340] sm:$0xff]  }
 0x156   : > { %3469 = vmatmul.mubr.bf16.vlgmr.msra.gmra.mrb[32].mxu1 %v4981_v14  ;;  %5641 = vmatpush3.bf16.msra.mxu0 %v6439_v11  ;;  %v5075_v11 = vcombine.low %v548_v51, %v560_v53  ;;  %v5100_v14 = vcombine.high %v572_v3, %v584_v4  ;;  %v6475_v51 = vld [vmem:[#allocation6 + $0x308] sm:$0xff]  }
 0x157   : > { %5705 = vmatpush3.bf16.msra.mxu1 %v6441_v15  ;;  %3379 = vmatprep.mubr.bf16.mxu0 %v5004_v16  ;;  %v5102_v15 = vcombine.high %v573_v6, %v585_v7  ;;  %v596_v16 = vld [vmem:[%s7240_s21 + $0x490] sm:$0xff]  ;;  %v6477_v53 = vld [vmem:[#allocation6 + $0x388] sm:$0xff]  }
 0x158   : > { %3476 = vmatprep.mubr.bf16.mxu1 %v5006_v18  ;;  %5642 = vmatprep.subr.bf16.mxu0 %v6442_v17  ;;  %v608_v17 = vld [vmem:[%s7240_s21 + $0x4f0] sm:$0xff]  ;;  %v597_v18 = vld [vmem:[%s7240_s21 + $0x498] sm:$0xff] }
 0x159   : > { %5706 = vmatprep.subr.bf16.mxu1 %v6444_v20  ;;  %v5099_v20 = vcombine.low %v572_v3, %v584_v4  ;;  %v5124_v22 = vcombine.high %v596_v16, %v608_v17  ;;  %v526_v3 = vld [vmem:[%s7240_s21 + $0x260] sm:$0xff] }
 0x15a   : > { %5643 = vmatpush3.bf16.msra.mxu0 %v6443_v19  ;;  %v609_v19 = vld [vmem:[%s7240_s21 + $0x4f8] sm:$0xff]  ;;  %v538_v4 = vld [vmem:[%s7240_s21 + $0x2c0] sm:$0xff] }
 0x15b   : > { %5707 = vmatpush3.bf16.msra.mxu1 %v6445_v21  ;;  %5644 = vmatprep.subr.bf16.mxu0 %v6446_v26  ;;  %v5101_v21 = vcombine.low %v573_v6, %v585_v7  ;;  %v5126_v23 = vcombine.high %v597_v18, %v609_v19  ;;  %v621_v26 = vld [vmem:[%s7240_s21 + $0x558] sm:$0xff]  ;;  %v527_v6 = vld [vmem:[%s7240_s21 + $0x268] sm:$0xff] }
 0x15c   : > { %5708 = vmatprep.subr.bf16.mxu1 %v6448_v27  ;;  %v633_v27 = vld [vmem:[%s7240_s21 + $0x5b8] sm:$0xff]  ;;  %v539_v7 = vld [vmem:[%s7240_s21 + $0x2c8] sm:$0xff] }
 0x15d   : > { %3380 = vmatmul.mubr.bf16.gmra.mrb[36].mxu0 %v5003_v28  ;;  %v5123_v28 = vcombine.low %v596_v16, %v608_v17  ;;  %v5058_v16 = vcombine.high %v527_v6, %v539_v7  ;;  %v6489_v17 = vld [vmem:[#allocation6 + $0x3a0] sm:$0xff]  }
 0x15e   : > { %3477 = vmatmul.mubr.bf16.gmra.mrb[36].mxu1 %v5005_v29  ;;  %3387 = vmatprep.mubr.bf16.mxu0 %v5028_v30  ;;  %v5125_v29 = vcombine.low %v597_v18, %v609_v19  ;;  %v5148_v30 = vcombine.high %v620_v24, %v632_v25  ;;  %v6490_v18 = vld [vmem:[#allocation6 + $0x368] sm:$0xff]   ;;  %v550_v19 = vld [vmem:[%s7240_s21 + $0x320] sm:$0xff] }
 0x15f   : > { %3484 = vmatprep.mubr.bf16.mxu1 %v5030_v31  ;;  %5645 = vmatpush3.bf16.msra.mxu0 %v6447_v32  ;;  %v5150_v31 = vcombine.high %v621_v26, %v633_v27  ;;  %v454_v32 = vld [vmem:[%s7240_s21 + $0x20] sm:$0xff]  ;;  %v6491_v24 = vld [vmem:[#allocation6 + $0x328] sm:$0xff]  }
 0x160   : > { %5709 = vmatpush3.bf16.msra.mxu1 %v6449_v33  ;;  %5646 = vmatprep.subr.bf16.mxu0 %v6450_v34  ;;  %v466_v33 = vld [vmem:[%s7240_s21 + $0x80] sm:$0xff]  ;;  %v455_v34 = vld [vmem:[%s7240_s21 + $0x28] sm:$0xff] }
 0x161   : > { %5710 = vmatprep.subr.bf16.mxu1 %v6452_v37  ;;  %v5149_v37 = vcombine.low %v621_v26, %v633_v27  ;;  %v4984_v38 = vcombine.high %v454_v32, %v466_v33  ;;  %v4986_v39 = vcombine.high %v455_v34, %v467_v35  ;;  %v6493_v25 = vld [vmem:[#allocation6 + $0x3a8] sm:$0xff]   ;;  %v6494_v26 = vld [vmem:[#allocation6 + $0x370] sm:$0xff]   ;;  %v5055_v27 = vcombine.low %v526_v3, %v538_v4 }
 0x163   : > { %5647 = vmatpush3.bf16.msra.mxu0 %v6451_v40  ;;  %v478_v40 = vld [vmem:[%s7240_s21 + $0xe0] sm:$0xff] }
 0x164   : > { %5711 = vmatpush3.bf16.msra.mxu1 %v6453_v41  ;;  %5648 = vmatprep.subr.bf16.mxu0 %v6454_v42  ;;  %v490_v41 = vld [vmem:[%s7240_s21 + $0x140] sm:$0xff]  ;;  %v4983_v42 = vcombine.low %v454_v32, %v466_v33  ;;  %v6495_v32 = vld [vmem:[#allocation6 + $0x330] sm:$0xff]  }
 0x165   : > { %3388 = vmatmul.mubr.bf16.gmra.mrb[40].mxu0 %v5027_v43  ;;  %5712 = vmatprep.subr.bf16.mxu1 %v6456_v44  ;;  %v6471_v43 = vld [vmem:[#allocation6 + $0x300] sm:$0xff]   ;;  %v479_v44 = vld [vmem:[%s7240_s21 + $0xe8] sm:$0xff]  ;;  %v6497_v33 = vld [vmem:[#allocation6 + $0x3b0] sm:$0xff]  }
 0x166   : > { %3485 = vmatmul.mubr.bf16.gmra.mrb[40].mxu1 %v5029_v45  ;;  %3395 = vmatprep.mubr.bf16.mxu0 %v5052_v46  ;;  %v491_v45 = vld [vmem:[%s7240_s21 + $0x148] sm:$0xff]  ;;  %v4985_v46 = vcombine.low %v455_v34, %v467_v35  ;;  %v6498_v34 = vld [vmem:[#allocation6 + $0x378] sm:$0xff]   ;;  %v574_v35 = vld [vmem:[%s7240_s21 + $0x3e0] sm:$0xff] }
 0x167   : > { %3492 = vmatprep.mubr.bf16.mxu1 %v5054_v48  ;;  %5649 = vmatpush3.bf16.msra.mxu0 %v6455_v47  ;;  %v6473_v47 = vld [vmem:[#allocation6 + $0x380] sm:$0xff]   ;;  %v5008_v48 = vcombine.high %v478_v40, %v490_v41 }
 0x168   : > { %5713 = vmatpush3.bf16.msra.mxu1 %v6457_v49  ;;  %5650 = vmatprep.subr.bf16.mxu0 %v6458_v50  ;;  %v6474_v49 = vld [vmem:[#allocation6 + $0x348] sm:$0xff]   ;;  %v5010_v50 = vcombine.high %v479_v44, %v491_v45 }
 0x169   : > { %5714 = vmatprep.subr.bf16.mxu1 %v6460_v52  ;;  %v6476_v52 = vld [vmem:[#allocation6 + $0x3c8] sm:$0xff]  }
 0x16b   : > { %5651 = vmatpush3.bf16.msra.mxu0 %v6459_v56  ;;  %v503_v56 = vld [vmem:[%s7240_s21 + $0x1a8] sm:$0xff] }
 0x16c   : > { %5715 = vmatpush3.bf16.msra.mxu1 %v6461_v57  ;;  %5652 = vmatprep.subr.bf16.mxu0 %v6462_v58  ;;  %v515_v57 = vld [vmem:[%s7240_s21 + $0x208] sm:$0xff]  ;;  %v6478_v58 = vld [vmem:[#allocation6 + $0x350] sm:$0xff]  }
 0x16d   : > { %3396 = vmatmul.mubr.bf16.gmra.mrb[44].mxu0 %v5051_v59  ;;  %5716 = vmatprep.subr.bf16.mxu1 %v6464_v60  ;;  %v6480_v59 = vld [vmem:[#allocation6 + $0x3d0] sm:$0xff]   ;;  %v5007_v60 = vcombine.low %v478_v40, %v490_v41  ;;  %v6499_v40 = vld [vmem:[#allocation6 + $0x338] sm:$0xff]  }
 0x16e   : > { %3493 = vmatmul.mubr.bf16.gmra.mrb[44].mxu1 %v5053_v61  ;;  %3403 = vmatprep.mubr.bf16.mxu0 %v5076_v62  ;;  %v5009_v61 = vcombine.low %v479_v44, %v491_v45  ;;  %v5032_v62 = vcombine.high %v502_v54, %v514_v55  ;;  %v6501_v41 = vld [vmem:[#allocation6 + $0x3b8] sm:$0xff]   ;;  %v6504_v44 = vld [vmem:[#allocation6 + $0x4c0] sm:$0xff]  }
 0x16f   : > { %3500 = vmatprep.mubr.bf16.mxu1 %v5078_v63  ;;  %5653 = vmatpush3.bf16.msra.mxu0 %v6463_v0  ;;  %v5034_v63 = vcombine.high %v503_v56, %v515_v57  ;;  %v6479_v0 = vld [vmem:[#allocation6 + $0x310] sm:$0xff]  }
 0x170   : > { %5717 = vmatpush3.bf16.msra.mxu1 %v6465_v1  ;;  %5654 = vmatprep.subr.bf16.mxu0 %v6466_v2  ;;  %v6481_v1 = vld [vmem:[#allocation6 + $0x390] sm:$0xff]   ;;  %v6482_v2 = vld [vmem:[#allocation6 + $0x358] sm:$0xff]  }
 0x171   : > { %5718 = vmatprep.subr.bf16.mxu1 %v6468_v5  ;;  %v6484_v5 = vld [vmem:[#allocation6 + $0x3d8] sm:$0xff]  }
 0x173   : > { %5655 = vmatpush3.bf16.msra.mxu0 %v6467_v8  ;;  %v6483_v8 = vld [vmem:[#allocation6 + $0x318] sm:$0xff]  }
 0x174   : > { %5719 = vmatpush3.bf16.msra.mxu1 %v6469_v9  ;;  %5768 = vmatprep.subr.bf16.mxu0 %v6470_v10  ;;  %v6485_v9 = vld [vmem:[#allocation6 + $0x398] sm:$0xff]   ;;  %v6486_v10 = vld [vmem:[#allocation6 + $0x360] sm:$0xff]  }
 0x175   : > { %3404 = vmatmul.mubr.bf16.gmra.mrb[48].mxu0 %v5075_v11  ;;  %5832 = vmatprep.subr.bf16.mxu1 %v6472_v12  ;;  %v5031_v11 = vcombine.low %v502_v54, %v514_v55  ;;  %v6488_v12 = vld [vmem:[#allocation6 + $0x3e0] sm:$0xff]  }
 0x176   : > { %3501 = vmatmul.mubr.bf16.gmra.mrb[48].mxu1 %v5077_v13  ;;  %3411 = vmatprep.mubr.bf16.mxu0 %v5100_v14  ;;  %v5033_v13 = vcombine.low %v503_v56, %v515_v57  ;;  %v5056_v14 = vcombine.high %v526_v3, %v538_v4  ;;  %v622_v56 = vld [vmem:[%s7240_s21 + $0x560] sm:$0xff]  ;;  %v469_v3 = vld [vmem:[%s7240_s21 + $0x98] sm:$0xff] }
 0x177   : > { %3508 = vmatprep.mubr.bf16.mxu1 %v5102_v15  ;;  %v6487_v15 = vld [vmem:[#allocation6 + $0x320] sm:$0xff]  }
 0x178   : > { %v634_v57 = vld [vmem:[%s7240_s21 + $0x5c0] sm:$0xff] }
 0x179   : > { %v5151_v4 = vcombine.low %v622_v56, %v634_v57 }
 0x17d   : > { %3412 = vmatmul.mubr.bf16.gmra.mrb[52].mxu0 %v5099_v20  ;;  %v6492_v20 = vld [vmem:[#allocation6 + $0x3e8] sm:$0xff]  }
 0x17e   : > { %3509 = vmatmul.mubr.bf16.gmra.mrb[52].mxu1 %v5101_v21  ;;  %3419 = vmatprep.mubr.bf16.mxu0 %v5124_v22  ;;  %v562_v21 = vld [vmem:[%s7240_s21 + $0x380] sm:$0xff]  ;;  %v551_v22 = vld [vmem:[%s7240_s21 + $0x328] sm:$0xff] }
 0x17f   : > { %3516 = vmatprep.mubr.bf16.mxu1 %v5126_v23  ;;  %v563_v23 = vld [vmem:[%s7240_s21 + $0x388] sm:$0xff] }
 0x180   : > { %v5081_v45 = vcombine.low %v551_v22, %v563_v23 }
 0x185   : > { %3420 = vmatmul.mubr.bf16.gmra.mrb[56].mxu0 %v5123_v28  ;;  %v6496_v28 = vld [vmem:[#allocation6 + $0x3f0] sm:$0xff]  }
 0x186   : > { %3517 = vmatmul.mubr.bf16.gmra.mrb[56].mxu1 %v5125_v29  ;;  %3427 = vmatprep.mubr.bf16.mxu0 %v5148_v30  ;;  %v5057_v29 = vcombine.low %v527_v6, %v539_v7  ;;  %v5080_v30 = vcombine.high %v550_v19, %v562_v21 }
 0x187   : > { %3524 = vmatprep.mubr.bf16.mxu1 %v5150_v31  ;;  %v5082_v31 = vcombine.high %v551_v22, %v563_v23  ;;  %v504_v22 = vld [vmem:[%s7240_s21 + $0x1b0] sm:$0xff] }
 0x188   : > { %v516_v23 = vld [vmem:[%s7240_s21 + $0x210] sm:$0xff] }
 0x18d   : > { %3428 = vmatmul.mubr.bf16.gmra.mrb[60].mxu0 %v5147_v36  ;;  %v586_v36 = vld [vmem:[%s7240_s21 + $0x440] sm:$0xff] }
 0x18e   : > { %3525 = vmatmul.mubr.bf16.gmra.mrb[60].mxu1 %v5149_v37  ;;  %3565 = vmatprep.mubr.bf16.mxu0 %v4984_v38  ;;  %v6500_v37 = vld [vmem:[#allocation6 + $0x3f8] sm:$0xff]   ;;  %v575_v38 = vld [vmem:[%s7240_s21 + $0x3e8] sm:$0xff] }
 0x18f   : > { %3662 = vmatprep.mubr.bf16.mxu1 %v4986_v39  ;;  %v587_v39 = vld [vmem:[%s7240_s21 + $0x448] sm:$0xff] }
 0x195   : > { %3566 = vmatmul.mubr.bf16.vlgmr.msra.gmra.mrb[64].mxu0 %v4983_v42  ;;  %v6502_v42 = vld [vmem:[#allocation6 + $0x440] sm:$0xff]  }
 0x196   : > { %3663 = vmatmul.mubr.bf16.vlgmr.msra.gmra.mrb[64].mxu1 %v4985_v46  ;;  %5769 = vmatpush3.bf16.msra.mxu0 %v6471_v43  ;;  %v5079_v43 = vcombine.low %v550_v19, %v562_v21  ;;  %v5104_v46 = vcombine.high %v574_v35, %v586_v36  ;;  %v6507_v19 = vld [vmem:[#allocation6 + $0x408] sm:$0xff]  }
 0x197   : > { %5833 = vmatpush3.bf16.msra.mxu1 %v6473_v47  ;;  %3573 = vmatprep.mubr.bf16.mxu0 %v5008_v48  ;;  %v5106_v47 = vcombine.high %v575_v38, %v587_v39  ;;  %v598_v48 = vld [vmem:[%s7240_s21 + $0x4a0] sm:$0xff]  ;;  %v6509_v21 = vld [vmem:[#allocation6 + $0x488] sm:$0xff]  }
 0x198   : > { %3670 = vmatprep.mubr.bf16.mxu1 %v5010_v50  ;;  %5770 = vmatprep.subr.bf16.mxu0 %v6474_v49  ;;  %v610_v49 = vld [vmem:[%s7240_s21 + $0x500] sm:$0xff]  ;;  %v599_v50 = vld [vmem:[%s7240_s21 + $0x4a8] sm:$0xff] }
 0x199   : > { %5834 = vmatprep.subr.bf16.mxu1 %v6476_v52  ;;  %v5103_v52 = vcombine.low %v574_v35, %v586_v36  ;;  %v5128_v54 = vcombine.high %v598_v48, %v610_v49  ;;  %v7371_v35 = vld [vmem:[%s7240_s21 + $0x270] sm:$0xff] }
 0x19a   : > { %5771 = vmatpush3.bf16.msra.mxu0 %v6475_v51  ;;  %v611_v51 = vld [vmem:[%s7240_s21 + $0x508] sm:$0xff]  ;;  %v7374_v36 = vld [vmem:[%s7240_s21 + $0x2d0] sm:$0xff] }
 0x19b   : > { %5835 = vmatpush3.bf16.msra.mxu1 %v6477_v53  ;;  %5772 = vmatprep.subr.bf16.mxu0 %v6478_v58  ;;  %v5105_v53 = vcombine.low %v575_v38, %v587_v39  ;;  %v5130_v55 = vcombine.high %v599_v50, %v611_v51  ;;  %v623_v58 = vld [vmem:[%s7240_s21 + $0x568] sm:$0xff]  ;;  %v7377_v38 = vld [vmem:[%s7240_s21 + $0x278] sm:$0xff] }
 0x19c   : > { %5836 = vmatprep.subr.bf16.mxu1 %v6480_v59  ;;  %v635_v59 = vld [vmem:[%s7240_s21 + $0x5c8] sm:$0xff]  ;;  %v7380_v39 = vld [vmem:[%s7240_s21 + $0x2d8] sm:$0xff] }
 0x19d   : > { %3574 = vmatmul.mubr.bf16.gmra.mrb[68].mxu0 %v5007_v60  ;;  %v5127_v60 = vcombine.low %v598_v48, %v610_v49  ;;  %v5062_v48 = vcombine.high %v7377_v38, %v7380_v39  ;;  %v6521_v49 = vld [vmem:[#allocation6 + $0x4a0] sm:$0xff]  }
 0x19e   : > { %3671 = vmatmul.mubr.bf16.gmra.mrb[68].mxu1 %v5009_v61  ;;  %3581 = vmatprep.mubr.bf16.mxu0 %v5032_v62  ;;  %v5129_v61 = vcombine.low %v599_v50, %v611_v51  ;;  %v5152_v62 = vcombine.high %v622_v56, %v634_v57  ;;  %v6522_v50 = vld [vmem:[#allocation6 + $0x468] sm:$0xff]   ;;  %v7396_v57 = vld [vmem:[%s7240_s21 + $0x398] sm:$0xff] }
 0x19f   : > { %3678 = vmatprep.mubr.bf16.mxu1 %v5034_v63  ;;  %5773 = vmatpush3.bf16.msra.mxu0 %v6479_v0  ;;  %v5154_v63 = vcombine.high %v623_v58, %v635_v59  ;;  %v456_v0 = vld [vmem:[%s7240_s21 + $0x30] sm:$0xff]  ;;  %v6524_v51 = vld [vmem:[#allocation6 + $0x4e8] sm:$0xff]  }
 0x1a0   : > { %5837 = vmatpush3.bf16.msra.mxu1 %v6481_v1  ;;  %5774 = vmatprep.subr.bf16.mxu0 %v6482_v2  ;;  %v468_v1 = vld [vmem:[%s7240_s21 + $0x90] sm:$0xff]  ;;  %v457_v2 = vld [vmem:[%s7240_s21 + $0x38] sm:$0xff] }
 0x1a1   : > { %5838 = vmatprep.subr.bf16.mxu1 %v6484_v5  ;;  %v5153_v5 = vcombine.low %v623_v58, %v635_v59  ;;  %v4988_v6 = vcombine.high %v456_v0, %v468_v1  ;;  %v4990_v7 = vcombine.high %v457_v2, %v469_v3  ;;  %v6525_v58 = vld [vmem:[#allocation6 + $0x4a8] sm:$0xff]   ;;  %v6526_v59 = vld [vmem:[#allocation6 + $0x470] sm:$0xff]  }
 0x1a3   : > { %5775 = vmatpush3.bf16.msra.mxu0 %v6483_v8  ;;  %v480_v8 = vld [vmem:[%s7240_s21 + $0xf0] sm:$0xff] }
 0x1a4   : > { %5839 = vmatpush3.bf16.msra.mxu1 %v6485_v9  ;;  %5776 = vmatprep.subr.bf16.mxu0 %v6486_v10  ;;  %v492_v9 = vld [vmem:[%s7240_s21 + $0x150] sm:$0xff]  ;;  %v4987_v10 = vcombine.low %v456_v0, %v468_v1 }
 0x1a5   : > { %3582 = vmatmul.mubr.bf16.gmra.mrb[72].mxu0 %v5031_v11  ;;  %5840 = vmatprep.subr.bf16.mxu1 %v6488_v12  ;;  %v481_v11 = vld [vmem:[%s7240_s21 + $0xf8] sm:$0xff]  ;;  %v6528_v0 = vld [vmem:[#allocation6 + $0x4f0] sm:$0xff]  }
 0x1a6   : > { %3679 = vmatmul.mubr.bf16.gmra.mrb[72].mxu1 %v5033_v13  ;;  %3589 = vmatprep.mubr.bf16.mxu0 %v5056_v14  ;;  %v493_v12 = vld [vmem:[%s7240_s21 + $0x158] sm:$0xff]  ;;  %v4989_v13 = vcombine.low %v457_v2, %v469_v3  ;;  %v6503_v14 = vld [vmem:[#allocation6 + $0x400] sm:$0xff]  }
 0x1a7   : > { %3686 = vmatprep.mubr.bf16.mxu1 %v5058_v16  ;;  %5777 = vmatpush3.bf16.msra.mxu0 %v6487_v15  ;;  %v6505_v15 = vld [vmem:[#allocation6 + $0x480] sm:$0xff]   ;;  %v5012_v16 = vcombine.high %v480_v8, %v492_v9 }
 0x1a8   : > { %5841 = vmatpush3.bf16.msra.mxu1 %v6489_v17  ;;  %5778 = vmatprep.subr.bf16.mxu0 %v6490_v18  ;;  %v6506_v17 = vld [vmem:[#allocation6 + $0x448] sm:$0xff]   ;;  %v5014_v18 = vcombine.high %v481_v11, %v493_v12 }
 0x1a9   : > { %5842 = vmatprep.subr.bf16.mxu1 %v6492_v20  ;;  %v6508_v20 = vld [vmem:[#allocation6 + $0x4c8] sm:$0xff]  }
 0x1ab   : > { %5779 = vmatpush3.bf16.msra.mxu0 %v6491_v24  ;;  %v505_v24 = vld [vmem:[%s7240_s21 + $0x1b8] sm:$0xff] }
 0x1ac   : > { %5843 = vmatpush3.bf16.msra.mxu1 %v6493_v25  ;;  %5780 = vmatprep.subr.bf16.mxu0 %v6494_v26  ;;  %v517_v25 = vld [vmem:[%s7240_s21 + $0x218] sm:$0xff]  ;;  %v6510_v26 = vld [vmem:[#allocation6 + $0x450] sm:$0xff]  }
 0x1ad   : > { %3590 = vmatmul.mubr.bf16.gmra.mrb[76].mxu0 %v5055_v27  ;;  %5844 = vmatprep.subr.bf16.mxu1 %v6496_v28  ;;  %v6512_v27 = vld [vmem:[#allocation6 + $0x4d0] sm:$0xff]   ;;  %v5011_v28 = vcombine.low %v480_v8, %v492_v9 }
 0x1ae   : > { %3687 = vmatmul.mubr.bf16.gmra.mrb[76].mxu1 %v5057_v29  ;;  %3597 = vmatprep.mubr.bf16.mxu0 %v5080_v30  ;;  %v5013_v29 = vcombine.low %v481_v11, %v493_v12  ;;  %v5036_v30 = vcombine.high %v504_v22, %v516_v23  ;;  %v6529_v11 = vld [vmem:[#allocation6 + $0x4b0] sm:$0xff]   ;;  %v6530_v12 = vld [vmem:[#allocation6 + $0x478] sm:$0xff]  }
 0x1af   : > { %3694 = vmatprep.mubr.bf16.mxu1 %v5082_v31  ;;  %5781 = vmatpush3.bf16.msra.mxu0 %v6495_v32  ;;  %v5038_v31 = vcombine.high %v505_v24, %v517_v25  ;;  %v6511_v32 = vld [vmem:[#allocation6 + $0x410] sm:$0xff]  }
 0x1b0   : > { %5845 = vmatpush3.bf16.msra.mxu1 %v6497_v33  ;;  %5782 = vmatprep.subr.bf16.mxu0 %v6498_v34  ;;  %v6513_v33 = vld [vmem:[#allocation6 + $0x490] sm:$0xff]   ;;  %v6514_v34 = vld [vmem:[#allocation6 + $0x458] sm:$0xff]  }
 0x1b1   : > { %5846 = vmatprep.subr.bf16.mxu1 %v6500_v37  ;;  %v6516_v37 = vld [vmem:[#allocation6 + $0x4d8] sm:$0xff]  }
 0x1b3   : > { %5783 = vmatpush3.bf16.msra.mxu0 %v6499_v40  ;;  %v6515_v40 = vld [vmem:[#allocation6 + $0x418] sm:$0xff]  }
 0x1b4   : > { %5847 = vmatpush3.bf16.msra.mxu1 %v6501_v41  ;;  %5896 = vmatprep.subr.bf16.mxu0 %v6502_v42  ;;  %v6517_v41 = vld [vmem:[#allocation6 + $0x498] sm:$0xff]   ;;  %v6518_v42 = vld [vmem:[#allocation6 + $0x460] sm:$0xff]  }
 0x1b5   : > { %3598 = vmatmul.mubr.bf16.gmra.mrb[80].mxu0 %v5079_v43  ;;  %5960 = vmatprep.subr.bf16.mxu1 %v6504_v44  ;;  %v5035_v43 = vcombine.low %v504_v22, %v516_v23  ;;  %v6520_v44 = vld [vmem:[#allocation6 + $0x4e0] sm:$0xff]   ;;  %v7419_v23 = vld [vmem:[%s7240_s21 + $0x3f8] sm:$0xff] }
 0x1b6   : > { %3695 = vmatmul.mubr.bf16.gmra.mrb[80].mxu1 %v5081_v45  ;;  %3605 = vmatprep.mubr.bf16.mxu0 %v5104_v46  ;;  %v5037_v45 = vcombine.low %v505_v24, %v517_v25  ;;  %v5060_v46 = vcombine.high %v7371_v35, %v7374_v36  ;;  %v589_v24 = vld [vmem:[%s7240_s21 + $0x458] sm:$0xff] }
 0x1b7   : > { %3702 = vmatprep.mubr.bf16.mxu1 %v5106_v47  ;;  %v6519_v47 = vld [vmem:[#allocation6 + $0x420] sm:$0xff]   ;;  %v6533_v25 = vld [vmem:[#allocation6 + $0x4b8] sm:$0xff]  }
 0x1bd   : > { %3606 = vmatmul.mubr.bf16.gmra.mrb[84].mxu0 %v5103_v52  ;;  %v7387_v52 = vld [vmem:[%s7240_s21 + $0x330] sm:$0xff] }
 0x1be   : > { %3703 = vmatmul.mubr.bf16.gmra.mrb[84].mxu1 %v5105_v53  ;;  %3613 = vmatprep.mubr.bf16.mxu0 %v5128_v54  ;;  %v7390_v53 = vld [vmem:[%s7240_s21 + $0x390] sm:$0xff]  ;;  %v7393_v54 = vld [vmem:[%s7240_s21 + $0x338] sm:$0xff] }
 0x1bf   : > { %3710 = vmatprep.mubr.bf16.mxu1 %v5130_v55  ;;  %v6523_v55 = vld [vmem:[#allocation6 + $0x428] sm:$0xff]   ;;  %v5086_v9 = vcombine.high %v7393_v54, %v7396_v57 }
 0x1c5   : > { %3614 = vmatmul.mubr.bf16.gmra.mrb[88].mxu0 %v5127_v60 }
 0x1c6   : > { %3711 = vmatmul.mubr.bf16.gmra.mrb[88].mxu1 %v5129_v61  ;;  %3621 = vmatprep.mubr.bf16.mxu0 %v5152_v62  ;;  %v7398_v61 = vld [vmem:[#allocation8] ss:$0 sm:$0xff] }
 0x1c7   : > { %3718 = vmatprep.mubr.bf16.mxu1 %v5154_v63  ;;  %v5059_v63 = vcombine.low %v7371_v35, %v7374_v36  ;;  %v5085_v36 = vcombine.low %v7393_v54, %v7396_v57 }
 0x1cd   : > { %3622 = vmatmul.mubr.bf16.gmra.mrb[92].mxu0 %v5151_v4  ;;  %v5061_v4 = vcombine.low %v7377_v38, %v7380_v39 }
 0x1ce   : > { %3719 = vmatmul.mubr.bf16.gmra.mrb[92].mxu1 %v5153_v5  ;;  %3759 = vmatprep.mubr.bf16.mxu0 %v4988_v6  ;;  %v5084_v5 = vcombine.high %v7387_v52, %v7390_v53 }
 0x1cf   : > { %3856 = vmatprep.mubr.bf16.mxu1 %v4990_v7 }
 0x1d5   : > { %3760 = vmatmul.mubr.bf16.vlgmr.msra.gmra.mrb[96].mxu0 %v4987_v10  ;;  %v6527_v10 = vld [vmem:[#allocation6 + $0x430] sm:$0xff]  }
 0x1d6   : > { %3857 = vmatmul.mubr.bf16.vlgmr.msra.gmra.mrb[96].mxu1 %v4989_v13  ;;  %5897 = vmatpush3.bf16.msra.mxu0 %v6503_v14 }
 0x1d7   : > { %5961 = vmatpush3.bf16.msra.mxu1 %v6505_v15  ;;  %3767 = vmatprep.mubr.bf16.mxu0 %v5012_v16  ;;  %v6532_v16 = vld [vmem:[#allocation6 + $0x4f8] sm:$0xff]  }
 0x1d8   : > { %3864 = vmatprep.mubr.bf16.mxu1 %v5014_v18  ;;  %5898 = vmatprep.subr.bf16.mxu0 %v6506_v17  ;;  %v7410_v18 = vld [vmem:[%s7240_s21 + $0x3f0] sm:$0xff] }
 0x1d9   : > { %5962 = vmatprep.subr.bf16.mxu1 %v6508_v20  ;;  %v6531_v20 = vld [vmem:[#allocation6 + $0x438] sm:$0xff]  }
 0x1da   : > { %5899 = vmatpush3.bf16.msra.mxu0 %v6507_v19  ;;  %v7413_v19 = vld [vmem:[%s7240_s21 + $0x450] sm:$0xff] }
 0x1db   : > { %5963 = vmatpush3.bf16.msra.mxu1 %v6509_v21  ;;  %5900 = vmatprep.subr.bf16.mxu0 %v6510_v26  ;;  %v6534_v26 = vld [vmem:[#allocation6 + $0x540] sm:$0xff]  }
 0x1dc   : > { %5964 = vmatprep.subr.bf16.mxu1 %v6512_v27 }
 0x1dd   : > { %3768 = vmatmul.mubr.bf16.gmra.mrb[100].mxu0 %v5011_v28 }
 0x1de   : > { %3865 = vmatmul.mubr.bf16.gmra.mrb[100].mxu1 %v5013_v29  ;;  %3775 = vmatprep.mubr.bf16.mxu0 %v5036_v30  ;;  %v6536_v29 = vld [vmem:[#allocation6 + $0x5c0] sm:$0xff]  }
 0x1df   : > { %3872 = vmatprep.mubr.bf16.mxu1 %v5038_v31  ;;  %5901 = vmatpush3.bf16.msra.mxu0 %v6511_v32  ;;  %v5083_v32 = vcombine.low %v7387_v52, %v7390_v53  ;;  %v613_v53 = vld [vmem:[%s7240_s21 + $0x518] sm:$0xff] }
 0x1e0   : > { %5965 = vmatpush3.bf16.msra.mxu1 %v6513_v33  ;;  %5902 = vmatprep.subr.bf16.mxu0 %v6514_v34 }
 0x1e1   : > { %5966 = vmatprep.subr.bf16.mxu1 %v6516_v37  ;;  %v5108_v37 = vcombine.high %v7410_v18, %v7413_v19 }
 0x1e3   : > { %5903 = vmatpush3.bf16.msra.mxu0 %v6515_v40 }
 0x1e4   : > { %5967 = vmatpush3.bf16.msra.mxu1 %v6517_v41  ;;  %5904 = vmatprep.subr.bf16.mxu0 %v6518_v42  ;;  %v5110_v41 = vcombine.high %v7419_v23, %v589_v24 }
 0x1e5   : > { %3776 = vmatmul.mubr.bf16.gmra.mrb[104].mxu0 %v5035_v43  ;;  %5968 = vmatprep.subr.bf16.mxu1 %v6520_v44 }
 0x1e6   : > { %3873 = vmatmul.mubr.bf16.gmra.mrb[104].mxu1 %v5037_v45  ;;  %3783 = vmatprep.mubr.bf16.mxu0 %v5060_v46  ;;  %v600_v46 = vld [vmem:[%s7240_s21 + $0x4b0] sm:$0xff] }
 0x1e7   : > { %3880 = vmatprep.mubr.bf16.mxu1 %v5062_v48  ;;  %5905 = vmatpush3.bf16.msra.mxu0 %v6519_v47  ;;  %v612_v47 = vld [vmem:[%s7240_s21 + $0x510] sm:$0xff] }
 0x1e8   : > { %v5400_v56 = vpop.f32.mrb[0].mxu0  ;;  %5969 = vmatpush3.bf16.msra.mxu1 %v6521_v49  ;;  %5906 = vmatprep.subr.bf16.mxu0 %v6522_v50  ;;  %v601_v50 = vld [vmem:[%s7240_s21 + $0x4b8] sm:$0xff] }
 0x1e9   : > { %v5464_v60 = vpop.f32.mrb[0].mxu1  ;;  %v5401_v62 = vpop.f32.mrb[1].mxu0  ;;  %5970 = vmatprep.subr.bf16.mxu1 %v6524_v51 }
 0x1ea   : > { %v5402_v1 = vadd.f32 %v5401_v62, %v5400_v56  ;;  %v5465_v2 = vpop.f32.mrb[1].mxu1  ;;  %v5403_v3 = vpop.f32.mrb[2].mxu0  ;;  %v5107_v56 = vcombine.low %v7410_v18, %v7413_v19  ;;  %v5132_v62 = vcombine.high %v600_v46, %v612_v47 }
 0x1eb   : > { %v5466_v6 = vadd.f32 %v5465_v2, %v5464_v60  ;;  %v5467_v7 = vpop.f32.mrb[2].mxu1  ;;  %v5404_v8 = vpop.f32.mrb[3].mxu0  ;;  %5907 = vmatpush3.bf16.msra.mxu0 %v6523_v55  ;;  %v5109_v60 = vcombine.low %v7419_v23, %v589_v24  ;;  %v5134_v2 = vcombine.high %v601_v50, %v613_v53 }
 0x1ec   : > { %v3180_v13 = vadd.f32 %v5402_v1, %v7398_v61  ;;  %v5405_v14 = vadd.f32 %v5404_v8, %v5403_v3  ;;  %v5468_v15 = vpop.f32.mrb[3].mxu1  ;;  %5971 = vmatpush3.bf16.msra.mxu1 %v6525_v58  ;;  %5908 = vmatprep.subr.bf16.mxu0 %v6526_v59 }
 0x1ed   : > { %v5469_v17 = vadd.f32 %v5468_v15, %v5467_v7  ;;  %3784 = vmatmul.mubr.bf16.gmra.mrb[108].mxu0 %v5059_v63  ;;  %5972 = vmatprep.subr.bf16.mxu1 %v6528_v0 }
 0x1ee   : > { %v7415_v21 = vadd.f32 %v5466_v6, %v3180_v13  ;;  %v3183_v22 = vadd.f32 %v5405_v14, %v7398_v61  ;;  %3881 = vmatmul.mubr.bf16.gmra.mrb[108].mxu1 %v5061_v4  ;;  %3791 = vmatprep.mubr.bf16.mxu0 %v5084_v5  ;;  %v625_v13 = vld [vmem:[%s7240_s21 + $0x578] sm:$0xff] }
 0x1ef   : > { %3888 = vmatprep.mubr.bf16.mxu1 %v5086_v9  ;;  %5909 = vmatpush3.bf16.msra.mxu0 %v6527_v10  ;;  %v624_v9 = vld [vmem:[%s7240_s21 + $0x570] sm:$0xff]  ;;  %v637_v14 = vld [vmem:[%s7240_s21 + $0x5d8] sm:$0xff] }
 0x1f0   : > { %v7422_v27 = vadd.f32 %v5469_v17, %v3183_v22  ;;  %v5406_v28 = vpop.f32.mrb[4].mxu0  ;;  %5973 = vmatpush3.bf16.msra.mxu1 %v6529_v11  ;;  %5910 = vmatprep.subr.bf16.mxu0 %v6530_v12  ;;  %v636_v10 = vld [vmem:[%s7240_s21 + $0x5d0] sm:$0xff]  ;;  %v5131_v17 = vcombine.low %v600_v46, %v612_v47  ;;  %v5133_v22 = vcombine.low %v601_v50, %v613_v53 }
 0x1f1   : > { %v5470_v30 = vpop.f32.mrb[4].mxu1  ;;  %v5407_v31 = vpop.f32.mrb[5].mxu0  ;;  %5974 = vmatprep.subr.bf16.mxu1 %v6532_v16  ;;  %v5156_v23 = vcombine.high %v624_v9, %v636_v10  ;;  %v5157_v47 = vcombine.low %v625_v13, %v637_v14 }
 0x1f2   : > { %v5408_v33 = vadd.f32 %v5407_v31, %v5406_v28  ;;  %v5471_v34 = vpop.f32.mrb[5].mxu1  ;;  %v5409_v35 = vpop.f32.mrb[6].mxu0  ;;  %v5158_v28 = vcombine.high %v625_v13, %v637_v14  ;;  %v6535_v13 = vld [vmem:[#allocation6 + $0x500] sm:$0xff]  }
 0x1f3   : > { %v5472_v38 = vadd.f32 %v5471_v34, %v5470_v30  ;;  %v5473_v39 = vpop.f32.mrb[6].mxu1  ;;  %v5410_v40 = vpop.f32.mrb[7].mxu0  ;;  %5911 = vmatpush3.bf16.msra.mxu0 %v6531_v20 }
 0x1f4   : > { %v3188_v42 = vadd.f32 %v5408_v33, %v7398_v61  ;;  %v5411_v43 = vadd.f32 %v5410_v40, %v5409_v35  ;;  %v5474_v44 = vpop.f32.mrb[7].mxu1  ;;  %5975 = vmatpush3.bf16.msra.mxu1 %v6533_v25  ;;  %6024 = vmatprep.subr.bf16.mxu0 %v6534_v26  ;;  %v458_v35 = vld [vmem:[%s7240_s21 + $0x40] sm:$0xff]  ;;  %v471_v40 = vld [vmem:[%s7240_s21 + $0xa8] sm:$0xff] }
 0x1f5   : > { %v5475_v45 = vadd.f32 %v5474_v44, %v5473_v39  ;;  %3792 = vmatmul.mubr.bf16.gmra.mrb[112].mxu0 %v5083_v32  ;;  %6088 = vmatprep.subr.bf16.mxu1 %v6536_v29  ;;  %v459_v39 = vld [vmem:[%s7240_s21 + $0x48] sm:$0xff] }
 0x1f6   : > { %v7434_v48 = vadd.f32 %v5472_v38, %v3188_v42  ;;  %v3191_v49 = vadd.f32 %v5411_v43, %v7398_v61  ;;  %3889 = vmatmul.mubr.bf16.gmra.mrb[112].mxu1 %v5085_v36  ;;  %3799 = vmatprep.mubr.bf16.mxu0 %v5108_v37  ;;  %v470_v36 = vld [vmem:[%s7240_s21 + $0xa0] sm:$0xff]  ;;  %v5155_v43 = vcombine.low %v624_v9, %v636_v10 }
 0x1f7   : > { %3896 = vmatprep.mubr.bf16.mxu1 %v5110_v41 }
 0x1f8   : > { %v7438_v51 = vadd.f32 %v5475_v45, %v3191_v49  ;;  %v5412_v52 = vpop.f32.mrb[8].mxu0  ;;  %v4992_v49 = vcombine.high %v458_v35, %v470_v36 }
 0x1f9   : > { %v5476_v54 = vpop.f32.mrb[8].mxu1  ;;  %v5413_v55 = vpop.f32.mrb[9].mxu0 }
 0x1fa   : > { %v5414_v57 = vadd.f32 %v5413_v55, %v5412_v52  ;;  %v5477_v58 = vpop.f32.mrb[9].mxu1  ;;  %v5415_v59 = vpop.f32.mrb[10].mxu0 }
 0x1fb   : > { %v5478_v63 = vadd.f32 %v5477_v58, %v5476_v54  ;;  %v5479_v0 = vpop.f32.mrb[10].mxu1  ;;  %v5416_v1 = vpop.f32.mrb[11].mxu0  ;;  %v4994_v54 = vcombine.high %v459_v39, %v471_v40 }
 0x1fc   : > { %v3196_v3 = vadd.f32 %v5414_v57, %v7398_v61  ;;  %v5417_v4 = vadd.f32 %v5416_v1, %v5415_v59  ;;  %v5480_v5 = vpop.f32.mrb[11].mxu1  ;;  %v7474_v1 = vld [vmem:[%s7240_s21 + $0x160] sm:$0xff] }
 0x1fd   : > { %v5481_v6 = vadd.f32 %v5480_v5, %v5479_v0  ;;  %3800 = vmatmul.mubr.bf16.gmra.mrb[116].mxu0 %v5107_v56  ;;  %v7471_v0 = vld [vmem:[%s7240_s21 + $0x100] sm:$0xff]  ;;  %v7477_v5 = vld [vmem:[%s7240_s21 + $0x108] sm:$0xff] }
 0x1fe   : > { %v7445_v7 = vadd.f32 %v5478_v63, %v3196_v3  ;;  %v3199_v8 = vadd.f32 %v5417_v4, %v7398_v61  ;;  %3897 = vmatmul.mubr.bf16.gmra.mrb[116].mxu1 %v5109_v60  ;;  %3807 = vmatprep.mubr.bf16.mxu0 %v5132_v62  ;;  %v4991_v4 = vcombine.low %v458_v35, %v470_v36  ;;  %v6542_v35 = vld [vmem:[#allocation6 + $0x550] sm:$0xff]  }
 0x1ff   : > { %3904 = vmatprep.mubr.bf16.mxu1 %v5134_v2 }
 0x200   : > { %v7450_v11 = vadd.f32 %v5481_v6, %v3199_v8  ;;  %v5418_v12 = vpop.f32.mrb[12].mxu0  ;;  %v7480_v6 = vld [vmem:[%s7240_s21 + $0x168] sm:$0xff] }
 0x201   : > { %v5482_v15 = vpop.f32.mrb[12].mxu1  ;;  %v5419_v16 = vpop.f32.mrb[13].mxu0 }
 0x202   : > { %v5420_v18 = vadd.f32 %v5419_v16, %v5418_v12  ;;  %v5483_v19 = vpop.f32.mrb[13].mxu1  ;;  %v5421_v20 = vpop.f32.mrb[14].mxu0  ;;  %v4993_v12 = vcombine.low %v459_v39, %v471_v40  ;;  %v7499_v39 = vld [vmem:[%s7240_s21 + $0x1c8] sm:$0xff] }
 0x203   : > { %v5484_v24 = vadd.f32 %v5483_v19, %v5482_v15  ;;  %v5485_v25 = vpop.f32.mrb[14].mxu1  ;;  %v5422_v26 = vpop.f32.mrb[15].mxu0  ;;  %v7502_v40 = vld [vmem:[%s7240_s21 + $0x228] sm:$0xff] }
 0x204   : > { %v3204_v29 = vadd.f32 %v5420_v18, %v7398_v61  ;;  %v5423_v30 = vadd.f32 %v5422_v26, %v5421_v20  ;;  %v5486_v31 = vpop.f32.mrb[15].mxu1  ;;  %v5016_v18 = vcombine.high %v7471_v0, %v7474_v1  ;;  %v6540_v26 = vld [vmem:[#allocation6 + $0x5c8] sm:$0xff]  }
 0x205   : > { %v5487_v32 = vadd.f32 %v5486_v31, %v5485_v25  ;;  %3808 = vmatmul.mubr.bf16.gmra.mrb[120].mxu0 %v5131_v17  ;;  %v6537_v17 = vld [vmem:[#allocation6 + $0x580] sm:$0xff]   ;;  %v6541_v31 = vld [vmem:[#allocation6 + $0x588] sm:$0xff]  }
 0x206   : > { %v7455_v33 = vadd.f32 %v5484_v24, %v3204_v29  ;;  %v3207_v34 = vadd.f32 %v5423_v30, %v7398_v61  ;;  %3905 = vmatmul.mubr.bf16.gmra.mrb[120].mxu1 %v5133_v22  ;;  %3815 = vmatprep.mubr.bf16.mxu0 %v5156_v23  ;;  %v5018_v23 = vcombine.high %v7477_v5, %v7480_v6  ;;  %v6538_v24 = vld [vmem:[#allocation6 + $0x548] sm:$0xff]  }
 0x207   : > { %3912 = vmatprep.mubr.bf16.mxu1 %v5158_v28  ;;  %v6539_v30 = vld [vmem:[#allocation6 + $0x508] sm:$0xff]  }
 0x208   : > { %v7460_v37 = vadd.f32 %v5487_v32, %v3207_v34  ;;  %v5424_v38 = vpop.f32.mrb[16].mxu0  ;;  %v7491_v32 = vld [vmem:[%s7240_s21 + $0x1c0] sm:$0xff] }
 0x209   : > { %v5488_v41 = vpop.f32.mrb[16].mxu1  ;;  %v5425_v42 = vpop.f32.mrb[17].mxu0  ;;  %v7494_v34 = vld [vmem:[%s7240_s21 + $0x220] sm:$0xff] }
 0x20a   : > { %v5426_v44 = vadd.f32 %v5425_v42, %v5424_v38  ;;  %v5489_v45 = vpop.f32.mrb[17].mxu1  ;;  %v5427_v46 = vpop.f32.mrb[18].mxu0 }
 0x20b   : > { %v5490_v50 = vadd.f32 %v5489_v45, %v5488_v41  ;;  %v5491_v52 = vpop.f32.mrb[18].mxu1  ;;  %v5428_v53 = vpop.f32.mrb[19].mxu0  ;;  %v6544_v41 = vld [vmem:[#allocation6 + $0x5d0] sm:$0xff]  }
 0x20c   : > { %v3212_v55 = vadd.f32 %v5426_v44, %v7398_v61  ;;  %v5429_v56 = vadd.f32 %v5428_v53, %v5427_v46  ;;  %v5492_v57 = vpop.f32.mrb[19].mxu1  ;;  %v5015_v44 = vcombine.low %v7471_v0, %v7474_v1  ;;  %v6546_v0 = vld [vmem:[#allocation6 + $0x558] sm:$0xff]  }
 0x20d   : > { %v5493_v58 = vadd.f32 %v5492_v57, %v5491_v52  ;;  %3816 = vmatmul.mubr.bf16.gmra.mrb[124].mxu0 %v5155_v43 }
 0x20e   : > { %v7465_v59 = vadd.f32 %v5490_v50, %v3212_v55  ;;  %v3215_v60 = vadd.f32 %v5429_v56, %v7398_v61  ;;  %3913 = vmatmul.mubr.bf16.gmra.mrb[124].mxu1 %v5157_v47  ;;  %3953 = vmatprep.mubr.bf16.mxu0 %v4992_v49  ;;  %v5017_v49 = vcombine.low %v7477_v5, %v7480_v6  ;;  %v6543_v56 = vld [vmem:[#allocation6 + $0x510] sm:$0xff]   ;;  %v7517_v5 = vld [vmem:[%s7240_s21 + $0x280] sm:$0xff] }
 0x20f   : > { %4050 = vmatprep.mubr.bf16.mxu1 %v4994_v54  ;;  %v5040_v50 = vcombine.high %v7491_v32, %v7494_v34  ;;  %v5042_v55 = vcombine.high %v7499_v39, %v7502_v40  ;;  %v7520_v6 = vld [vmem:[%s7240_s21 + $0x2e0] sm:$0xff] }
 0x210   : > { %v7468_v62 = vadd.f32 %v5493_v58, %v3215_v60  ;;  %v5430_v63 = vpop.f32.mrb[20].mxu0 }
 0x211   : > { %v5494_v2 = vpop.f32.mrb[20].mxu1  ;;  %v5431_v3 = vpop.f32.mrb[21].mxu0 }
 0x212   : > { %v5432_v8 = vadd.f32 %v5431_v3, %v5430_v63  ;;  %v5495_v9 = vpop.f32.mrb[21].mxu1  ;;  %v5433_v10 = vpop.f32.mrb[22].mxu0  ;;  %v6545_v63 = vld [vmem:[#allocation6 + $0x590] sm:$0xff]  }
 0x213   : > { %v5496_v14 = vadd.f32 %v5495_v9, %v5494_v2  ;;  %v5497_v15 = vpop.f32.mrb[22].mxu1  ;;  %v5434_v16 = vpop.f32.mrb[23].mxu0  ;;  %v6548_v2 = vld [vmem:[#allocation6 + $0x5d8] sm:$0xff]  }
 0x214   : > { %v3220_v19 = vadd.f32 %v5432_v8, %v7398_v61  ;;  %v5435_v20 = vadd.f32 %v5434_v16, %v5433_v10  ;;  %v5498_v22 = vpop.f32.mrb[23].mxu1  ;;  %v7523_v8 = vld [vmem:[%s7240_s21 + $0x288] sm:$0xff]  ;;  %v6547_v9 = vld [vmem:[#allocation6 + $0x518] sm:$0xff]  }
 0x215   : > { %v5499_v25 = vadd.f32 %v5498_v22, %v5497_v15  ;;  %3954 = vmatmul.mubr.bf16.vlgmr.msra.gmra.mrb[128].mxu0 %v4991_v4  ;;  %v6550_v15 = vld [vmem:[#allocation6 + $0x560] sm:$0xff]  }
 0x216   : > { %v7487_v28 = vadd.f32 %v5496_v14, %v3220_v19  ;;  %v3223_v29 = vadd.f32 %v5435_v20, %v7398_v61  ;;  %4051 = vmatmul.mubr.bf16.vlgmr.msra.gmra.mrb[128].mxu1 %v4993_v12  ;;  %6025 = vmatpush3.bf16.msra.mxu0 %v6535_v13  ;;  %v7528_v13 = vld [vmem:[%s7240_s21 + $0x2e8] sm:$0xff]  ;;  %v6549_v14 = vld [vmem:[#allocation6 + $0x598] sm:$0xff]   ;;  %v6552_v19 = vld [vmem:[#allocation6 + $0x5e0] sm:$0xff]  }
 0x217   : > { %6089 = vmatpush3.bf16.msra.mxu1 %v6537_v17  ;;  %3961 = vmatprep.mubr.bf16.mxu0 %v5016_v18  ;;  %v5039_v18 = vcombine.low %v7491_v32, %v7494_v34 }
 0x218   : > { %v7496_v36 = vadd.f32 %v5499_v25, %v3223_v29  ;;  %v5436_v38 = vpop.f32.mrb[24].mxu0  ;;  %4058 = vmatprep.mubr.bf16.mxu1 %v5018_v23  ;;  %6026 = vmatprep.subr.bf16.mxu0 %v6538_v24  ;;  %v5041_v24 = vcombine.low %v7499_v39, %v7502_v40  ;;  %v5064_v25 = vcombine.high %v7517_v5, %v7520_v6  ;;  %v6553_v39 = vld [vmem:[#allocation6 + $0x5a0] sm:$0xff]   ;;  %v6554_v40 = vld [vmem:[#allocation6 + $0x568] sm:$0xff]  }
 0x219   : > { %v5500_v42 = vpop.f32.mrb[24].mxu1  ;;  %v5437_v43 = vpop.f32.mrb[25].mxu0  ;;  %6090 = vmatprep.subr.bf16.mxu1 %v6540_v26 }
 0x21a   : > { %v5438_v45 = vadd.f32 %v5437_v43, %v5436_v38  ;;  %v5501_v46 = vpop.f32.mrb[25].mxu1  ;;  %v5439_v47 = vpop.f32.mrb[26].mxu0  ;;  %6027 = vmatpush3.bf16.msra.mxu0 %v6539_v30 }
 0x21b   : > { %v5502_v52 = vadd.f32 %v5501_v46, %v5500_v42  ;;  %v5503_v53 = vpop.f32.mrb[26].mxu1  ;;  %v5440_v54 = vpop.f32.mrb[27].mxu0  ;;  %6091 = vmatpush3.bf16.msra.mxu1 %v6541_v31  ;;  %6028 = vmatprep.subr.bf16.mxu0 %v6542_v35  ;;  %v5066_v31 = vcombine.high %v7523_v8, %v7528_v13  ;;  %v6551_v35 = vld [vmem:[#allocation6 + $0x520] sm:$0xff]   ;;  %v6556_v42 = vld [vmem:[#allocation6 + $0x5e8] sm:$0xff]  }
 0x21c   : > { %v3228_v57 = vadd.f32 %v5438_v45, %v7398_v61  ;;  %v5441_v58 = vadd.f32 %v5440_v54, %v5439_v47  ;;  %v5504_v60 = vpop.f32.mrb[27].mxu1  ;;  %6092 = vmatprep.subr.bf16.mxu1 %v6544_v41  ;;  %v7543_v45 = vld [vmem:[%s7240_s21 + $0x340] sm:$0xff]  ;;  %v7549_v47 = vld [vmem:[%s7240_s21 + $0x348] sm:$0xff] }
 0x21d   : > { %v5505_v1 = vadd.f32 %v5504_v60, %v5503_v53  ;;  %3962 = vmatmul.mubr.bf16.gmra.mrb[132].mxu0 %v5015_v44  ;;  %v7546_v46 = vld [vmem:[%s7240_s21 + $0x3a0] sm:$0xff]  ;;  %v7554_v53 = vld [vmem:[%s7240_s21 + $0x3a8] sm:$0xff] }
 0x21e   : > { %v7513_v3 = vadd.f32 %v5502_v52, %v3228_v57  ;;  %v3231_v4 = vadd.f32 %v5441_v58, %v7398_v61  ;;  %4059 = vmatmul.mubr.bf16.gmra.mrb[132].mxu1 %v5017_v49  ;;  %3969 = vmatprep.mubr.bf16.mxu0 %v5040_v50  ;;  %v6555_v49 = vld [vmem:[#allocation6 + $0x528] sm:$0xff]   ;;  %v5063_v57 = vcombine.low %v7517_v5, %v7520_v6  ;;  %v6560_v58 = vld [vmem:[#allocation6 + $0x5f0] sm:$0xff]  }
 0x21f   : > { %4066 = vmatprep.mubr.bf16.mxu1 %v5042_v55  ;;  %6029 = vmatpush3.bf16.msra.mxu0 %v6543_v56  ;;  %v6557_v54 = vld [vmem:[#allocation6 + $0x5a8] sm:$0xff]  }
 0x220   : > { %v7525_v10 = vadd.f32 %v5505_v1, %v3231_v4  ;;  %v5442_v12 = vpop.f32.mrb[28].mxu0  ;;  %6093 = vmatpush3.bf16.msra.mxu1 %v6545_v63  ;;  %6030 = vmatprep.subr.bf16.mxu0 %v6546_v0  ;;  %v5065_v1 = vcombine.low %v7523_v8, %v7528_v13  ;;  %v6561_v8 = vld [vmem:[#allocation6 + $0x5b0] sm:$0xff]   ;;  %v6562_v13 = vld [vmem:[#allocation6 + $0x578] sm:$0xff]  }
 0x221   : > { %v5506_v16 = vpop.f32.mrb[28].mxu1  ;;  %v5443_v17 = vpop.f32.mrb[29].mxu0  ;;  %6094 = vmatprep.subr.bf16.mxu1 %v6548_v2  ;;  %v5088_v2 = vcombine.high %v7543_v45, %v7546_v46 }
 0x222   : > { %v5444_v20 = vadd.f32 %v5443_v17, %v5442_v12  ;;  %v5507_v22 = vpop.f32.mrb[29].mxu1  ;;  %v5445_v23 = vpop.f32.mrb[30].mxu0 }
 0x223   : > { %v5508_v26 = vadd.f32 %v5507_v22, %v5506_v16  ;;  %v5509_v29 = vpop.f32.mrb[30].mxu1  ;;  %v5446_v30 = vpop.f32.mrb[31].mxu0  ;;  %6031 = vmatpush3.bf16.msra.mxu0 %v6547_v9  ;;  %v590_v22 = vld [vmem:[%s7240_s21 + $0x460] sm:$0xff] }
 0x224   : > { %v3236_v32 = vadd.f32 %v5444_v20, %v7398_v61  ;;  %v5447_v34 = vadd.f32 %v5446_v30, %v5445_v23  ;;  %v5510_v38 = vpop.f32.mrb[31].mxu1  ;;  %6095 = vmatpush3.bf16.msra.mxu1 %v6549_v14  ;;  %6032 = vmatprep.subr.bf16.mxu0 %v6550_v15  ;;  %v5090_v14 = vcombine.high %v7549_v47, %v7554_v53  ;;  %v6559_v15 = vld [vmem:[#allocation6 + $0x530] sm:$0xff]   ;;  %v6563_v23 = vld [vmem:[#allocation6 + $0x538] sm:$0xff]  }
 0x225   : > { %v5511_v41 = vadd.f32 %v5510_v38, %v5509_v29  ;;  %3970 = vmatmul.mubr.bf16.gmra.mrb[136].mxu0 %v5039_v18  ;;  %6096 = vmatprep.subr.bf16.mxu1 %v6552_v19  ;;  %v6564_v18 = vld [vmem:[#allocation6 + $0x5f8] sm:$0xff]   ;;  %v591_v29 = vld [vmem:[%s7240_s21 + $0x468] sm:$0xff] }
 0x226   : > { %v7539_v43 = vadd.f32 %v5508_v26, %v3236_v32  ;;  %v3239_v44 = vadd.f32 %v5447_v34, %v7398_v61  ;;  %4067 = vmatmul.mubr.bf16.gmra.mrb[136].mxu1 %v5041_v24  ;;  %3977 = vmatprep.mubr.bf16.mxu0 %v5064_v25  ;;  %v6558_v61 = vld [vmem:[#allocation6 + $0x570] sm:$0xff]   ;;  %v579_v26 = vld [vmem:[%s7240_s21 + $0x408] sm:$0xff]  ;;  %v6565_v30 = vld [vmem:[#allocation6 + $0x5b8] sm:$0xff]  }
 0x227   : > { %4074 = vmatprep.mubr.bf16.mxu1 %v5066_v31  ;;  %6033 = vmatpush3.bf16.msra.mxu0 %v6551_v35 }
 0x228   : > { %v7551_v50 = vadd.f32 %v5511_v41, %v3239_v44  ;;  %v5528_v52 = vpop.f32.mrb[32].mxu0  ;;  %6097 = vmatpush3.bf16.msra.mxu1 %v6553_v39  ;;  %6034 = vmatprep.subr.bf16.mxu0 %v6554_v40  ;;  %v5089_v39 = vcombine.low %v7549_v47, %v7554_v53  ;;  %v602_v53 = vld [vmem:[%s7240_s21 + $0x4c0] sm:$0xff] }
 0x229   : > { %v5592_v55 = vpop.f32.mrb[32].mxu1  ;;  %v5529_v56 = vpop.f32.mrb[33].mxu0  ;;  %6098 = vmatprep.subr.bf16.mxu1 %v6556_v42 }
 0x22a   : > { %v5530_v60 = vadd.f32 %v5529_v56, %v5528_v52  ;;  %v5593_v63 = vpop.f32.mrb[33].mxu1  ;;  %v5531_v0 = vpop.f32.mrb[34].mxu0 }
 0x22b   : > { %v5594_v4 = vadd.f32 %v5593_v63, %v5592_v55  ;;  %v5595_v9 = vpop.f32.mrb[34].mxu1  ;;  %v5532_v12 = vpop.f32.mrb[35].mxu0  ;;  %6035 = vmatpush3.bf16.msra.mxu0 %v6555_v49  ;;  %v5114_v49 = vcombine.high %v579_v26, %v591_v29  ;;  %v614_v55 = vld [vmem:[%s7240_s21 + $0x520] sm:$0xff] }
 0x22c   : > { %v3374_v5 = vadd.f32 %v5530_v60, %v7415_v21  ;;  %v5533_v6 = vadd.f32 %v5532_v12, %v5531_v0  ;;  %v5596_v16 = vpop.f32.mrb[35].mxu1  ;;  %6099 = vmatpush3.bf16.msra.mxu1 %v6557_v54  ;;  %6036 = vmatprep.subr.bf16.mxu0 %v6558_v61  ;;  %v578_v21 = vld [vmem:[%s7240_s21 + $0x400] sm:$0xff]  ;;  %v5136_v12 = vcombine.high %v602_v53, %v614_v55 }
 0x22d   : > { %v5597_v17 = vadd.f32 %v5596_v16, %v5595_v9  ;;  %3978 = vmatmul.mubr.bf16.gmra.mrb[140].mxu0 %v5063_v57  ;;  %6100 = vmatprep.subr.bf16.mxu1 %v6560_v58  ;;  %v5112_v40 = vcombine.high %v578_v21, %v590_v22  ;;  %v603_v58 = vld [vmem:[%s7240_s21 + $0x4c8] sm:$0xff]  ;;  %v5111_v0 = vcombine.low %v578_v21, %v590_v22  ;;  %v638_v21 = vld [vmem:[%s7240_s21 + $0x5e0] sm:$0xff] }
 0x22e   : > { %v7565_v19 = vadd.f32 %v5594_v4, %v3374_v5  ;;  %v3377_v20 = vadd.f32 %v5533_v6, %v7422_v27  ;;  %4075 = vmatmul.mubr.bf16.gmra.mrb[140].mxu1 %v5065_v1  ;;  %3985 = vmatprep.mubr.bf16.mxu0 %v5088_v2  ;;  %v5087_v27 = vcombine.low %v7543_v45, %v7546_v46 }
 0x22f   : > { %4082 = vmatprep.mubr.bf16.mxu1 %v5090_v14  ;;  %6037 = vmatpush3.bf16.msra.mxu0 %v6559_v15  ;;  %v5113_v9 = vcombine.low %v579_v26, %v591_v29  ;;  %v639_v26 = vld [vmem:[%s7240_s21 + $0x5e8] sm:$0xff] }
 0x230   : > { %v7570_v24 = vadd.f32 %v5597_v17, %v3377_v20  ;;  %v5534_v25 = vpop.f32.mrb[36].mxu0  ;;  %6101 = vmatpush3.bf16.msra.mxu1 %v6561_v8  ;;  %6038 = vmatprep.subr.bf16.mxu0 %v6562_v13  ;;  %v626_v20 = vld [vmem:[%s7240_s21 + $0x580] sm:$0xff] }
 0x231   : > { %v5598_v31 = vpop.f32.mrb[36].mxu1  ;;  %v5535_v35 = vpop.f32.mrb[37].mxu0  ;;  %6102 = vmatprep.subr.bf16.mxu1 %v6564_v18 }
 0x232   : > { %v5536_v32 = vadd.f32 %v5535_v35, %v5534_v25  ;;  %v5599_v34 = vpop.f32.mrb[37].mxu1  ;;  %v5537_v38 = vpop.f32.mrb[38].mxu0  ;;  %v627_v25 = vld [vmem:[%s7240_s21 + $0x588] sm:$0xff] }
 0x233   : > { %v5600_v41 = vadd.f32 %v5599_v34, %v5598_v31  ;;  %v5601_v42 = vpop.f32.mrb[38].mxu1  ;;  %v5538_v44 = vpop.f32.mrb[39].mxu0  ;;  %6039 = vmatpush3.bf16.msra.mxu0 %v6563_v23  ;;  %v5160_v34 = vcombine.high %v626_v20, %v638_v21 }
 0x234   : > { %v3382_v52 = vadd.f32 %v5536_v32, %v7434_v48  ;;  %v5539_v45 = vadd.f32 %v5538_v44, %v5537_v38  ;;  %v5602_v46 = vpop.f32.mrb[39].mxu1  ;;  %6103 = vmatpush3.bf16.msra.mxu1 %v6565_v30  ;;  %v615_v48 = vld [vmem:[%s7240_s21 + $0x528] sm:$0xff]  ;;  %v5135_v30 = vcombine.low %v602_v53, %v614_v55  ;;  %v461_v55 = vld [vmem:[%s7240_s21 + $0x58] sm:$0xff] }
 0x235   : > { %v5603_v54 = vadd.f32 %v5602_v46, %v5601_v42  ;;  %3986 = vmatmul.mubr.bf16.gmra.mrb[144].mxu0 %v5087_v27  ;;  %v5138_v5 = vcombine.high %v603_v58, %v615_v48  ;;  %v5137_v32 = vcombine.low %v603_v58, %v615_v48  ;;  %v460_v46 = vld [vmem:[%s7240_s21 + $0x50] sm:$0xff]  ;;  %v5159_v48 = vcombine.low %v626_v20, %v638_v21  ;;  %v485_v21 = vld [vmem:[%s7240_s21 + $0x118] sm:$0xff] }
 0x236   : > { %v7579_v61 = vadd.f32 %v5600_v41, %v3382_v52  ;;  %v3385_v47 = vadd.f32 %v5539_v45, %v7438_v51  ;;  %4083 = vmatmul.mubr.bf16.gmra.mrb[144].mxu1 %v5089_v39  ;;  %3993 = vmatprep.mubr.bf16.mxu0 %v5112_v40  ;;  %v5162_v40 = vcombine.high %v627_v25, %v639_v26 }
 0x237   : > { %4090 = vmatprep.mubr.bf16.mxu1 %v5114_v49 }
 0x238   : > { %v7584_v56 = vadd.f32 %v5603_v54, %v3385_v47  ;;  %v5540_v57 = vpop.f32.mrb[40].mxu0  ;;  %v472_v54 = vld [vmem:[%s7240_s21 + $0xb0] sm:$0xff] }
 0x239   : > { %v5604_v60 = vpop.f32.mrb[40].mxu1  ;;  %v5541_v63 = vpop.f32.mrb[41].mxu0 }
 0x23a   : > { %v5542_v1 = vadd.f32 %v5541_v63, %v5540_v57  ;;  %v5605_v2 = vpop.f32.mrb[41].mxu1  ;;  %v5543_v4 = vpop.f32.mrb[42].mxu0  ;;  %v473_v57 = vld [vmem:[%s7240_s21 + $0xb8] sm:$0xff] }
 0x23b   : > { %v5606_v51 = vadd.f32 %v5605_v2, %v5604_v60  ;;  %v5607_v14 = vpop.f32.mrb[42].mxu1  ;;  %v5544_v15 = vpop.f32.mrb[43].mxu0  ;;  %v4996_v2 = vcombine.high %v460_v46, %v472_v54 }
 0x23c   : > { %v3390_v6 = vadd.f32 %v5542_v1, %v7445_v7  ;;  %v5545_v16 = vadd.f32 %v5544_v15, %v5543_v4  ;;  %v5608_v8 = vpop.f32.mrb[43].mxu1  ;;  %v5161_v1 = vcombine.low %v627_v25, %v639_v26  ;;  %v4995_v26 = vcombine.low %v460_v46, %v472_v54  ;;  %v509_v54 = vld [vmem:[%s7240_s21 + $0x1d8] sm:$0xff] }
 0x23d   : > { %v5609_v13 = vadd.f32 %v5608_v8, %v5607_v14  ;;  %3994 = vmatmul.mubr.bf16.gmra.mrb[148].mxu0 %v5111_v0  ;;  %v484_v8 = vld [vmem:[%s7240_s21 + $0x110] sm:$0xff] }
 0x23e   : > { %v7589_v17 = vadd.f32 %v5606_v51, %v3390_v6  ;;  %v3393_v18 = vadd.f32 %v5545_v16, %v7450_v11  ;;  %4091 = vmatmul.mubr.bf16.gmra.mrb[148].mxu1 %v5113_v9  ;;  %4001 = vmatprep.mubr.bf16.mxu0 %v5136_v12  ;;  %v4998_v12 = vcombine.high %v461_v55, %v473_v57 }
 0x23f   : > { %4098 = vmatprep.mubr.bf16.mxu1 %v5138_v5 }
 0x240   : > { %v7594_v22 = vadd.f32 %v5609_v13, %v3393_v18  ;;  %v5546_v23 = vpop.f32.mrb[44].mxu0  ;;  %v496_v13 = vld [vmem:[%s7240_s21 + $0x170] sm:$0xff] }
 0x241   : > { %v5610_v29 = vpop.f32.mrb[44].mxu1  ;;  %v5547_v7 = vpop.f32.mrb[45].mxu0 }
 0x242   : > { %v5548_v31 = vadd.f32 %v5547_v7, %v5546_v23  ;;  %v5611_v35 = vpop.f32.mrb[45].mxu1  ;;  %v5549_v27 = vpop.f32.mrb[46].mxu0  ;;  %v497_v23 = vld [vmem:[%s7240_s21 + $0x178] sm:$0xff] }
 0x243   : > { %v5612_v11 = vadd.f32 %v5611_v35, %v5610_v29  ;;  %v5613_v38 = vpop.f32.mrb[46].mxu1  ;;  %v5550_v39 = vpop.f32.mrb[47].mxu0  ;;  %v5020_v35 = vcombine.high %v484_v8, %v496_v13 }
 0x244   : > { %v3398_v41 = vadd.f32 %v5548_v31, %v7455_v33  ;;  %v5551_v42 = vadd.f32 %v5550_v39, %v5549_v27  ;;  %v5614_v44 = vpop.f32.mrb[47].mxu1  ;;  %v4997_v31 = vcombine.low %v461_v55, %v473_v57  ;;  %v5019_v57 = vcombine.low %v484_v8, %v496_v13  ;;  %v533_v13 = vld [vmem:[%s7240_s21 + $0x298] sm:$0xff] }
 0x245   : > { %v5615_v49 = vadd.f32 %v5614_v44, %v5613_v38  ;;  %4002 = vmatmul.mubr.bf16.gmra.mrb[152].mxu0 %v5135_v30  ;;  %v508_v44 = vld [vmem:[%s7240_s21 + $0x1d0] sm:$0xff] }
 0x246   : > { %v7599_v52 = vadd.f32 %v5612_v11, %v3398_v41  ;;  %v3401_v45 = vadd.f32 %v5551_v42, %v7460_v37  ;;  %4099 = vmatmul.mubr.bf16.gmra.mrb[152].mxu1 %v5137_v32  ;;  %4009 = vmatprep.mubr.bf16.mxu0 %v5160_v34  ;;  %v5022_v34 = vcombine.high %v485_v21, %v497_v23 }
 0x247   : > { %4106 = vmatprep.mubr.bf16.mxu1 %v5162_v40 }
 0x248   : > { %v7604_v47 = vadd.f32 %v5615_v49, %v3401_v45  ;;  %v5552_v53 = vpop.f32.mrb[48].mxu0  ;;  %v520_v49 = vld [vmem:[%s7240_s21 + $0x230] sm:$0xff] }
 0x249   : > { %v5616_v58 = vpop.f32.mrb[48].mxu1  ;;  %v5553_v33 = vpop.f32.mrb[49].mxu0 }
 0x24a   : > { %v5554_v60 = vadd.f32 %v5553_v33, %v5552_v53  ;;  %v5617_v63 = vpop.f32.mrb[49].mxu1  ;;  %v5555_v0 = vpop.f32.mrb[50].mxu0  ;;  %v521_v53 = vld [vmem:[%s7240_s21 + $0x238] sm:$0xff] }
 0x24b   : > { %v5618_v37 = vadd.f32 %v5617_v63, %v5616_v58  ;;  %v5619_v4 = vpop.f32.mrb[50].mxu1  ;;  %v5556_v9 = vpop.f32.mrb[51].mxu0  ;;  %v5044_v63 = vcombine.high %v508_v44, %v520_v49 }
 0x24c   : > { %v3406_v51 = vadd.f32 %v5554_v60, %v7465_v59  ;;  %v5557_v14 = vadd.f32 %v5556_v9, %v5555_v0  ;;  %v5620_v15 = vpop.f32.mrb[51].mxu1  ;;  %v5021_v60 = vcombine.low %v485_v21, %v497_v23  ;;  %v5043_v23 = vcombine.low %v508_v44, %v520_v49  ;;  %v557_v49 = vld [vmem:[%s7240_s21 + $0x358] sm:$0xff] }
 0x24d   : > { %v5621_v5 = vadd.f32 %v5620_v15, %v5619_v4  ;;  %4010 = vmatmul.mubr.bf16.gmra.mrb[156].mxu0 %v5159_v48  ;;  %v532_v15 = vld [vmem:[%s7240_s21 + $0x290] sm:$0xff] }
 0x24e   : > { %v7609_v6 = vadd.f32 %v5618_v37, %v3406_v51  ;;  %v3409_v16 = vadd.f32 %v5557_v14, %v7468_v62  ;;  %4107 = vmatmul.mubr.bf16.gmra.mrb[156].mxu1 %v5161_v1  ;;  %4147 = vmatprep.mubr.bf16.mxu0 %v4996_v2  ;;  %v5046_v2 = vcombine.high %v509_v54, %v521_v53 }
 0x24f   : > { %4244 = vmatprep.mubr.bf16.mxu1 %v4998_v12 }
 0x250   : > { %v7614_v18 = vadd.f32 %v5621_v5, %v3409_v16  ;;  %v5558_v20 = vpop.f32.mrb[52].mxu0  ;;  %v544_v5 = vld [vmem:[%s7240_s21 + $0x2f0] sm:$0xff] }
 0x251   : > { %v5622_v25 = vpop.f32.mrb[52].mxu1  ;;  %v5559_v59 = vpop.f32.mrb[53].mxu0 }
 0x252   : > { %v5560_v29 = vadd.f32 %v5559_v59, %v5558_v20  ;;  %v5623_v7 = vpop.f32.mrb[53].mxu1  ;;  %v5561_v30 = vpop.f32.mrb[54].mxu0  ;;  %v545_v20 = vld [vmem:[%s7240_s21 + $0x2f8] sm:$0xff] }
 0x253   : > { %v5624_v62 = vadd.f32 %v5623_v7, %v5622_v25  ;;  %v5625_v27 = vpop.f32.mrb[54].mxu1  ;;  %v5562_v32 = vpop.f32.mrb[55].mxu0  ;;  %v5068_v7 = vcombine.high %v532_v15, %v544_v5 }
 0x254   : > { %v3414_v11 = vadd.f32 %v5560_v29, %v7487_v28  ;;  %v5563_v38 = vadd.f32 %v5562_v32, %v5561_v30  ;;  %v5626_v39 = vpop.f32.mrb[55].mxu1  ;;  %v5045_v29 = vcombine.low %v509_v54, %v521_v53  ;;  %v5067_v53 = vcombine.low %v532_v15, %v544_v5  ;;  %v581_v5 = vld [vmem:[%s7240_s21 + $0x418] sm:$0xff] }
 0x255   : > { %v5627_v40 = vadd.f32 %v5626_v39, %v5625_v27  ;;  %4148 = vmatmul.mubr.bf16.vlgmr.msra.gmra.mrb[160].mxu0 %v4995_v26  ;;  %v556_v39 = vld [vmem:[%s7240_s21 + $0x350] sm:$0xff] }
 0x256   : > { %v7619_v41 = vadd.f32 %v5624_v62, %v3414_v11  ;;  %v3417_v42 = vadd.f32 %v5563_v38, %v7496_v36  ;;  %4245 = vmatmul.mubr.bf16.vlgmr.msra.gmra.mrb[160].mxu1 %v4997_v31  ;;  %4155 = vmatprep.mubr.bf16.mxu0 %v5020_v35  ;;  %v5070_v35 = vcombine.high %v533_v13, %v545_v20 }
 0x257   : > { %4252 = vmatprep.mubr.bf16.mxu1 %v5022_v34 }
 0x258   : > { %v7624_v45 = vadd.f32 %v5627_v40, %v3417_v42  ;;  %v5564_v46 = vpop.f32.mrb[56].mxu0  ;;  %v568_v40 = vld [vmem:[%s7240_s21 + $0x3b0] sm:$0xff] }
 0x259   : > { %v5628_v55 = vpop.f32.mrb[56].mxu1  ;;  %v5565_v28 = vpop.f32.mrb[57].mxu0 }
 0x25a   : > { %v5566_v58 = vadd.f32 %v5565_v28, %v5564_v46  ;;  %v5629_v33 = vpop.f32.mrb[57].mxu1  ;;  %v5567_v48 = vpop.f32.mrb[58].mxu0  ;;  %v569_v46 = vld [vmem:[%s7240_s21 + $0x3b8] sm:$0xff] }
 0x25b   : > { %v5630_v36 = vadd.f32 %v5629_v33, %v5628_v55  ;;  %v5631_v0 = vpop.f32.mrb[58].mxu1  ;;  %v5568_v1 = vpop.f32.mrb[59].mxu0  ;;  %v5092_v33 = vcombine.high %v556_v39, %v568_v40 }
 0x25c   : > { %v3422_v37 = vadd.f32 %v5566_v58, %v7513_v3  ;;  %v5569_v4 = vadd.f32 %v5568_v1, %v5567_v48  ;;  %v5632_v9 = vpop.f32.mrb[59].mxu1  ;;  %v5069_v58 = vcombine.low %v533_v13, %v545_v20  ;;  %v5091_v20 = vcombine.low %v556_v39, %v568_v40  ;;  %v605_v40 = vld [vmem:[%s7240_s21 + $0x4d8] sm:$0xff] }
 0x25d   : > { %v5633_v12 = vadd.f32 %v5632_v9, %v5631_v0  ;;  %4156 = vmatmul.mubr.bf16.gmra.mrb[164].mxu0 %v5019_v57  ;;  %v580_v9 = vld [vmem:[%s7240_s21 + $0x410] sm:$0xff] }
 0x25e   : > { %v7629_v51 = vadd.f32 %v5630_v36, %v3422_v37  ;;  %v3425_v14 = vadd.f32 %v5569_v4, %v7525_v10  ;;  %4253 = vmatmul.mubr.bf16.gmra.mrb[164].mxu1 %v5021_v60  ;;  %4163 = vmatprep.mubr.bf16.mxu0 %v5044_v63  ;;  %v5094_v63 = vcombine.high %v557_v49, %v569_v46 }
 0x25f   : > { %4260 = vmatprep.mubr.bf16.mxu1 %v5046_v2 }
 0x260   : > { %v7634_v16 = vadd.f32 %v5633_v12, %v3425_v14  ;;  %v5570_v8 = vpop.f32.mrb[60].mxu0  ;;  %v592_v12 = vld [vmem:[%s7240_s21 + $0x470] sm:$0xff] }
 0x261   : > { %v5634_v21 = vpop.f32.mrb[60].mxu1  ;;  %v5571_v3 = vpop.f32.mrb[61].mxu0 }
 0x262   : > { %v5572_v25 = vadd.f32 %v5571_v3, %v5570_v8  ;;  %v5635_v59 = vpop.f32.mrb[61].mxu1  ;;  %v5573_v26 = vpop.f32.mrb[62].mxu0  ;;  %v593_v8 = vld [vmem:[%s7240_s21 + $0x478] sm:$0xff] }
 0x263   : > { %v5636_v10 = vadd.f32 %v5635_v59, %v5634_v21  ;;  %v5637_v30 = vpop.f32.mrb[62].mxu1  ;;  %v5574_v31 = vpop.f32.mrb[63].mxu0  ;;  %v5116_v59 = vcombine.high %v580_v9, %v592_v12 }
 0x264   : > { %v3430_v62 = vadd.f32 %v5572_v25, %v7539_v43  ;;  %v5575_v27 = vadd.f32 %v5574_v31, %v5573_v26  ;;  %v5638_v32 = vpop.f32.mrb[63].mxu1  ;;  %v5093_v25 = vcombine.low %v557_v49, %v569_v46  ;;  %v5115_v46 = vcombine.low %v580_v9, %v592_v12  ;;  %v629_v12 = vld [vmem:[%s7240_s21 + $0x598] sm:$0xff] }
 0x265   : > { %v5639_v34 = vadd.f32 %v5638_v32, %v5637_v30  ;;  %4164 = vmatmul.mubr.bf16.gmra.mrb[168].mxu0 %v5043_v23  ;;  %v604_v32 = vld [vmem:[%s7240_s21 + $0x4d0] sm:$0xff] }
 0x266   : > { %v7639_v11 = vadd.f32 %v5636_v10, %v3430_v62  ;;  %v3433_v38 = vadd.f32 %v5575_v27, %v7551_v50  ;;  %4261 = vmatmul.mubr.bf16.gmra.mrb[168].mxu1 %v5045_v29  ;;  %4171 = vmatprep.mubr.bf16.mxu0 %v5068_v7  ;;  %v5118_v7 = vcombine.high %v581_v5, %v593_v8 }
 0x267   : > { %4268 = vmatprep.mubr.bf16.mxu1 %v5070_v35 }
 0x268   : > { %v7644_v42 = vadd.f32 %v5639_v34, %v3433_v38  ;;  %v5656_v44 = vpop.f32.mrb[64].mxu0  ;;  %v616_v34 = vld [vmem:[%s7240_s21 + $0x530] sm:$0xff] }
 0x269   : > { %v5720_v54 = vpop.f32.mrb[64].mxu1  ;;  %v5657_v43 = vpop.f32.mrb[65].mxu0 }
 0x26a   : > { %v5658_v55 = vadd.f32 %v5657_v43, %v5656_v44  ;;  %v5721_v28 = vpop.f32.mrb[65].mxu1  ;;  %v5659_v57 = vpop.f32.mrb[66].mxu0  ;;  %v617_v44 = vld [vmem:[%s7240_s21 + $0x538] sm:$0xff] }
 0x26b   : > { %v5722_v50 = vadd.f32 %v5721_v28, %v5720_v54  ;;  %v5723_v48 = vpop.f32.mrb[66].mxu1  ;;  %v5660_v60 = vpop.f32.mrb[67].mxu0  ;;  %v5140_v28 = vcombine.high %v604_v32, %v616_v34 }
 0x26c   : > { %v3568_v36 = vadd.f32 %v5658_v55, %v7565_v19  ;;  %v5661_v0 = vadd.f32 %v5660_v60, %v5659_v57  ;;  %v5724_v1 = vpop.f32.mrb[67].mxu1  ;;  %v5117_v55 = vcombine.low %v581_v5, %v593_v8  ;;  %v5139_v8 = vcombine.low %v604_v32, %v616_v34 }
 0x26d   : > { %v5725_v2 = vadd.f32 %v5724_v1, %v5723_v48  ;;  %4172 = vmatmul.mubr.bf16.gmra.mrb[172].mxu0 %v5067_v53  ;;  %v628_v1 = vld [vmem:[%s7240_s21 + $0x590] sm:$0xff] }
 0x26e   : > { %v7649_v37 = vadd.f32 %v5722_v50, %v3568_v36  ;;  %v3571_v4 = vadd.f32 %v5661_v0, %v7570_v24  ;;  %4269 = vmatmul.mubr.bf16.gmra.mrb[172].mxu1 %v5069_v58  ;;  %4179 = vmatprep.mubr.bf16.mxu0 %v5092_v33  ;;  %v5142_v33 = vcombine.high %v605_v40, %v617_v44 }
 0x26f   : > { %4276 = vmatprep.mubr.bf16.mxu1 %v5094_v63 }
 0x270   : > { %v7654_v14 = vadd.f32 %v5725_v2, %v3571_v4  ;;  %v5662_v15 = vpop.f32.mrb[68].mxu0  ;;  %v640_v2 = vld [vmem:[%s7240_s21 + $0x5f0] sm:$0xff] }
 0x271   : > { %v5726_v13 = vpop.f32.mrb[68].mxu1  ;;  %v5663_v19 = vpop.f32.mrb[69].mxu0  ;;  %v5163_v34 = vcombine.low %v628_v1, %v640_v2 }
 0x272   : > { %v5664_v21 = vadd.f32 %v5663_v19, %v5662_v15  ;;  %v5727_v3 = vpop.f32.mrb[69].mxu1  ;;  %v5665_v23 = vpop.f32.mrb[70].mxu0  ;;  %v641_v15 = vld [vmem:[%s7240_s21 + $0x5f8] sm:$0xff] }
 0x273   : > { %v5728_v24 = vadd.f32 %v5727_v3, %v5726_v13  ;;  %v5729_v26 = vpop.f32.mrb[70].mxu1  ;;  %v5666_v29 = vpop.f32.mrb[71].mxu0  ;;  %v5164_v3 = vcombine.high %v628_v1, %v640_v2 }
 0x274   : > { %v3576_v10 = vadd.f32 %v5664_v21, %v7579_v61  ;;  %v5667_v30 = vadd.f32 %v5666_v29, %v5665_v23  ;;  %v5730_v31 = vpop.f32.mrb[71].mxu1  ;;  %v5141_v21 = vcombine.low %v605_v40, %v617_v44  ;;  %v5165_v44 = vcombine.low %v629_v12, %v641_v15 }
 0x275   : > { %v5731_v35 = vadd.f32 %v5730_v31, %v5729_v26  ;;  %4180 = vmatmul.mubr.bf16.gmra.mrb[176].mxu0 %v5091_v20 }
 0x276   : > { %v7659_v62 = vadd.f32 %v5728_v24, %v3576_v10  ;;  %v3579_v27 = vadd.f32 %v5667_v30, %v7584_v56  ;;  %4277 = vmatmul.mubr.bf16.gmra.mrb[176].mxu1 %v5093_v25  ;;  %4187 = vmatprep.mubr.bf16.mxu0 %v5116_v59  ;;  %v5166_v59 = vcombine.high %v629_v12, %v641_v15 }
 0x277   : > { %4284 = vmatprep.mubr.bf16.mxu1 %v5118_v7 }
 0x278   : > { %v7664_v38 = vadd.f32 %v5731_v35, %v3579_v27  ;;  %v5668_v39 = vpop.f32.mrb[72].mxu0 }
 0x279   : > { %v5732_v49 = vpop.f32.mrb[72].mxu1  ;;  %v5669_v61 = vpop.f32.mrb[73].mxu0 }
 0x27a   : > { %v5670_v54 = vadd.f32 %v5669_v61, %v5668_v39  ;;  %v5733_v43 = vpop.f32.mrb[73].mxu1  ;;  %v5671_v53 = vpop.f32.mrb[74].mxu0 }
 0x27b   : > { %v5734_v56 = vadd.f32 %v5733_v43, %v5732_v49  ;;  %v5735_v57 = vpop.f32.mrb[74].mxu1  ;;  %v5672_v58 = vpop.f32.mrb[75].mxu0 }
 0x27c   : > { %v3584_v50 = vadd.f32 %v5670_v54, %v7589_v17  ;;  %v5673_v48 = vadd.f32 %v5672_v58, %v5671_v53  ;;  %v5736_v60 = vpop.f32.mrb[75].mxu1 }
 0x27d   : > { %v5737_v63 = vadd.f32 %v5736_v60, %v5735_v57  ;;  %4188 = vmatmul.mubr.bf16.gmra.mrb[180].mxu0 %v5115_v46 }
 0x27e   : > { %v7669_v36 = vadd.f32 %v5734_v56, %v3584_v50  ;;  %v3587_v0 = vadd.f32 %v5673_v48, %v7594_v22  ;;  %4285 = vmatmul.mubr.bf16.gmra.mrb[180].mxu1 %v5117_v55  ;;  %4195 = vmatprep.mubr.bf16.mxu0 %v5140_v28 }
 0x27f   : > { %4292 = vmatprep.mubr.bf16.mxu1 %v5142_v33 }
 0x280   : > { %v7674_v4 = vadd.f32 %v5737_v63, %v3587_v0  ;;  %v5674_v9 = vpop.f32.mrb[76].mxu0 }
 0x281   : > { %v5738_v5 = vpop.f32.mrb[76].mxu1  ;;  %v5675_v17 = vpop.f32.mrb[77].mxu0 }
 0x282   : > { %v5676_v13 = vadd.f32 %v5675_v17, %v5674_v9  ;;  %v5739_v19 = vpop.f32.mrb[77].mxu1  ;;  %v5677_v20 = vpop.f32.mrb[78].mxu0 }
 0x283   : > { %v5740_v23 = vadd.f32 %v5739_v19, %v5738_v5  ;;  %v5741_v22 = vpop.f32.mrb[78].mxu1  ;;  %v5678_v25 = vpop.f32.mrb[79].mxu0 }
 0x284   : > { %v3592_v24 = vadd.f32 %v5676_v13, %v7599_v52  ;;  %v5679_v26 = vadd.f32 %v5678_v25, %v5677_v20  ;;  %v5742_v29 = vpop.f32.mrb[79].mxu1 }
 0x285   : > { %v5743_v7 = vadd.f32 %v5742_v29, %v5741_v22  ;;  %4196 = vmatmul.mubr.bf16.gmra.mrb[184].mxu0 %v5139_v8  ;;  %v6566_v8 = vld [vmem:[#allocation9] sm:$0xff]  }
 0x286   : > { %v7679_v10 = vadd.f32 %v5740_v23, %v3592_v24  ;;  %v3595_v30 = vadd.f32 %v5679_v26, %v7604_v47  ;;  %4293 = vmatmul.mubr.bf16.gmra.mrb[184].mxu1 %v5141_v21  ;;  %4203 = vmatprep.mubr.bf16.mxu0 %v5164_v3 }
 0x287   : > { %4300 = vmatprep.mubr.bf16.mxu1 %v5166_v59  ;;  %6184 = vmatprep.subr.bf16.mxu0 %v6566_v8 }
 0x288   : > { %v7682_v31 = vadd.f32 %v5743_v7, %v3595_v30  ;;  %v5680_v35 = vpop.f32.mrb[80].mxu0  ;;  %6185 = vmatpush3.bf16.msra.mxu0 %v6566_v8 }
 0x289   : > { %v5744_v27 = vpop.f32.mrb[80].mxu1  ;;  %v5681_v32 = vpop.f32.mrb[81].mxu0 }
 0x28a   : > { %v5682_v39 = vadd.f32 %v5681_v32, %v5680_v35  ;;  %v5745_v40 = vpop.f32.mrb[81].mxu1  ;;  %v5683_v52 = vpop.f32.mrb[82].mxu0  ;;  %v6567_v35 = vld [vmem:[#allocation9 + $0x8] sm:$0xff]  }
 0x28b   : > { %v5746_v49 = vadd.f32 %v5745_v40, %v5744_v27  ;;  %v5747_v61 = vpop.f32.mrb[82].mxu1  ;;  %v5684_v46 = vpop.f32.mrb[83].mxu0  ;;  %6186 = vmatprep.subr.bf16.mxu0 %v6567_v35 }
 0x28c   : > { %v3600_v54 = vadd.f32 %v5682_v39, %v7609_v6  ;;  %v5685_v43 = vadd.f32 %v5684_v46, %v5683_v52  ;;  %v5748_v47 = vpop.f32.mrb[83].mxu1  ;;  %6187 = vmatpush3.bf16.msra.mxu0 %v6567_v35 }
 0x28d   : > { %v5749_v53 = vadd.f32 %v5748_v47, %v5747_v61  ;;  %4204 = vmatmul.mubr.bf16.gmra.mrb[188].mxu0 %v5163_v34 }
 0x28e   : > { %v7685_v55 = vadd.f32 %v5746_v49, %v3600_v54  ;;  %v3603_v28 = vadd.f32 %v5685_v43, %v7614_v18  ;;  %4301 = vmatmul.mubr.bf16.gmra.mrb[188].mxu1 %v5165_v44 }
 0x290   : > { %v7688_v56 = vadd.f32 %v5749_v53, %v3603_v28  ;;  %v5686_v57 = vpop.f32.mrb[84].mxu0 }
 0x291   : > { %v5750_v58 = vpop.f32.mrb[84].mxu1  ;;  %v5687_v33 = vpop.f32.mrb[85].mxu0 }
 0x292   : > { %v5688_v50 = vadd.f32 %v5687_v33, %v5686_v57  ;;  %v5751_v48 = vpop.f32.mrb[85].mxu1  ;;  %v5689_v60 = vpop.f32.mrb[86].mxu0  ;;  %v6569_v33 = vld [vmem:[#allocation9 + $0x18] sm:$0xff]  }
 0x293   : > { %v5752_v63 = vadd.f32 %v5751_v48, %v5750_v58  ;;  %v5753_v0 = vpop.f32.mrb[86].mxu1  ;;  %v5690_v6 = vpop.f32.mrb[87].mxu0 }
 0x294   : > { %v3608_v1 = vadd.f32 %v5688_v50, %v7619_v41  ;;  %v5691_v2 = vadd.f32 %v5690_v6, %v5689_v60  ;;  %v5754_v9 = vpop.f32.mrb[87].mxu1 }
 0x295   : > { %v5755_v12 = vadd.f32 %v5754_v9, %v5753_v0  ;;  %v6570_v9 = vld [vmem:[#allocation9 + $0x20] sm:$0xff]  }
 0x296   : > { %v7691_v15 = vadd.f32 %v5752_v63, %v3608_v1  ;;  %v3611_v18 = vadd.f32 %v5691_v2, %v7624_v45 }
 0x298   : > { %v7694_v5 = vadd.f32 %v5755_v12, %v3611_v18  ;;  %v5692_v17 = vpop.f32.mrb[88].mxu0 }
 0x299   : > { %v5756_v13 = vpop.f32.mrb[88].mxu1  ;;  %v5693_v19 = vpop.f32.mrb[89].mxu0 }
 0x29a   : > { %v5694_v20 = vadd.f32 %v5693_v19, %v5692_v17  ;;  %v5757_v21 = vpop.f32.mrb[89].mxu1  ;;  %v5695_v3 = vpop.f32.mrb[90].mxu0 }
 0x29b   : > { %v5758_v23 = vadd.f32 %v5757_v21, %v5756_v13  ;;  %v5759_v22 = vpop.f32.mrb[90].mxu1  ;;  %v5696_v41 = vpop.f32.mrb[91].mxu0 }
 0x29c   : > { %v3616_v25 = vadd.f32 %v5694_v20, %v7629_v51  ;;  %v5697_v59 = vadd.f32 %v5696_v41, %v5695_v3  ;;  %v5760_v24 = vpop.f32.mrb[91].mxu1  ;;  %v6571_v20 = vld [vmem:[#allocation9 + $0x28] sm:$0xff]  }
 0x29d   : > { %v5761_v26 = vadd.f32 %v5760_v24, %v5759_v22 }
 0x29e   : > { %v7697_v45 = vadd.f32 %v5758_v23, %v3616_v25  ;;  %v3619_v29 = vadd.f32 %v5697_v59, %v7634_v16  ;;  %v6568_v16 = vld [vmem:[#allocation9 + $0x10] sm:$0xff]  }
 0x29f   : > { %6188 = vmatprep.subr.bf16.mxu0 %v6568_v16 }
 0x2a0   : > { %v7700_v7 = vadd.f32 %v5761_v26, %v3619_v29  ;;  %v5698_v30 = vpop.f32.mrb[92].mxu0  ;;  %6189 = vmatpush3.bf16.msra.mxu0 %v6568_v16  ;;  %v6572_v26 = vld [vmem:[#allocation9 + $0x30] sm:$0xff]  }
 0x2a1   : > { %v5762_v27 = vpop.f32.mrb[92].mxu1  ;;  %v5699_v32 = vpop.f32.mrb[93].mxu0  ;;  %6190 = vmatprep.subr.bf16.mxu0 %v6569_v33 }
 0x2a2   : > { %v5700_v34 = vadd.f32 %v5699_v32, %v5698_v30  ;;  %v5763_v39 = vpop.f32.mrb[93].mxu1  ;;  %v5701_v40 = vpop.f32.mrb[94].mxu0 }
 0x2a3   : > { %v5764_v52 = vadd.f32 %v5763_v39, %v5762_v27  ;;  %v5765_v44 = vpop.f32.mrb[94].mxu1  ;;  %v5702_v51 = vpop.f32.mrb[95].mxu0  ;;  %v6573_v39 = vld [vmem:[#allocation9 + $0x38] sm:$0xff]  }
 0x2a4   : > { %v3624_v49 = vadd.f32 %v5700_v34, %v7639_v11  ;;  %v5703_v61 = vadd.f32 %v5702_v51, %v5701_v40  ;;  %v5766_v46 = vpop.f32.mrb[95].mxu1  ;;  %6191 = vmatpush3.bf16.msra.mxu0 %v6569_v33 }
 0x2a5   : > { %v5767_v54 = vadd.f32 %v5766_v46, %v5765_v44  ;;  %6192 = vmatprep.subr.bf16.mxu0 %v6570_v9 }
 0x2a6   : > { %v7703_v43 = vadd.f32 %v5764_v52, %v3624_v49  ;;  %v3627_v47 = vadd.f32 %v5703_v61, %v7644_v42 }
 0x2a8   : > { %v7706_v53 = vadd.f32 %v5767_v54, %v3627_v47  ;;  %v5784_v28 = vpop.f32.mrb[96].mxu0  ;;  %6193 = vmatpush3.bf16.msra.mxu0 %v6570_v9 }
 0x2a9   : > { %v5848_v57 = vpop.f32.mrb[96].mxu1  ;;  %v5785_v58 = vpop.f32.mrb[97].mxu0  ;;  %6194 = vmatprep.subr.bf16.mxu0 %v6571_v20 }
 0x2aa   : > { %v5786_v50 = vadd.f32 %v5785_v58, %v5784_v28  ;;  %v5849_v48 = vpop.f32.mrb[97].mxu1  ;;  %v5787_v60 = vpop.f32.mrb[98].mxu0 }
 0x2ab   : > { %v5850_v11 = vadd.f32 %v5849_v48, %v5848_v57  ;;  %v5851_v63 = vpop.f32.mrb[98].mxu1  ;;  %v5788_v0 = vpop.f32.mrb[99].mxu0 }
 0x2ac   : > { %v3762_v6 = vadd.f32 %v5786_v50, %v7649_v37  ;;  %v5789_v1 = vadd.f32 %v5788_v0, %v5787_v60  ;;  %v5852_v2 = vpop.f32.mrb[99].mxu1  ;;  %6195 = vmatpush3.bf16.msra.mxu0 %v6571_v20 }
 0x2ad   : > { %v5853_v42 = vadd.f32 %v5852_v2, %v5851_v63  ;;  %6196 = vmatprep.subr.bf16.mxu0 %v6572_v26 }
 0x2ae   : > { %v7709_v12 = vadd.f32 %v5850_v11, %v3762_v6  ;;  %v3765_v18 = vadd.f32 %v5789_v1, %v7654_v14 }
 0x2b0   : > { %v7712_v17 = vadd.f32 %v5853_v42, %v3765_v18  ;;  %v5790_v8 = vpop.f32.mrb[100].mxu0  ;;  %6197 = vmatpush3.bf16.msra.mxu0 %v6572_v26 }
 0x2b1   : > { %v5854_v13 = vpop.f32.mrb[100].mxu1  ;;  %v5791_v19 = vpop.f32.mrb[101].mxu0  ;;  %6198 = vmatprep.subr.bf16.mxu0 %v6573_v39 }
 0x2b2   : > { %v5792_v21 = vadd.f32 %v5791_v19, %v5790_v8  ;;  %v5855_v3 = vpop.f32.mrb[101].mxu1  ;;  %v5793_v37 = vpop.f32.mrb[102].mxu0 }
 0x2b3   : > { %v5856_v23 = vadd.f32 %v5855_v3, %v5854_v13  ;;  %v5857_v22 = vpop.f32.mrb[102].mxu1  ;;  %v5794_v41 = vpop.f32.mrb[103].mxu0 }
 0x2b4   : > { %v3770_v25 = vadd.f32 %v5792_v21, %v7659_v62  ;;  %v5795_v59 = vadd.f32 %v5794_v41, %v5793_v37  ;;  %v5858_v24 = vpop.f32.mrb[103].mxu1  ;;  %6199 = vmatpush3.bf16.msra.mxu0 %v6573_v39 }
 0x2b5   : > { %v5859_v14 = vadd.f32 %v5858_v24, %v5857_v22 }
 0x2b6   : > { %v7715_v29 = vadd.f32 %v5856_v23, %v3770_v25  ;;  %v3773_v30 = vadd.f32 %v5795_v59, %v7664_v38 }
 0x2b8   : > { %v7718_v35 = vadd.f32 %v5859_v14, %v3773_v30  ;;  %v5796_v27 = vpop.f32.mrb[104].mxu0 }
 0x2b9   : > { %v5860_v32 = vpop.f32.mrb[104].mxu1  ;;  %v5797_v34 = vpop.f32.mrb[105].mxu0 }
 0x2ba   : > { %v5798_v40 = vadd.f32 %v5797_v34, %v5796_v27  ;;  %v5861_v52 = vpop.f32.mrb[105].mxu1  ;;  %v5799_v62 = vpop.f32.mrb[106].mxu0 }
 0x2bb   : > { %v5862_v44 = vadd.f32 %v5861_v52, %v5860_v32  ;;  %v5863_v51 = vpop.f32.mrb[106].mxu1  ;;  %v5800_v49 = vpop.f32.mrb[107].mxu0 }
 0x2bc   : > { %v3778_v61 = vadd.f32 %v5798_v40, %v7669_v36  ;;  %v5801_v46 = vadd.f32 %v5800_v49, %v5799_v62  ;;  %v5864_v54 = vpop.f32.mrb[107].mxu1 }
 0x2bd   : > { %v5865_v38 = vadd.f32 %v5864_v54, %v5863_v51 }
 0x2be   : > { %v7721_v16 = vadd.f32 %v5862_v44, %v3778_v61  ;;  %v3781_v47 = vadd.f32 %v5801_v46, %v7674_v4 }
 0x2c0   : > { %v7724_v28 = vadd.f32 %v5865_v38, %v3781_v47  ;;  %v5802_v57 = vpop.f32.mrb[108].mxu0 }
 0x2c1   : > { %v5866_v58 = vpop.f32.mrb[108].mxu1  ;;  %v5803_v33 = vpop.f32.mrb[109].mxu0 }
 0x2c2   : > { %v5804_v50 = vadd.f32 %v5803_v33, %v5802_v57  ;;  %v5867_v48 = vpop.f32.mrb[109].mxu1  ;;  %v5805_v60 = vpop.f32.mrb[110].mxu0 }
 0x2c3   : > { %v5868_v11 = vadd.f32 %v5867_v48, %v5866_v58  ;;  %v5869_v63 = vpop.f32.mrb[110].mxu1  ;;  %v5806_v0 = vpop.f32.mrb[111].mxu0 }
 0x2c4   : > { %v3786_v36 = vadd.f32 %v5804_v50, %v7679_v10  ;;  %v5807_v6 = vadd.f32 %v5806_v0, %v5805_v60  ;;  %v5870_v1 = vpop.f32.mrb[111].mxu1 }
 0x2c5   : > { %v5871_v2 = vadd.f32 %v5870_v1, %v5869_v63 }
 0x2c6   : > { %v7727_v42 = vadd.f32 %v5868_v11, %v3786_v36  ;;  %v3789_v4 = vadd.f32 %v5807_v6, %v7682_v31 }
 0x2c8   : > { %v7730_v9 = vadd.f32 %v5871_v2, %v3789_v4  ;;  %v5808_v18 = vpop.f32.mrb[112].mxu0 }
 0x2c9   : > { %v5872_v8 = vpop.f32.mrb[112].mxu1  ;;  %v5809_v13 = vpop.f32.mrb[113].mxu0 }
 0x2ca   : > { %v5810_v19 = vadd.f32 %v5809_v13, %v5808_v18  ;;  %v5873_v20 = vpop.f32.mrb[113].mxu1  ;;  %v5811_v21 = vpop.f32.mrb[114].mxu0 }
 0x2cb   : > { %v5874_v3 = vadd.f32 %v5873_v20, %v5872_v8  ;;  %v5875_v37 = vpop.f32.mrb[114].mxu1  ;;  %v5812_v23 = vpop.f32.mrb[115].mxu0 }
 0x2cc   : > { %v3794_v10 = vadd.f32 %v5810_v19, %v7685_v55  ;;  %v5813_v22 = vadd.f32 %v5812_v23, %v5811_v21  ;;  %v5876_v41 = vpop.f32.mrb[115].mxu1 }
 0x2cd   : > { %v5877_v25 = vadd.f32 %v5876_v41, %v5875_v37 }
 0x2ce   : > { %v7733_v59 = vadd.f32 %v5874_v3, %v3794_v10  ;;  %v3797_v31 = vadd.f32 %v5813_v22, %v7688_v56 }
 0x2d0   : > { %v7736_v24 = vadd.f32 %v5877_v25, %v3797_v31  ;;  %v5814_v14 = vpop.f32.mrb[116].mxu0 }
 0x2d1   : > { %v5878_v26 = vpop.f32.mrb[116].mxu1  ;;  %v5815_v30 = vpop.f32.mrb[117].mxu0 }
 0x2d2   : > { %v5816_v27 = vadd.f32 %v5815_v30, %v5814_v14  ;;  %v5879_v32 = vpop.f32.mrb[117].mxu1  ;;  %v5817_v34 = vpop.f32.mrb[118].mxu0 }
 0x2d3   : > { %v5880_v39 = vadd.f32 %v5879_v32, %v5878_v26  ;;  %v5881_v40 = vpop.f32.mrb[118].mxu1  ;;  %v5818_v52 = vpop.f32.mrb[119].mxu0 }
 0x2d4   : > { %v3802_v55 = vadd.f32 %v5816_v27, %v7691_v15  ;;  %v5819_v62 = vadd.f32 %v5818_v52, %v5817_v34  ;;  %v5882_v44 = vpop.f32.mrb[119].mxu1 }
 0x2d5   : > { %v5883_v51 = vadd.f32 %v5882_v44, %v5881_v40 }
 0x2d6   : > { %v7739_v49 = vadd.f32 %v5880_v39, %v3802_v55  ;;  %v3805_v56 = vadd.f32 %v5819_v62, %v7694_v5  ;;  %v6574_v55 = vld [vmem:[#allocation12] sm:$0xff]   ;;  %v6575_v62 = vld [vmem:[#allocation12 + $0x8] sm:$0xff]  }
 0x2d7   : > { %6216 = vmatprep.subr.bf16.mxu1 %v6574_v55 }
 0x2d8   : > { %v7742_v61 = vadd.f32 %v5883_v51, %v3805_v56  ;;  %v5820_v46 = vpop.f32.mrb[120].mxu0  ;;  %6217 = vmatpush3.bf16.msra.mxu1 %v6574_v55 }
 0x2d9   : > { %v5884_v54 = vpop.f32.mrb[120].mxu1  ;;  %v5821_v38 = vpop.f32.mrb[121].mxu0  ;;  %6218 = vmatprep.subr.bf16.mxu1 %v6575_v62 }
 0x2da   : > { %v5822_v47 = vadd.f32 %v5821_v38, %v5820_v46  ;;  %v5885_v57 = vpop.f32.mrb[121].mxu1  ;;  %v5823_v58 = vpop.f32.mrb[122].mxu0 }
 0x2db   : > { %v5886_v33 = vadd.f32 %v5885_v57, %v5884_v54  ;;  %v5887_v50 = vpop.f32.mrb[122].mxu1  ;;  %v5824_v48 = vpop.f32.mrb[123].mxu0 }
 0x2dc   : > { %v3810_v15 = vadd.f32 %v5822_v47, %v7697_v45  ;;  %v5825_v60 = vadd.f32 %v5824_v48, %v5823_v58  ;;  %v5888_v11 = vpop.f32.mrb[123].mxu1  ;;  %6219 = vmatpush3.bf16.msra.mxu1 %v6575_v62 }
 0x2dd   : > { %v5889_v63 = vadd.f32 %v5888_v11, %v5887_v50 }
 0x2de   : > { %v7745_v0 = vadd.f32 %v5886_v33, %v3810_v15  ;;  %v3813_v5 = vadd.f32 %v5825_v60, %v7700_v7 }
 0x2e0   : > { %v7748_v36 = vadd.f32 %v5889_v63, %v3813_v5  ;;  %v5826_v6 = vpop.f32.mrb[124].mxu0  ;;  %v6577_v63 = vld [vmem:[#allocation12 + $0x18] sm:$0xff]  }
 0x2e1   : > { %v5890_v1 = vpop.f32.mrb[124].mxu1  ;;  %v5827_v2 = vpop.f32.mrb[125].mxu0 }
 0x2e2   : > { %v5828_v4 = vadd.f32 %v5827_v2, %v5826_v6  ;;  %v5891_v18 = vpop.f32.mrb[125].mxu1  ;;  %v5829_v8 = vpop.f32.mrb[126].mxu0 }
 0x2e3   : > { %v5892_v13 = vadd.f32 %v5891_v18, %v5890_v1  ;;  %v5893_v19 = vpop.f32.mrb[126].mxu1  ;;  %v5830_v20 = vpop.f32.mrb[127].mxu0 }
 0x2e4   : > { %v3818_v45 = vadd.f32 %v5828_v4, %v7703_v43  ;;  %v5831_v21 = vadd.f32 %v5830_v20, %v5829_v8  ;;  %v5894_v3 = vpop.f32.mrb[127].mxu1 }
 0x2e5   : > { %v5895_v37 = vadd.f32 %v5894_v3, %v5893_v19 }
 0x2e6   : > { %v7751_v23 = vadd.f32 %v5892_v13, %v3818_v45  ;;  %v3821_v7 = vadd.f32 %v5831_v21, %v7706_v53 }
 0x2e8   : > { %v7754_v10 = vadd.f32 %v5895_v37, %v3821_v7  ;;  %v5912_v22 = vpop.f32.mrb[128].mxu0 }
 0x2e9   : > { %v5976_v41 = vpop.f32.mrb[128].mxu1  ;;  %v5913_v25 = vpop.f32.mrb[129].mxu0 }
 0x2ea   : > { %v5914_v31 = vadd.f32 %v5913_v25, %v5912_v22  ;;  %v5977_v14 = vpop.f32.mrb[129].mxu1  ;;  %v5915_v26 = vpop.f32.mrb[130].mxu0  ;;  %v6579_v22 = vld [vmem:[#allocation12 + $0x28] sm:$0xff]  }
 0x2eb   : > { %v5978_v30 = vadd.f32 %v5977_v14, %v5976_v41  ;;  %v5979_v27 = vpop.f32.mrb[130].mxu1  ;;  %v5916_v32 = vpop.f32.mrb[131].mxu0 }
 0x2ec   : > { %v3956_v43 = vadd.f32 %v5914_v31, %v7709_v12  ;;  %v5917_v34 = vadd.f32 %v5916_v32, %v5915_v26  ;;  %v5980_v39 = vpop.f32.mrb[131].mxu1  ;;  %v6576_v12 = vld [vmem:[#allocation12 + $0x10] sm:$0xff]  }
 0x2ed   : > { %v5981_v40 = vadd.f32 %v5980_v39, %v5979_v27  ;;  %6220 = vmatprep.subr.bf16.mxu1 %v6576_v12 }
 0x2ee   : > { %v7757_v52 = vadd.f32 %v5978_v30, %v3956_v43  ;;  %v3959_v53 = vadd.f32 %v5917_v34, %v7712_v17  ;;  %6221 = vmatpush3.bf16.msra.mxu1 %v6576_v12 }
 0x2ef   : > { %6222 = vmatprep.subr.bf16.mxu1 %v6577_v63 }
 0x2f0   : > { %v7760_v44 = vadd.f32 %v5981_v40, %v3959_v53  ;;  %v5918_v51 = vpop.f32.mrb[132].mxu0 }
 0x2f1   : > { %v5982_v56 = vpop.f32.mrb[132].mxu1  ;;  %v5919_v46 = vpop.f32.mrb[133].mxu0 }
 0x2f2   : > { %v5920_v54 = vadd.f32 %v5919_v46, %v5918_v51  ;;  %v5983_v38 = vpop.f32.mrb[133].mxu1  ;;  %v5921_v47 = vpop.f32.mrb[134].mxu0  ;;  %6223 = vmatpush3.bf16.msra.mxu1 %v6577_v63 }
 0x2f3   : > { %v5984_v57 = vadd.f32 %v5983_v38, %v5982_v56  ;;  %v5985_v58 = vpop.f32.mrb[134].mxu1  ;;  %v5922_v33 = vpop.f32.mrb[135].mxu0 }
 0x2f4   : > { %v3964_v50 = vadd.f32 %v5920_v54, %v7715_v29  ;;  %v5923_v17 = vadd.f32 %v5922_v33, %v5921_v47  ;;  %v5986_v48 = vpop.f32.mrb[135].mxu1  ;;  %v6578_v29 = vld [vmem:[#allocation12 + $0x20] sm:$0xff]  }
 0x2f5   : > { %v5987_v15 = vadd.f32 %v5986_v48, %v5985_v58  ;;  %6224 = vmatprep.subr.bf16.mxu1 %v6578_v29 }
 0x2f6   : > { %v7763_v60 = vadd.f32 %v5984_v57, %v3964_v50  ;;  %v3967_v11 = vadd.f32 %v5923_v17, %v7718_v35  ;;  %6225 = vmatpush3.bf16.msra.mxu1 %v6578_v29 }
 0x2f7   : > { %6226 = vmatprep.subr.bf16.mxu1 %v6579_v22 }
 0x2f8   : > { %v7766_v5 = vadd.f32 %v5987_v15, %v3967_v11  ;;  %v5924_v6 = vpop.f32.mrb[136].mxu0 }
 0x2f9   : > { %v5988_v1 = vpop.f32.mrb[136].mxu1  ;;  %v5925_v2 = vpop.f32.mrb[137].mxu0 }
 0x2fa   : > { %v5926_v4 = vadd.f32 %v5925_v2, %v5924_v6  ;;  %v5989_v18 = vpop.f32.mrb[137].mxu1  ;;  %v5927_v8 = vpop.f32.mrb[138].mxu0  ;;  %6227 = vmatpush3.bf16.msra.mxu1 %v6579_v22 }
 0x2fb   : > { %v5990_v13 = vadd.f32 %v5989_v18, %v5988_v1  ;;  %v5991_v19 = vpop.f32.mrb[138].mxu1  ;;  %v5928_v20 = vpop.f32.mrb[139].mxu0 }
 0x2fc   : > { %v3972_v45 = vadd.f32 %v5926_v4, %v7721_v16  ;;  %v5929_v21 = vadd.f32 %v5928_v20, %v5927_v8  ;;  %v5992_v35 = vpop.f32.mrb[139].mxu1 }
 0x2fd   : > { %v5993_v3 = vadd.f32 %v5992_v35, %v5991_v19 }
 0x2fe   : > { %v7769_v37 = vadd.f32 %v5990_v13, %v3972_v45  ;;  %v3975_v7 = vadd.f32 %v5929_v21, %v7724_v28 }
 0x300   : > { %v7772_v41 = vadd.f32 %v5993_v3, %v3975_v7  ;;  %v5930_v25 = vpop.f32.mrb[140].mxu0 }
 0x301   : > { %v5994_v31 = vpop.f32.mrb[140].mxu1  ;;  %v5931_v14 = vpop.f32.mrb[141].mxu0 }
 0x302   : > { %v5932_v26 = vadd.f32 %v5931_v14, %v5930_v25  ;;  %v5995_v30 = vpop.f32.mrb[141].mxu1  ;;  %v5933_v27 = vpop.f32.mrb[142].mxu0 }
 0x303   : > { %v5996_v16 = vadd.f32 %v5995_v30, %v5994_v31  ;;  %v5997_v32 = vpop.f32.mrb[142].mxu1  ;;  %v5934_v43 = vpop.f32.mrb[143].mxu0 }
 0x304   : > { %v3980_v34 = vadd.f32 %v5932_v26, %v7727_v42  ;;  %v5935_v39 = vadd.f32 %v5934_v43, %v5933_v27  ;;  %v5998_v40 = vpop.f32.mrb[143].mxu1 }
 0x305   : > { %v5999_v28 = vadd.f32 %v5998_v40, %v5997_v32 }
 0x306   : > { %v7775_v53 = vadd.f32 %v5996_v16, %v3980_v34  ;;  %v3983_v55 = vadd.f32 %v5935_v39, %v7730_v9 }
 0x308   : > { %v7778_v62 = vadd.f32 %v5999_v28, %v3983_v55  ;;  %v5936_v51 = vpop.f32.mrb[144].mxu0 }
 0x309   : > { %v6000_v56 = vpop.f32.mrb[144].mxu1  ;;  %v5937_v46 = vpop.f32.mrb[145].mxu0 }
 0x30a   : > { %v5938_v54 = vadd.f32 %v5937_v46, %v5936_v51  ;;  %v6001_v38 = vpop.f32.mrb[145].mxu1  ;;  %v5939_v47 = vpop.f32.mrb[146].mxu0 }
 0x30b   : > { %v6002_v12 = vadd.f32 %v6001_v38, %v6000_v56  ;;  %v6003_v57 = vpop.f32.mrb[146].mxu1  ;;  %v5940_v58 = vpop.f32.mrb[147].mxu0 }
 0x30c   : > { %v3988_v42 = vadd.f32 %v5938_v54, %v7733_v59  ;;  %v5941_v33 = vadd.f32 %v5940_v58, %v5939_v47  ;;  %v6004_v50 = vpop.f32.mrb[147].mxu1 }
 0x30d   : > { %v6005_v17 = vadd.f32 %v6004_v50, %v6003_v57 }
 0x30e   : > { %v7781_v48 = vadd.f32 %v6002_v12, %v3988_v42  ;;  %v3991_v9 = vadd.f32 %v5941_v33, %v7736_v24 }
 0x310   : > { %v7784_v15 = vadd.f32 %v6005_v17, %v3991_v9  ;;  %v5942_v11 = vpop.f32.mrb[148].mxu0 }
 0x311   : > { %v6006_v63 = vpop.f32.mrb[148].mxu1  ;;  %v5943_v6 = vpop.f32.mrb[149].mxu0 }
 0x312   : > { %v5944_v1 = vadd.f32 %v5943_v6, %v5942_v11  ;;  %v6007_v2 = vpop.f32.mrb[149].mxu1  ;;  %v5945_v4 = vpop.f32.mrb[150].mxu0 }
 0x313   : > { %v6008_v18 = vadd.f32 %v6007_v2, %v6006_v63  ;;  %v6009_v8 = vpop.f32.mrb[150].mxu1  ;;  %v5946_v29 = vpop.f32.mrb[151].mxu0 }
 0x314   : > { %v3996_v59 = vadd.f32 %v5944_v1, %v7739_v49  ;;  %v5947_v13 = vadd.f32 %v5946_v29, %v5945_v4  ;;  %v6010_v19 = vpop.f32.mrb[151].mxu1 }
 0x315   : > { %v6011_v20 = vadd.f32 %v6010_v19, %v6009_v8 }
 0x316   : > { %v7787_v45 = vadd.f32 %v6008_v18, %v3996_v59  ;;  %v3999_v24 = vadd.f32 %v5947_v13, %v7742_v61 }
 0x318   : > { %v7790_v21 = vadd.f32 %v6011_v20, %v3999_v24  ;;  %v5948_v35 = vpop.f32.mrb[152].mxu0 }
 0x319   : > { %v6012_v3 = vpop.f32.mrb[152].mxu1  ;;  %v5949_v7 = vpop.f32.mrb[153].mxu0 }
 0x31a   : > { %v5950_v22 = vadd.f32 %v5949_v7, %v5948_v35  ;;  %v6013_v25 = vpop.f32.mrb[153].mxu1  ;;  %v5951_v31 = vpop.f32.mrb[154].mxu0 }
 0x31b   : > { %v6014_v14 = vadd.f32 %v6013_v25, %v6012_v3  ;;  %v6015_v26 = vpop.f32.mrb[154].mxu1  ;;  %v5952_v30 = vpop.f32.mrb[155].mxu0 }
 0x31c   : > { %v4004_v49 = vadd.f32 %v5950_v22, %v7745_v0  ;;  %v5953_v27 = vadd.f32 %v5952_v30, %v5951_v31  ;;  %v6016_v16 = vpop.f32.mrb[155].mxu1 }
 0x31d   : > { %v6017_v32 = vadd.f32 %v6016_v16, %v6015_v26 }
 0x31e   : > { %v7793_v43 = vadd.f32 %v6014_v14, %v4004_v49  ;;  %v4007_v61 = vadd.f32 %v5953_v27, %v7748_v36 }
 0x320   : > { %v7796_v34 = vadd.f32 %v6017_v32, %v4007_v61  ;;  %v5954_v39 = vpop.f32.mrb[156].mxu0 }
 0x321   : > { %v6018_v40 = vpop.f32.mrb[156].mxu1  ;;  %v5955_v28 = vpop.f32.mrb[157].mxu0 }
 0x322   : > { %v5956_v55 = vadd.f32 %v5955_v28, %v5954_v39  ;;  %v6019_v51 = vpop.f32.mrb[157].mxu1  ;;  %v5957_v56 = vpop.f32.mrb[158].mxu0 }
 0x323   : > { %v6020_v46 = vadd.f32 %v6019_v51, %v6018_v40  ;;  %v6021_v54 = vpop.f32.mrb[158].mxu1  ;;  %v5958_v38 = vpop.f32.mrb[159].mxu0 }
 0x324   : > { %v4012_v0 = vadd.f32 %v5956_v55, %v7751_v23  ;;  %v5959_v47 = vadd.f32 %v5958_v38, %v5957_v56  ;;  %v6022_v12 = vpop.f32.mrb[159].mxu1 }
 0x325   : > { %v6023_v57 = vadd.f32 %v6022_v12, %v6021_v54 }
 0x326   : > { %v7799_v58 = vadd.f32 %v6020_v46, %v4012_v0  ;;  %v4015_v36 = vadd.f32 %v5959_v47, %v7754_v10 }
 0x328   : > { %v7802_v42 = vadd.f32 %v6023_v57, %v4015_v36  ;;  %v6040_v33 = vpop.f32.mrb[160].mxu0 }
 0x329   : > { %v6104_v50 = vpop.f32.mrb[160].mxu1  ;;  %v6041_v17 = vpop.f32.mrb[161].mxu0 }
 0x32a   : > { %v6042_v9 = vadd.f32 %v6041_v17, %v6040_v33  ;;  %v6105_v11 = vpop.f32.mrb[161].mxu1  ;;  %v6043_v63 = vpop.f32.mrb[162].mxu0 }
 0x32b   : > { %v6106_v6 = vadd.f32 %v6105_v11, %v6104_v50  ;;  %v6107_v1 = vpop.f32.mrb[162].mxu1  ;;  %v6044_v2 = vpop.f32.mrb[163].mxu0 }
 0x32c   : > { %v4150_v23 = vadd.f32 %v6042_v9, %v7757_v52  ;;  %v6045_v4 = vadd.f32 %v6044_v2, %v6043_v63  ;;  %v6108_v18 = vpop.f32.mrb[163].mxu1 }
 0x32d   : > { %v6109_v8 = vadd.f32 %v6108_v18, %v6107_v1 }
 0x32e   : > { %v4247_v29 = vadd.f32 %v6106_v6, %v4150_v23  ;;  %v4153_v59 = vadd.f32 %v6045_v4, %v7760_v44 }
 0x330   : > { %v4250_v10 = vadd.f32 %v6109_v8, %v4153_v59  ;;  %v6046_v13 = vpop.f32.mrb[164].mxu0  ;;  %v4309_v24 = vmax.f32 %v4247_v29, 0.0 }
 0x331   : > { %v6110_v19 = vpop.f32.mrb[164].mxu1  ;;  %v6047_v20 = vpop.f32.mrb[165].mxu0 }
 0x332   : > { %v4310_v35 = vmax.f32 %v4250_v10, 0.0  ;;  %v6048_v3 = vadd.f32 %v6047_v20, %v6046_v13  ;;  %v6111_v7 = vpop.f32.mrb[165].mxu1  ;;  %v6049_v22 = vpop.f32.mrb[166].mxu0 }
 0x333   : > { %v6112_v25 = vadd.f32 %v6111_v7, %v6110_v19  ;;  %v6113_v31 = vpop.f32.mrb[166].mxu1  ;;  %v6050_v14 = vpop.f32.mrb[167].mxu0 }
 0x334   : > { %v4158_v52 = vadd.f32 %v6048_v3, %v7763_v60  ;;  %v6051_v26 = vadd.f32 %v6050_v14, %v6049_v22  ;;  %v6114_v30 = vpop.f32.mrb[167].mxu1  ;;  %v4325_v49 = vpack.c.bf16 %v4310_v35, %v4309_v24 }
 0x335   : > { %v6115_v27 = vadd.f32 %v6114_v30, %v6113_v31 }
 0x336   : > { %v4255_v16 = vadd.f32 %v6112_v25, %v4158_v52  ;;  %v4161_v44 = vadd.f32 %v6051_v26, %v7766_v5  ;;  %6200 = vmatprep.mubr.bf16.mxu0 %v4325_v49 }
 0x338   : > { %v4258_v32 = vadd.f32 %v6115_v27, %v4161_v44  ;;  %v6052_v61 = vpop.f32.mrb[168].mxu0  ;;  %v4311_v28 = vmax.f32 %v4255_v16, 0.0 }
 0x339   : > { %v6116_v39 = vpop.f32.mrb[168].mxu1  ;;  %v6053_v40 = vpop.f32.mrb[169].mxu0 }
 0x33a   : > { %v4312_v55 = vmax.f32 %v4258_v32, 0.0  ;;  %v6054_v51 = vadd.f32 %v6053_v40, %v6052_v61  ;;  %v6117_v56 = vpop.f32.mrb[169].mxu1  ;;  %v6055_v46 = vpop.f32.mrb[170].mxu0 }
 0x33b   : > { %v6118_v54 = vadd.f32 %v6117_v56, %v6116_v39  ;;  %v6119_v38 = vpop.f32.mrb[170].mxu1  ;;  %v6056_v60 = vpop.f32.mrb[171].mxu0 }
 0x33c   : > { %v4326_v0 = vpack.c.bf16 %v4312_v55, %v4311_v28  ;;  %v4166_v47 = vadd.f32 %v6054_v51, %v7769_v37  ;;  %v6057_v12 = vadd.f32 %v6056_v60, %v6055_v46  ;;  %v6120_v57 = vpop.f32.mrb[171].mxu1 }
 0x33d   : > { %v6121_v36 = vadd.f32 %v6120_v57, %v6119_v38 }
 0x33e   : > { %v4263_v5 = vadd.f32 %v6118_v54, %v4166_v47  ;;  %v4169_v33 = vadd.f32 %v6057_v12, %v7772_v41  ;;  %6201 = vmatmul.mubr.bf16.vlgmr.msra.gmra.mrb[192].mxu0 %v4326_v0 }
 0x340   : > { %v4266_v50 = vadd.f32 %v6121_v36, %v4169_v33  ;;  %v6058_v17 = vpop.f32.mrb[172].mxu0  ;;  %v4313_v63 = vmax.f32 %v4263_v5, 0.0 }
 0x341   : > { %v6122_v9 = vpop.f32.mrb[172].mxu1  ;;  %v6059_v11 = vpop.f32.mrb[173].mxu0 }
 0x342   : > { %v4314_v6 = vmax.f32 %v4266_v50, 0.0  ;;  %v6060_v1 = vadd.f32 %v6059_v11, %v6058_v17  ;;  %v6123_v2 = vpop.f32.mrb[173].mxu1  ;;  %v6061_v23 = vpop.f32.mrb[174].mxu0 }
 0x343   : > { %v6124_v4 = vadd.f32 %v6123_v2, %v6122_v9  ;;  %v6125_v18 = vpop.f32.mrb[174].mxu1  ;;  %v6062_v8 = vpop.f32.mrb[175].mxu0 }
 0x344   : > { %v4174_v37 = vadd.f32 %v6060_v1, %v7775_v53  ;;  %v6063_v29 = vadd.f32 %v6062_v8, %v6061_v23  ;;  %v6126_v59 = vpop.f32.mrb[175].mxu1  ;;  %v4327_v10 = vpack.c.bf16 %v4314_v6, %v4313_v63 }
 0x345   : > { %v6127_v13 = vadd.f32 %v6126_v59, %v6125_v18 }
 0x346   : > { %v4271_v41 = vadd.f32 %v6124_v4, %v4174_v37  ;;  %v4177_v19 = vadd.f32 %v6063_v29, %v7778_v62  ;;  %6204 = vmatprep.mubr.bf16.mxu0 %v4327_v10 }
 0x348   : > { %v4274_v20 = vadd.f32 %v6127_v13, %v4177_v19  ;;  %v6064_v24 = vpop.f32.mrb[176].mxu0  ;;  %v4315_v7 = vmax.f32 %v4271_v41, 0.0 }
 0x349   : > { %v6128_v35 = vpop.f32.mrb[176].mxu1  ;;  %v6065_v3 = vpop.f32.mrb[177].mxu0 }
 0x34a   : > { %v4316_v22 = vmax.f32 %v4274_v20, 0.0  ;;  %v6066_v25 = vadd.f32 %v6065_v3, %v6064_v24  ;;  %v6129_v31 = vpop.f32.mrb[177].mxu1  ;;  %v6067_v14 = vpop.f32.mrb[178].mxu0 }
 0x34b   : > { %v6130_v52 = vadd.f32 %v6129_v31, %v6128_v35  ;;  %v6131_v26 = vpop.f32.mrb[178].mxu1  ;;  %v6068_v53 = vpop.f32.mrb[179].mxu0 }
 0x34c   : > { %v4182_v30 = vadd.f32 %v6066_v25, %v7781_v48  ;;  %v6069_v49 = vadd.f32 %v6068_v53, %v6067_v14  ;;  %v6132_v27 = vpop.f32.mrb[179].mxu1  ;;  %v4328_v16 = vpack.c.bf16 %v4316_v22, %v4315_v7 }
 0x34d   : > { %v6133_v44 = vadd.f32 %v6132_v27, %v6131_v26 }
 0x34e   : > { %v4279_v62 = vadd.f32 %v6130_v52, %v4182_v30  ;;  %v4185_v32 = vadd.f32 %v6069_v49, %v7784_v15  ;;  %6205 = vmatmul.mubr.bf16.gmra.mrb[196].mxu0 %v4328_v16 }
 0x350   : > { %v4282_v61 = vadd.f32 %v6133_v44, %v4185_v32  ;;  %v6070_v39 = vpop.f32.mrb[180].mxu0  ;;  %v4317_v55 = vmax.f32 %v4279_v62, 0.0  ;;  %v6580_v32 = vld [vmem:[#allocation12 + $0x30] sm:$0xff]  }
 0x351   : > { %v6134_v40 = vpop.f32.mrb[180].mxu1  ;;  %v6071_v28 = vpop.f32.mrb[181].mxu0  ;;  %6228 = vmatprep.subr.bf16.mxu1 %v6580_v32 }
 0x352   : > { %v4318_v51 = vmax.f32 %v4282_v61, 0.0  ;;  %v6072_v56 = vadd.f32 %v6071_v28, %v6070_v39  ;;  %v6135_v46 = vpop.f32.mrb[181].mxu1  ;;  %v6073_v54 = vpop.f32.mrb[182].mxu0  ;;  %6229 = vmatpush3.bf16.msra.mxu1 %v6580_v32  ;;  %v6581_v61 = vld [vmem:[#allocation12 + $0x38] sm:$0xff]  }
 0x353   : > { %v6136_v38 = vadd.f32 %v6135_v46, %v6134_v40  ;;  %v6137_v60 = vpop.f32.mrb[182].mxu1  ;;  %v6074_v48 = vpop.f32.mrb[183].mxu0  ;;  %6230 = vmatprep.subr.bf16.mxu1 %v6581_v61 }
 0x354   : > { %v4190_v0 = vadd.f32 %v6072_v56, %v7787_v45  ;;  %v6075_v47 = vadd.f32 %v6074_v48, %v6073_v54  ;;  %v6138_v12 = vpop.f32.mrb[183].mxu1  ;;  %v4329_v57 = vpack.c.bf16 %v4318_v51, %v4317_v55 }
 0x355   : > { %v6139_v36 = vadd.f32 %v6138_v12, %v6137_v60 }
 0x356   : > { %v4287_v15 = vadd.f32 %v6136_v38, %v4190_v0  ;;  %v4193_v5 = vadd.f32 %v6075_v47, %v7790_v21  ;;  %6208 = vmatprep.mubr.bf16.mxu0 %v4329_v57  ;;  %6231 = vmatpush3.bf16.msra.mxu1 %v6581_v61  ;;  %v7824_v61 = vld [vmem:[#allocation15] ss:$0 sm:$0xff] }
 0x358   : > { %v4290_v33 = vadd.f32 %v6139_v36, %v4193_v5  ;;  %v6076_v50 = vpop.f32.mrb[184].mxu0  ;;  %v4319_v11 = vmax.f32 %v4287_v15, 0.0 }
 0x359   : > { %v6140_v17 = vpop.f32.mrb[184].mxu1  ;;  %v6077_v9 = vpop.f32.mrb[185].mxu0 }
 0x35a   : > { %v4320_v63 = vmax.f32 %v4290_v33, 0.0  ;;  %v6078_v6 = vadd.f32 %v6077_v9, %v6076_v50  ;;  %v6141_v1 = vpop.f32.mrb[185].mxu1  ;;  %v6079_v2 = vpop.f32.mrb[186].mxu0 }
 0x35b   : > { %v6142_v23 = vadd.f32 %v6141_v1, %v6140_v17  ;;  %v6143_v4 = vpop.f32.mrb[186].mxu1  ;;  %v6080_v45 = vpop.f32.mrb[187].mxu0 }
 0x35c   : > { %v4198_v18 = vadd.f32 %v6078_v6, %v7793_v43  ;;  %v6081_v8 = vadd.f32 %v6080_v45, %v6079_v2  ;;  %v6144_v37 = vpop.f32.mrb[187].mxu1  ;;  %v4330_v29 = vpack.c.bf16 %v4320_v63, %v4319_v11 }
 0x35d   : > { %v6145_v59 = vadd.f32 %v6144_v37, %v6143_v4 }
 0x35e   : > { %v4295_v21 = vadd.f32 %v6142_v23, %v4198_v18  ;;  %v4201_v10 = vadd.f32 %v6081_v8, %v7796_v34  ;;  %6209 = vmatmul.mubr.bf16.gmra.mrb[200].mxu0 %v4330_v29 }
 0x360   : > { %v4298_v13 = vadd.f32 %v6145_v59, %v4201_v10  ;;  %v6082_v41 = vpop.f32.mrb[188].mxu0  ;;  %v4321_v24 = vmax.f32 %v4295_v21, 0.0 }
 0x361   : > { %v6146_v19 = vpop.f32.mrb[188].mxu1  ;;  %v6083_v20 = vpop.f32.mrb[189].mxu0 }
 0x362   : > { %v4322_v35 = vmax.f32 %v4298_v13, 0.0  ;;  %v6084_v3 = vadd.f32 %v6083_v20, %v6082_v41  ;;  %v6147_v7 = vpop.f32.mrb[189].mxu1  ;;  %v6085_v22 = vpop.f32.mrb[190].mxu0 }
 0x363   : > { %v6148_v25 = vadd.f32 %v6147_v7, %v6146_v19  ;;  %v6149_v31 = vpop.f32.mrb[190].mxu1  ;;  %v6086_v43 = vpop.f32.mrb[191].mxu0 }
 0x364   : > { %v4206_v14 = vadd.f32 %v6084_v3, %v7799_v58  ;;  %v6087_v52 = vadd.f32 %v6086_v43, %v6085_v22  ;;  %v6150_v26 = vpop.f32.mrb[191].mxu1  ;;  %v4331_v53 = vpack.c.bf16 %v4322_v35, %v4321_v24  ;;  %v5359_v58 = vld [vmem:[#allocation11] ss:$0 sm:$0xff] }
 0x365   : > { %v6151_v30 = vadd.f32 %v6150_v26, %v6149_v31 }
 0x366   : > { %v4303_v34 = vadd.f32 %v6148_v25, %v4206_v14  ;;  %v4209_v49 = vadd.f32 %v6087_v52, %v7802_v42  ;;  %6212 = vmatprep.mubr.bf16.mxu0 %v4331_v53 }
 0x368   : > { %v4306_v27 = vadd.f32 %v6151_v30, %v4209_v49  ;;  %v4323_v16 = vmax.f32 %v4303_v34, 0.0  ;;  %v7820_v49 = vld [vmem:[#allocation14] ss:$0 sm:$0xff] }
 0x36a   : > { %v4324_v44 = vmax.f32 %v4306_v27, 0.0 }
 0x36c   : > { %v4332_v62 = vpack.c.bf16 %v4324_v44, %v4323_v16 }
 0x36e   : > { %6213 = vmatmul.mubr.bf16.gmra.mrb[204].mxu0 %v4332_v62 }
 0x411   : > { %v6202_v39 = vpop.f32.mrb[192].mxu0 }
 0x412   : > { %v4447_v40 = vadd.f32 %v6202_v39, %v5359_v58  ;;  %v4438_v28 = vpop.f32.mrb[193].mxu0 }
 0x413   : > { %v4439_v55 = vadd.f32 %v5359_v58, %v4438_v28  ;;  %v6203_v51 = vpop.f32.mrb[194].mxu0 }
 0x414   : > { %v4450_v56 = vadd.f32 %v6203_v51, %v5359_v58  ;;  %v4441_v42 = vpop.f32.mrb[195].mxu0  ;;  %v4503_v54 = vmax.f32 %v4447_v40, 0.0 }
 0x415   : > { %v4442_v46 = vadd.f32 %v5359_v58, %v4441_v42  ;;  %v4501_v60 = vmax.f32 %v4439_v55, 0.0 }
 0x416   : > { %v4504_v38 = vmax.f32 %v4450_v56, 0.0 }
 0x417   : > { %v4502_v48 = vmax.f32 %v4442_v46, 0.0 }
 0x418   : > { %v4518_v0 = vpack.c.bf16 %v4504_v38, %v4503_v54 }
 0x419   : > { %v4517_v47 = vpack.c.bf16 %v4502_v48, %v4501_v60 }
 0x41b   : > { %6232 = vmatprep.mubr.bf16.mxu1 %v4517_v47 }
 0x41c   : > { %6233 = vmatmul.mubr.bf16.vlgmr.msra.gmra.mrb[192].mxu1 %v4518_v0 }
 0x421   : > { %v6206_v12 = vpop.f32.mrb[196].mxu0 }
 0x422   : > { %v4463_v57 = vadd.f32 %v6206_v12, %v5359_v58  ;;  %v4454_v36 = vpop.f32.mrb[197].mxu0 }
 0x423   : > { %v4455_v15 = vadd.f32 %v5359_v58, %v4454_v36  ;;  %v6207_v5 = vpop.f32.mrb[198].mxu0 }
 0x424   : > { %v4466_v33 = vadd.f32 %v6207_v5, %v5359_v58  ;;  %v4457_v50 = vpop.f32.mrb[199].mxu0  ;;  %v4507_v9 = vmax.f32 %v4463_v57, 0.0 }
 0x425   : > { %v4458_v17 = vadd.f32 %v5359_v58, %v4457_v50  ;;  %v4505_v63 = vmax.f32 %v4455_v15, 0.0 }
 0x426   : > { %v4508_v11 = vmax.f32 %v4466_v33, 0.0 }
 0x427   : > { %v4506_v6 = vmax.f32 %v4458_v17, 0.0 }
 0x428   : > { %v4520_v1 = vpack.c.bf16 %v4508_v11, %v4507_v9 }
 0x429   : > { %v4519_v2 = vpack.c.bf16 %v4506_v6, %v4505_v63 }
 0x42b   : > { %6236 = vmatprep.mubr.bf16.mxu1 %v4519_v2 }
 0x42c   : > { %6237 = vmatmul.mubr.bf16.gmra.mrb[196].mxu1 %v4520_v1 }
 0x431   : > { %v6210_v23 = vpop.f32.mrb[200].mxu0 }
 0x432   : > { %v4479_v4 = vadd.f32 %v6210_v23, %v5359_v58  ;;  %v4470_v45 = vpop.f32.mrb[201].mxu0 }
 0x433   : > { %v4471_v18 = vadd.f32 %v5359_v58, %v4470_v45  ;;  %v6211_v8 = vpop.f32.mrb[202].mxu0 }
 0x434   : > { %v4482_v37 = vadd.f32 %v6211_v8, %v5359_v58  ;;  %v4473_v29 = vpop.f32.mrb[203].mxu0  ;;  %v4511_v21 = vmax.f32 %v4479_v4, 0.0 }
 0x435   : > { %v4474_v59 = vadd.f32 %v5359_v58, %v4473_v29  ;;  %v4509_v13 = vmax.f32 %v4471_v18, 0.0 }
 0x436   : > { %v4512_v10 = vmax.f32 %v4482_v37, 0.0 }
 0x437   : > { %v4510_v41 = vmax.f32 %v4474_v59, 0.0 }
 0x438   : > { %v4522_v19 = vpack.c.bf16 %v4512_v10, %v4511_v21 }
 0x439   : > { %v4521_v20 = vpack.c.bf16 %v4510_v41, %v4509_v13 }
 0x43b   : > { %6240 = vmatprep.mubr.bf16.mxu1 %v4521_v20 }
 0x43c   : > { %6241 = vmatmul.mubr.bf16.gmra.mrb[200].mxu1 %v4522_v19 }
 0x441   : > { %v6214_v24 = vpop.f32.mrb[204].mxu0 }
 0x442   : > { %v4495_v35 = vadd.f32 %v6214_v24, %v5359_v58  ;;  %v4486_v3 = vpop.f32.mrb[205].mxu0 }
 0x443   : > { %v4487_v7 = vadd.f32 %v5359_v58, %v4486_v3  ;;  %v6215_v22 = vpop.f32.mrb[206].mxu0 }
 0x444   : > { %v4498_v25 = vadd.f32 %v6215_v22, %v5359_v58  ;;  %v4489_v31 = vpop.f32.mrb[207].mxu0  ;;  %v4515_v14 = vmax.f32 %v4495_v35, 0.0 }
 0x445   : > { %v4490_v43 = vadd.f32 %v5359_v58, %v4489_v31  ;;  %v4513_v26 = vmax.f32 %v4487_v7, 0.0 }
 0x446   : > { %v4516_v52 = vmax.f32 %v4498_v25, 0.0 }
 0x447   : > { %v4514_v53 = vmax.f32 %v4490_v43, 0.0 }
 0x448   : > { %v4524_v30 = vpack.c.bf16 %v4516_v52, %v4515_v14 }
 0x449   : > { %v4523_v34 = vpack.c.bf16 %v4514_v53, %v4513_v26 }
 0x44b   : > { %6244 = vmatprep.mubr.bf16.mxu1 %v4523_v34 }
 0x44c   : > { %6245 = vmatmul.mubr.bf16.gmra.mrb[204].mxu1 %v4524_v30 }
 0x4ef   : > { %v6234_v27 = vpop.f32.mrb[192].mxu1 }
 0x4f0   : > { %v4639_v16 = vadd.f32 %v6234_v27, %v7820_v49  ;;  %v4630_v44 = vpop.f32.mrb[193].mxu1 }
 0x4f1   : > { %v4631_v62 = vadd.f32 %v7820_v49, %v4630_v44  ;;  %v6235_v32 = vpop.f32.mrb[194].mxu1  ;;  %v4765_v44 = vstv %s4764_s17 }
 0x4f2   : > { %v4695_v58 = vmax.f32 %v4639_v16, 0.0  ;;  %v4642_v39 = vadd.f32 %v6235_v32, %v7820_v49  ;;  %v4633_v40 = vpop.f32.mrb[195].mxu1 }
 0x4f3   : > { %v4693_v28 = vmax.f32 %v4631_v62, 0.0  ;;  %v4634_v55 = vadd.f32 %v7820_v49, %v4633_v40 }
 0x4f4   : > { %v4696_v51 = vmax.f32 %v4642_v39, 0.0  ;;  %v4718_v56 = vmul.f32 %v7824_v61, %v4695_v58 }
 0x4f5   : > { %v4694_v42 = vmax.f32 %v4634_v55, 0.0  ;;  %v4716_v46 = vmul.f32 %v7824_v61, %v4693_v28 }
 0x4f6   : > { %4736 = vadd.xlane.f32.xlu1 %v4718_v56  ;;  %v4719_v54 = vmul.f32 %v7824_v61, %v4696_v51 }
 0x4f7   : > { %4732 = vadd.xlane.f32.xlu0 %v4716_v46  ;;  %v4717_v38 = vmul.f32 %v7824_v61, %v4694_v42 }
 0x4fa   : > { %4738 = vadd.xlane.f32.xlu1 %v4719_v54 }
 0x4fb   : > { %4734 = vadd.xlane.f32.xlu0 %v4717_v38 }
 0x4ff   : > { %v6238_v60 = vpop.f32.mrb[196].mxu1 }
 0x500   : > { %v4655_v48 = vadd.f32 %v6238_v60, %v7820_v49  ;;  %v4646_v0 = vpop.f32.mrb[197].mxu1 }
 0x501   : > { %v4647_v47 = vadd.f32 %v7820_v49, %v4646_v0  ;;  %v6239_v12 = vpop.f32.mrb[198].mxu1 }
 0x502   : > { %v4699_v57 = vmax.f32 %v4655_v48, 0.0  ;;  %v4658_v36 = vadd.f32 %v6239_v12, %v7820_v49  ;;  %v4649_v15 = vpop.f32.mrb[199].mxu1 }
 0x503   : > { %v4650_v5 = vadd.f32 %v7820_v49, %v4649_v15  ;;  %v4697_v33 = vmax.f32 %v4647_v47, 0.0 }
 0x504   : > { %v4700_v50 = vmax.f32 %v4658_v36, 0.0  ;;  %v4722_v17 = vmul.f32 %v7824_v61, %v4699_v57 }
 0x505   : > { %v4698_v9 = vmax.f32 %v4650_v5, 0.0  ;;  %v4720_v63 = vmul.f32 %v7824_v61, %v4697_v33 }
 0x506   : > { %4744 = vadd.xlane.f32.xlu0 %v4722_v17  ;;  %v4723_v11 = vmul.f32 %v7824_v61, %v4700_v50 }
 0x507   : > { %v4721_v6 = vmul.f32 %v7824_v61, %v4698_v9 }
 0x508   : > { %4746 = vadd.xlane.f32.xlu1 %v4723_v11 }
 0x50a   : > { %4740 = vadd.xlane.f32.xlu0 %v4720_v63 }
 0x50c   : > { %4742 = vadd.xlane.f32.xlu1 %v4721_v6 }
 0x50f   : > { %v6242_v1 = vpop.f32.mrb[200].mxu1 }
 0x510   : > { %v4671_v2 = vadd.f32 %v6242_v1, %v7820_v49  ;;  %v4662_v23 = vpop.f32.mrb[201].mxu1 }
 0x511   : > { %v4663_v4 = vadd.f32 %v7820_v49, %v4662_v23  ;;  %v6243_v45 = vpop.f32.mrb[202].mxu1 }
 0x512   : > { %v4703_v18 = vmax.f32 %v4671_v2, 0.0  ;;  %v4674_v8 = vadd.f32 %v6243_v45, %v7820_v49  ;;  %v4665_v37 = vpop.f32.mrb[203].mxu1 }
 0x513   : > { %v4666_v29 = vadd.f32 %v7820_v49, %v4665_v37  ;;  %v4701_v59 = vmax.f32 %v4663_v4, 0.0 }
 0x514   : > { %v4704_v21 = vmax.f32 %v4674_v8, 0.0  ;;  %v4726_v10 = vmul.f32 %v7824_v61, %v4703_v18 }
 0x515   : > { %v4702_v13 = vmax.f32 %v4666_v29, 0.0  ;;  %v4724_v19 = vmul.f32 %v7824_v61, %v4701_v59 }
 0x516   : > { %4752 = vadd.xlane.f32.xlu0 %v4726_v10  ;;  %v4727_v41 = vmul.f32 %v7824_v61, %v4704_v21 }
 0x517   : > { %v4725_v20 = vmul.f32 %v7824_v61, %v4702_v13 }
 0x518   : > { %4754 = vadd.xlane.f32.xlu1 %v4727_v41 }
 0x51a   : > { %4748 = vadd.xlane.f32.xlu0 %v4724_v19 }
 0x51c   : > { %4750 = vadd.xlane.f32.xlu1 %v4725_v20 }
 0x51f   : > { %v6246_v24 = vpop.f32.mrb[204].mxu1 }
 0x520   : > { %v4678_v35 = vpop.f32.mrb[205].mxu1  ;;  %v4687_v3 = vadd.f32 %v6246_v24, %v7820_v49 }
 0x521   : > { %v4679_v7 = vadd.f32 %v7820_v49, %v4678_v35  ;;  %v6247_v22 = vpop.f32.mrb[206].mxu1 }
 0x522   : > { %v4681_v25 = vpop.f32.mrb[207].mxu1  ;;  %v4690_v43 = vadd.f32 %v6247_v22, %v7820_v49  ;;  %v4707_v52 = vmax.f32 %v4687_v3, 0.0 }
 0x523   : > { %v4705_v31 = vmax.f32 %v4679_v7, 0.0  ;;  %v4682_v14 = vadd.f32 %v7820_v49, %v4681_v25 }
 0x524   : > { %v4708_v30 = vmax.f32 %v4690_v43, 0.0  ;;  %v4730_v27 = vmul.f32 %v7824_v61, %v4707_v52 }
 0x525   : > { %v4706_v26 = vmax.f32 %v4682_v14, 0.0  ;;  %v4728_v53 = vmul.f32 %v7824_v61, %v4705_v31 }
 0x526   : > { %v4731_v16 = vmul.f32 %v7824_v61, %v4708_v30 }
 0x527   : > { %4756 = vadd.xlane.f32.xlu0 %v4728_v53  ;;  %v4729_v34 = vmul.f32 %v7824_v61, %v4706_v26 }
 0x529   : > { %4758 = vadd.xlane.f32.xlu1 %v4729_v34 }
 0x52b   : > { %4760 = vadd.xlane.f32.xlu0 %v4730_v27 }
 0x52d   : > { %4762 = vadd.xlane.f32.xlu1 %v4731_v16 }
 0x583   : > { %v4737_v62 = vpop.xlane.xlu1 %4736 }
 0x584   : > { %v4768_v49 = vadd.f32 %v4765_v44, %v4737_v62  ;;  %v4733_v32 = vpop.xlane.xlu0 %4732 }
 0x585   : > { %v4766_v58 = vadd.f32 %v4765_v44, %v4733_v32 }
 0x586   : > { %4784 = vst [vmem:[%s7857_s27 + $0x10] sm:$0xff] %v4768_v49 }
 0x587   : > { %4782 = vst [vmem:[%s7857_s27] sm:$0xff] %v4766_v58  ;;  %v4739_v61 = vpop.xlane.xlu1 %4738 }
 0x588   : > { %v4769_v39 = vadd.f32 %v4765_v44, %v4739_v61  ;;  %v4735_v40 = vpop.xlane.xlu0 %4734 }
 0x589   : > { %v4767_v28 = vadd.f32 %v4765_v44, %v4735_v40 }
 0x58a   : > { %4785 = vst [vmem:[%s7857_s27 + $0x18] sm:$0xff] %v4769_v39 }
 0x58b   : > { %4783 = vst [vmem:[%s7857_s27 + $0x8] sm:$0xff] %v4767_v28 }
 0x593   : > { %v4745_v55 = vpop.xlane.xlu0 %4744 }
 0x594   : > { %v4772_v51 = vadd.f32 %v4765_v44, %v4745_v55 }
 0x595   : > { %v4747_v56 = vpop.xlane.xlu1 %4746 }
 0x596   : > { %4788 = vst [vmem:[%s7857_s27 + $0x30] sm:$0xff] %v4772_v51  ;;  %v4773_v42 = vadd.f32 %v4765_v44, %v4747_v56 }
 0x597   : > { %v4741_v46 = vpop.xlane.xlu0 %4740 }
 0x598   : > { %4789 = vst [vmem:[%s7857_s27 + $0x38] sm:$0xff] %v4773_v42  ;;  %v4770_v54 = vadd.f32 %v4765_v44, %v4741_v46 }
 0x599   : > { %v4743_v38 = vpop.xlane.xlu1 %4742 }
 0x59a   : > { %4786 = vst [vmem:[%s7857_s27 + $0x20] sm:$0xff] %v4770_v54  ;;  %v4771_v60 = vadd.f32 %v4765_v44, %v4743_v38 }
 0x59c   : > { %4787 = vst [vmem:[%s7857_s27 + $0x28] sm:$0xff] %v4771_v60 }
 0x5a3   : > { %v4753_v48 = vpop.xlane.xlu0 %4752 }
 0x5a4   : > { %v4776_v0 = vadd.f32 %v4765_v44, %v4753_v48 }
 0x5a5   : > { %v4755_v47 = vpop.xlane.xlu1 %4754 }
 0x5a6   : > { %4792 = vst [vmem:[%s7857_s27 + $0x50] sm:$0xff] %v4776_v0  ;;  %v4777_v12 = vadd.f32 %v4765_v44, %v4755_v47 }
 0x5a7   : > { %v4749_v57 = vpop.xlane.xlu0 %4748 }
 0x5a8   : > { %4793 = vst [vmem:[%s7857_s27 + $0x58] sm:$0xff] %v4777_v12  ;;  %v4774_v36 = vadd.f32 %v4765_v44, %v4749_v57 }
 0x5a9   : > { %v4751_v15 = vpop.xlane.xlu1 %4750 }
 0x5aa   : > { %4790 = vst [vmem:[%s7857_s27 + $0x40] sm:$0xff] %v4774_v36  ;;  %v4775_v5 = vadd.f32 %v4765_v44, %v4751_v15 }
 0x5ac   : > { %4791 = vst [vmem:[%s7857_s27 + $0x48] sm:$0xff] %v4775_v5 }
 0x5b4   : > { %v4757_v33 = vpop.xlane.xlu0 %4756 }
 0x5b5   : > { %v4778_v50 = vadd.f32 %v4765_v44, %v4757_v33 }
 0x5b6   : > { %v4759_v17 = vpop.xlane.xlu1 %4758 }
 0x5b7   : > { %4794 = vst [vmem:[%s7857_s27 + $0x60] sm:$0xff] %v4778_v50  ;;  %v4779_v9 = vadd.f32 %v4765_v44, %v4759_v17 }
 0x5b8   : > { %v4761_v11 = vpop.xlane.xlu0 %4760 }
 0x5b9   : > { %4795 = vst [vmem:[%s7857_s27 + $0x68] sm:$0xff] %v4779_v9  ;;  %v4780_v63 = vadd.f32 %v4765_v44, %v4761_v11 }
 0x5ba   : > { %v4763_v6 = vpop.xlane.xlu1 %4762 }
 0x5bb   : > { %4796 = vst [vmem:[%s7857_s27 + $0x70] sm:$0xff] %v4780_v63  ;;  %v4781_v1 = vadd.f32 %v4765_v44, %v4763_v6 }
 0x5bd   : > { %4797 = vst [vmem:[%s7857_s27 + $0x78] sm:$0xff] %v4781_v1 }
 0x5be   : > { %6821 = shalt.err (!%p6818_p10)
}
 0x5bf   : > { %s6822_s10 = scalar_lea.hbm %s7878_s19, 2048  ;;  %s6826_s8 = scalar_lea.hbm %s7935_s9, 4096 }
 0x5c0   : > { %p6823_p11 = scmp.ne.s32.totalorder %s7878_s19, %s6822_s10  ;;  %p6827_p9 = scmp.lt.u32.totalorder %s7878_s19, %s7935_s9 }
 0x5c1   : > { %p6828_p7 = scmp.lt.u32.totalorder %s6826_s8, %s6822_s10  ;;  %p6830_p12 = scmp.lt.u32.totalorder %s6822_s10, %s7878_s19 }
 0x5c2   : > { %p6824_p0 = pnand %p6823_p11, %p7960_p13 }
 0x5c3   : > { %p6829_p4 = por %p6828_p7, %p6827_p9 }
 0x5c4   : > { %p6825_p5 = pneg %p6824_p0 }
 0x5c5   : > { %p6831_p1 = por %p6830_p12, %p6829_p4 }
 0x5c7   : > { %p6832_p3 = pnand %p6831_p1, %p6825_p5 }
 0x5c9   : > { %6835 = shalt.err (!%p6832_p3)
}
 0x5ca   : > { %s6905_s28 = smov 128   ;;  %s6906_s25 = smov 8  }
 0x5cb   : > { %6281 = dma.vmem_to_hbm [thread:$0]  (%p7960_p13), %s7880_s26, 2048, %s7878_s19, %s4799_s2, %s6905_s28, %s6905_s28, %s6906_s25  }
 0x5cc PF: > { %s4827_s16 = sand.u32 1, %s6878_s11   ;;  %p7961_p2 = scmp.ne.s32.totalorder %s7949_s23, 0 }
 0x5cd   : > { %p7962_p8 = scmp.ge.s32.totalorder %s6890_s14, 2  ;;  %s4828_s24 = scalar_lea.sflag [#allocation5], %s4827_s16 }
 0x5cf   : > { %p6310_p6 = pnand %p7962_p8, %p7961_p2 }
 0x5d1   : > { %6873 = dma.done.wait (!%p6310_p6), %s4828_s24, 2048  }
 0x5d2   : > { %6875 = vsyncadd (!%p6310_p6), %s4828_s24, 4294965248  ;;  %p27_p10 = scmp.ge.s32.totalorder %s7163_s20, 4   ;;  %s7963_s11 = smov %s6882_s12 }
 0x5d3   : > { %s7964_s12 = smov %s6886_s13  ;;  %s7965_s13 = smov %s7175_s22 }
 0x5d4   : > { %s7966_s14 = smov %s7163_s20  ;;  %29 = sbr.rel (!%p27_p10) target bundleno = 13 (0xd), region = 129 }
 0x5db   :  { %4833 = vsyncpa [#allocation4], 1 }
 0x5dc   :  { %4835 = vsyncpa [#allocation4 + $0x1], 1 }
 0x5dd   :  { %4836 = vsyncpa [#allocation7], 1 }
 0x5de   :  { %4837 = vsyncpa [#allocation10], 1 }
 0x5df   :  { %4838 = vsyncpa [#allocation13], 1 }
 0x5e0   :  { %4839 = vsyncpa [#allocation16], 1 }
 0x5e1   :  { %4840 = vsyncpa [#allocation5], 1 }
 0x5e2   :  { %4842 = vsyncpa [#allocation5 + $0x1], 1 }

</bundles_post_ra>
